<compile_context>
chip_gen: v5e
topology: v5e:2x2
jax: 0.10.0
libtpu: 0.0.40
codegen_flags: <defaults>
</compile_context>

<pallas_src>
import functools

import jax
import jax.numpy as jnp
from jax.experimental import pallas as pl
from jax.experimental.pallas import tpu as pltpu


def _round_up(x, m):
    return ((x + m - 1) // m) * m


def _cdiv(a, b):
    return -(-a // b)


# --------------------------------------------------------------------------
# Pallas kernel: fused (pre_act -> K-tiled MXU matmul -> +shift -> post_act)
# --------------------------------------------------------------------------
def _fused_matmul_kernel(a_ref, b_ref, shift_ref, o_ref, acc_ref, *, pre_act, post_act):
    k_id = pl.program_id(2)

    @pl.when(k_id == 0)
    def _init():
        acc_ref[...] = jnp.zeros_like(acc_ref)

    a = a_ref[...]
    if pre_act == "leaky":            # LeakyReLU(0.2) on the conv input (f32 VPU math)
        af = a.astype(jnp.float32)
        a = jnp.where(af >= 0.0, af, 0.2 * af).astype(a_ref.dtype)
    elif pre_act == "relu":           # ReLU is exact in bf16
        a = jnp.maximum(a, jnp.zeros_like(a))

    acc_ref[...] += jnp.dot(a, b_ref[...], preferred_element_type=jnp.float32)

    @pl.when(k_id == pl.num_programs(2) - 1)
    def _finalize():
        res = acc_ref[...] + shift_ref[...]     # folded conv-bias + BatchNorm shift
        if post_act == "tanh":
            res = jnp.tanh(res)
        o_ref[...] = res.astype(o_ref.dtype)


def fused_matmul(a, b, shift, pre_act="none", post_act="none", out_dtype=jnp.bfloat16):
    """a: (M, K) bf16 patches, b: (K, N) bf16 folded weights, shift: (N,) f32.
    Returns (M, N) in out_dtype.  Tiled over (M, N, K) with an f32 accumulator."""
    M, K = a.shape
    _, N = b.shape

    # ---- N tiling: lane-dense, multiples of 128, tiles <= 512 ----
    n128 = _round_up(N, 128)
    nn = _cdiv(n128, 512)
    tn = 128 * _cdiv(n128 // 128, nn)
    n_pad = tn * nn

    # ---- K tiling: single step if K small (block == full dim), else 128-mult tiles ----
    if K <= 2048:
        tk, k_pad, nk = K, K, 1
    else:
        k128 = _round_up(K, 128)
        nk = _cdiv(k128, 2048)
        tk = 128 * _cdiv(k128 // 128, nk)
        k_pad = tk * nk

    # ---- M tiling: budget-based cap, multiple of 8 ----
    tm_cap = 512 if tk * tn <= 512 * 1024 else 256
    tm = min(tm_cap, _round_up(M, 8))
    m_pad = _round_up(M, tm)
    nm = m_pad // tm

    a_p = a if (m_pad, k_pad) == (M, K) else jnp.pad(a, ((0, m_pad - M), (0, k_pad - K)))
    b_p = b if (k_pad, n_pad) == (K, N) else jnp.pad(b, ((0, k_pad - K), (0, n_pad - N)))
    shift_p = shift.reshape(1, N).astype(jnp.float32)
    if n_pad != N:
        shift_p = jnp.pad(shift_p, ((0, 0), (0, n_pad - N)))

    kernel = functools.partial(_fused_matmul_kernel, pre_act=pre_act, post_act=post_act)
    out = pl.pallas_call(
        kernel,
        out_shape=jax.ShapeDtypeStruct((m_pad, n_pad), out_dtype),
        grid=(nm, nn, nk),
        in_specs=[
            pl.BlockSpec((tm, tk), lambda i, j, kk: (i, kk)),
            pl.BlockSpec((tk, tn), lambda i, j, kk: (kk, j)),
            pl.BlockSpec((1, tn), lambda i, j, kk: (0, j)),
        ],
        out_specs=pl.BlockSpec((tm, tn), lambda i, j, kk: (i, j)),
        scratch_shapes=[pltpu.VMEM((tm, tn), jnp.float32)],
        compiler_params=pltpu.CompilerParams(
            dimension_semantics=("parallel", "parallel", "arbitrary")),
    )(a_p, b_p, shift_p)

    if (m_pad, n_pad) != (M, N):
        out = out[:M, :N]
    return out


# --------------------------------------------------------------------------
# Conv / ConvTranspose built on top of the Pallas matmul (NHWC, bf16)
# --------------------------------------------------------------------------
def _im2col_nhwc(x, k, stride, pad_hw):
    """x: (B, H, W, C) -> patches (B*Ho*Wo, k*k*C) ordered (kh, kw, C)."""
    B, H, W, C = x.shape
    (pt, pb), (pl_, pr) = pad_hw
    Ho = (H + pt + pb - k) // stride + 1
    Wo = (W + pl_ + pr - k) // stride + 1
    xp = jnp.pad(x, ((0, 0), (pt, pb), (pl_, pr), (0, 0)))
    cols = []
    for ki in range(k):
        for kj in range(k):
            cols.append(xp[:, ki:ki + stride * (Ho - 1) + 1:stride,
                              kj:kj + stride * (Wo - 1) + 1:stride, :])
    pat = jnp.concatenate(cols, axis=-1)               # (B, Ho, Wo, k*k*C)
    return pat.reshape(B * Ho * Wo, k * k * C), (B, Ho, Wo)


def _fold(bias, scale, shift, cout):
    bias = jnp.zeros((cout,), jnp.float32) if bias is None else bias.astype(jnp.float32)
    scale = jnp.ones((cout,), jnp.float32) if scale is None else scale.astype(jnp.float32)
    shift = jnp.zeros((cout,), jnp.float32) if shift is None else shift.astype(jnp.float32)
    return scale, bias * scale + shift


def conv2d_nhwc(x, w, bias=None, scale=None, shift=None, *, stride, pad,
                pre_act="none", post_act="none", out_dtype=jnp.bfloat16):
    """PyTorch-semantics Conv2d. x: (B,H,W,Cin) NHWC, w: (Cout, Cin, k, k)."""
    cout, cin, k, _ = w.shape
    scale_v, shift_tot = _fold(bias, scale, shift, cout)
    wm = w.transpose(2, 3, 1, 0).reshape(k * k * cin, cout)          # (kh,kw,Cin) -> Cout
    wm = (wm * scale_v[None, :]).astype(jnp.bfloat16)                # fold BN scale
    a, (B, Ho, Wo) = _im2col_nhwc(x, k, stride, ((pad, pad), (pad, pad)))
    y = fused_matmul(a, wm, shift_tot, pre_act=pre_act, post_act=post_act,
                     out_dtype=out_dtype)
    return y.reshape(B, Ho, Wo, cout)


_TAP_SEL = ((3, 1), (2, 0))    # parity 0 uses kernel taps {3,1}, parity 1 uses {2,0}


def _interleave_2x2(y00, y01, y10, y11):
    B, H, W, C = y00.shape
    r0 = jnp.stack([y00, y01], axis=3).reshape(B, H, 2 * W, C)
    r1 = jnp.stack([y10, y11], axis=3).reshape(B, H, 2 * W, C)
    return jnp.stack([r0, r1], axis=2).reshape(B, 2 * H, 2 * W, C)


def conv_transpose2d_nhwc(x, w, bias=None, scale=None, shift=None, *,
                          pre_act="none", post_act="none", out_dtype=jnp.bfloat16):
    """PyTorch ConvTranspose2d(k=4, stride=2, pad=1) via sub-pixel decomposition.
    x: (B,H,W,Cin) NHWC; w: (Cin, Cout, 4, 4) PyTorch layout."""
    cin, cout, _, _ = w.shape
    scale_v, shift_tot = _fold(bias, scale, shift, cout)

    outs = []
    for po in range(2):
        for qo in range(2):
            khs = jnp.array(_TAP_SEL[po], dtype=jnp.int32)
            kws = jnp.array(_TAP_SEL[qo], dtype=jnp.int32)
            w_sub = jnp.take(jnp.take(w, khs, axis=2), kws, axis=3)  # (Cin,Cout,2,2)
            wm = w_sub.transpose(2, 3, 0, 1).reshape(4 * cin, cout)  # (r,s,Cin) -> Cout
            wm = (wm * scale_v[None, :]).astype(jnp.bfloat16)
            pad_h = (1 - po, po)
            pad_w = (1 - qo, qo)
            a, (B, Ho, Wo) = _im2col_nhwc(x, 2, 1, (pad_h, pad_w))
            # pre_act(0) == 0 for relu, so activating the zero-padded border is exact.
            y = fused_matmul(a, wm, shift_tot, pre_act=pre_act, post_act=post_act,
                             out_dtype=out_dtype)
            outs.append(y.reshape(B, Ho, Wo, cout))
    return _interleave_2x2(*outs)


# --------------------------------------------------------------------------
# Deterministic parameter construction (mirrors weights_init_normal + BN init)
# --------------------------------------------------------------------------
def _conv_w(key, cout, cin, k=4):
    return 0.02 * jax.random.normal(key, (cout, cin, k, k), jnp.float32)


def _convT_w(key, cin, cout, k=4):
    return 0.02 * jax.random.normal(key, (cin, cout, k, k), jnp.float32)


def _bn(key, c, eps=1e-5):
    gamma = 1.0 + 0.02 * jax.random.normal(key, (c,), jnp.float32)
    beta = jnp.zeros((c,), jnp.float32)
    # eval mode: running_mean = 0, running_var = 1
    scale = gamma / jnp.sqrt(1.0 + eps)
    shift = beta
    return scale, shift


def build_block(key, outer_nc, inner_nc, input_nc=None, sub=None,
                outermost=False, innermost=False):
    if input_nc is None:
        input_nc = outer_nc
    k0, k1, k2, k3 = jax.random.split(key, 4)
    p = {"dw": _conv_w(k0, inner_nc, input_nc)}       # downconv (bias=False, batch norm)
    if outermost:
        p["type"] = "outermost"
        p["uw"] = _convT_w(k1, inner_nc * 2, outer_nc)
        p["ub"] = jnp.zeros((outer_nc,), jnp.float32)  # default ConvTranspose bias
        p["sub"] = sub
    elif innermost:
        p["type"] = "innermost"
        p["uw"] = _convT_w(k1, inner_nc, outer_nc)
        p["up_scale"], p["up_shift"] = _bn(k2, outer_nc)
    else:
        p["type"] = "middle"
        p["dn_scale"], p["dn_shift"] = _bn(k2, inner_nc)
        p["uw"] = _convT_w(k1, inner_nc * 2, outer_nc)
        p["up_scale"], p["up_shift"] = _bn(k3, outer_nc)
        p["sub"] = sub
    return p


def build_unet(key, input_nc, output_nc, num_downs, ngf):
    keys = jax.random.split(key, num_downs + 1)
    blk = build_block(keys[0], ngf * 8, ngf * 8, innermost=True)
    ki = 1
    for _ in range(num_downs - 5):
        blk = build_block(keys[ki], ngf * 8, ngf * 8, sub=blk)
        ki += 1
    blk = build_block(keys[ki], ngf * 4, ngf * 8, sub=blk); ki += 1
    blk = build_block(keys[ki], ngf * 2, ngf * 4, sub=blk); ki += 1
    blk = build_block(keys[ki], ngf * 1, ngf * 2, sub=blk); ki += 1
    blk = build_block(keys[ki], output_nc, ngf, input_nc=input_nc, sub=blk,
                      outermost=True)
    return blk


# --------------------------------------------------------------------------
# UnetSkipConnectionBlock / UnetGenerator forward (NHWC internal layout)
# --------------------------------------------------------------------------
def apply_block(p, x):
    t = p["type"]
    if t == "outermost":
        # [downconv] -> submodule -> [ReLU, ConvTranspose(bias), Tanh]
        d = conv2d_nhwc(x, p["dw"], stride=2, pad=1, pre_act="none")
        s = apply_block(p["sub"], d)
        return conv_transpose2d_nhwc(s, p["uw"], bias=p["ub"], pre_act="relu",
                                     post_act="tanh", out_dtype=jnp.float32)
    elif t == "innermost":
        # [LeakyReLU, downconv] -> [ReLU, ConvTranspose, BN]; skip concat
        d = conv2d_nhwc(x, p["dw"], stride=2, pad=1, pre_act="leaky")
        u = conv_transpose2d_nhwc(d, p["uw"], scale=p["up_scale"], shift=p["up_shift"],
                                  pre_act="relu")
        return jnp.concatenate([x, u], axis=-1)
    else:
        # [LeakyReLU, downconv, BN] -> submodule -> [ReLU, ConvTranspose, BN] (+Dropout)
        d = conv2d_nhwc(x, p["dw"], scale=p["dn_scale"], shift=p["dn_shift"],
                        stride=2, pad=1, pre_act="leaky")
        s = apply_block(p["sub"], d)
        u = conv_transpose2d_nhwc(s, p["uw"], scale=p["up_scale"], shift=p["up_shift"],
                                  pre_act="relu")
        # TODO(synk): Dropout(0.5) is identity in eval mode (training-only stochastic op).
        return jnp.concatenate([x, u], axis=-1)


def pix2pix_forward(params, input_, output_):
    """Pix2Pix.forward: returns (real_output, fake_output). I/O in NCHW."""
    x = jnp.transpose(input_, (0, 2, 3, 1)).astype(jnp.bfloat16)   # NCHW -> NHWC, bf16
    fake = apply_block(params, x)                                  # NHWC, f32 (tanh head)
    fake_output = jnp.transpose(fake, (0, 3, 1, 2))                # NHWC -> NCHW
    return output_, fake_output


# --------------------------------------------------------------------------
# Demo
# --------------------------------------------------------------------------
if __name__ == "__main__":
    # Small shapes consistent with the module: NCHW images, generator is a
    # num_downs-deep U-Net (num_downs=5 needs spatial 32; the real model uses
    # num_downs=8 / 256x256 / ngf=64 — same code path, scaled down here).
    B, INPUT_NC, OUTPUT_NC = 2, 3, 1
    H = W = 32
    NUM_DOWNS, NGF = 5, 8

    root = jax.random.PRNGKey(0)
    kp, ki, ko = jax.random.split(root, 3)

    params = build_unet(kp, INPUT_NC, OUTPUT_NC, NUM_DOWNS, NGF)
    input_ = jax.random.normal(ki, (B, INPUT_NC, H, W), jnp.float32)
    output_ = jax.random.normal(ko, (B, OUTPUT_NC, H, W), jnp.float32)

    fwd = jax.jit(lambda a, b: pix2pix_forward(params, a, b))
    real_out, fake_out = fwd(input_, output_)
    jax.block_until_ready((real_out, fake_out))

    assert real_out.shape == (B, OUTPUT_NC, H, W)
    assert fake_out.shape == (B, OUTPUT_NC, H, W)
    assert bool(jnp.all(jnp.abs(fake_out) <= 1.0 + 1e-6))  # tanh head
    print("KERNEL_OK")
</pallas_src>

<mosaic_0001>
module attributes {stable_mosaic.version = 11 : i64} {
  func.func @_fused_matmul_kernel(%arg0: i32, %arg1: i32, %arg2: i32, %arg3: memref<512x48xbf16, #tpu.memory_space<vmem>>, %arg4: memref<48x128xbf16, #tpu.memory_space<vmem>>, %arg5: memref<1x128xf32, #tpu.memory_space<vmem>>, %arg6: memref<512x128xbf16, #tpu.memory_space<vmem>>, %arg7: memref<512x128xf32, #tpu.memory_space<vmem>>) attributes {dimension_semantics = [#tpu.dimension_semantics<parallel>, #tpu.dimension_semantics<parallel>, #tpu.dimension_semantics<arbitrary>], iteration_bounds = array<i64: 1, 1, 1>, scalar_prefetch = 0 : i64, scratch_operands = 1 : i64, tpu.core_type = #tpu.core_type<tc>, window_params = [{transform_indices = @transform_0, window_bounds = array<i64: 512, 48>}, {transform_indices = @transform_1, window_bounds = array<i64: 48, 128>}, {transform_indices = @transform_2, window_bounds = array<i64: 1, 128>}, {transform_indices = @transform_3, window_bounds = array<i64: 512, 128>}]} {
    %c0_i32 = arith.constant 0 : i32
    %0 = arith.cmpi eq, %arg2, %c0_i32 : i32
    %1 = arith.extui %0 : i1 to i32
    %c0_i32_0 = arith.constant 0 : i32
    %2 = arith.cmpi ne, %1, %c0_i32_0 : i32
    scf.if %2 {
      %cst_10 = arith.constant 0.000000e+00 : f32
      %12 = vector.broadcast %cst_10 : f32 to vector<512x128xf32>
      %c0_11 = arith.constant 0 : index
      %c0_12 = arith.constant 0 : index
      %13 = vector.load %arg7[%c0_11, %c0_12] : memref<512x128xf32, #tpu.memory_space<vmem>>, vector<512x128xf32>
      tpu.vector_store %arg7[%c0_11, %c0_12], %12 {strides = array<i32>} : memref<512x128xf32, #tpu.memory_space<vmem>>, vector<512x128xf32>,
    } else {
    }
    %c0 = arith.constant 0 : index
    %c0_1 = arith.constant 0 : index
    %3 = vector.load %arg3[%c0, %c0_1] : memref<512x48xbf16, #tpu.memory_space<vmem>>, vector<512x48xbf16>
    %c0_2 = arith.constant 0 : index
    %c0_3 = arith.constant 0 : index
    %4 = vector.load %arg7[%c0_2, %c0_3] : memref<512x128xf32, #tpu.memory_space<vmem>>, vector<512x128xf32>
    %c0_4 = arith.constant 0 : index
    %c0_5 = arith.constant 0 : index
    %5 = vector.load %arg4[%c0_4, %c0_5] : memref<48x128xbf16, #tpu.memory_space<vmem>>, vector<48x128xbf16>
    %cst = arith.constant dense<0.000000e+00> : vector<512x128xf32>
    %6 = tpu.matmul %3, %5, %cst {dimension_numbers = #tpu.dot_dimension_numbers<[1], [0], [0], [1], [0, 0, 1, 1], [], []>} : vector<512x48xbf16>, vector<48x128xbf16>, vector<512x128xf32> -> vector<512x128xf32>
    %7 = arith.addf %4, %6 : vector<512x128xf32>
    %c0_6 = arith.constant 0 : index
    %c0_7 = arith.constant 0 : index
    %8 = vector.load %arg7[%c0_6, %c0_7] : memref<512x128xf32, #tpu.memory_space<vmem>>, vector<512x128xf32>
    tpu.vector_store %arg7[%c0_6, %c0_7], %7 {strides = array<i32>} : memref<512x128xf32, #tpu.memory_space<vmem>>, vector<512x128xf32>,
    %c0_i32_8 = arith.constant 0 : i32
    %9 = arith.cmpi eq, %arg2, %c0_i32_8 : i32
    %10 = arith.extui %9 : i1 to i32
    %c0_i32_9 = arith.constant 0 : i32
    %11 = arith.cmpi ne, %10, %c0_i32_9 : i32
    scf.if %11 {
      %c0_10 = arith.constant 0 : index
      %c0_11 = arith.constant 0 : index
      %12 = vector.load %arg7[%c0_10, %c0_11] : memref<512x128xf32, #tpu.memory_space<vmem>>, vector<512x128xf32>
      %c0_12 = arith.constant 0 : index
      %c0_13 = arith.constant 0 : index
      %13 = vector.load %arg5[%c0_12, %c0_13] : memref<1x128xf32, #tpu.memory_space<vmem>>, vector<1x128xf32>
      %14 = vector.broadcast %13 : vector<1x128xf32> to vector<512x128xf32>
      %15 = arith.addf %12, %14 : vector<512x128xf32>
      %16 = arith.truncf %15 : vector<512x128xf32> to vector<512x128xbf16>
      %c0_14 = arith.constant 0 : index
      %c0_15 = arith.constant 0 : index
      %17 = vector.load %arg6[%c0_14, %c0_15] : memref<512x128xbf16, #tpu.memory_space<vmem>>, vector<512x128xbf16>
      tpu.vector_store %arg6[%c0_14, %c0_15], %16 {strides = array<i32>} : memref<512x128xbf16, #tpu.memory_space<vmem>>, vector<512x128xbf16>,
    } else {
    }
    return
  }
  func.func @transform_0(%arg0: i32, %arg1: i32, %arg2: i32) -> (i32, i32) {
    %c0_i32 = arith.constant 0 : i32
    return %arg0, %arg2 : i32, i32
  }
  func.func @transform_1(%arg0: i32, %arg1: i32, %arg2: i32) -> (i32, i32) {
    %c0_i32 = arith.constant 0 : i32
    return %arg2, %arg1 : i32, i32
  }
  func.func @transform_2(%arg0: i32, %arg1: i32, %arg2: i32) -> (i32, i32) {
    %c0_i32 = arith.constant 0 : i32
    %c0_i32_0 = arith.constant 0 : i32
    return %c0_i32, %arg1 : i32, i32
  }
  func.func @transform_3(%arg0: i32, %arg1: i32, %arg2: i32) -> (i32, i32) {
    %c0_i32 = arith.constant 0 : i32
    return %arg0, %arg1 : i32, i32
  }
}

module attributes {stable_mosaic.version = 11 : i64} {
  func.func @_fused_matmul_kernel(%arg0: i32, %arg1: i32, %arg2: i32, %arg3: memref<128x128xbf16, #tpu.memory_space<vmem>>, %arg4: memref<128x128xbf16, #tpu.memory_space<vmem>>, %arg5: memref<1x128xf32, #tpu.memory_space<vmem>>, %arg6: memref<128x128xbf16, #tpu.memory_space<vmem>>, %arg7: memref<128x128xf32, #tpu.memory_space<vmem>>) attributes {dimension_semantics = [#tpu.dimension_semantics<parallel>, #tpu.dimension_semantics<parallel>, #tpu.dimension_semantics<arbitrary>], iteration_bounds = array<i64: 1, 1, 1>, scalar_prefetch = 0 : i64, scratch_operands = 1 : i64, tpu.core_type = #tpu.core_type<tc>, window_params = [{transform_indices = @transform_0, window_bounds = array<i64: 128, 128>}, {transform_indices = @transform_1, window_bounds = array<i64: 128, 128>}, {transform_indices = @transform_2, window_bounds = array<i64: 1, 128>}, {transform_indices = @transform_3, window_bounds = array<i64: 128, 128>}]} {
    %c0_i32 = arith.constant 0 : i32
    %0 = arith.cmpi eq, %arg2, %c0_i32 : i32
    %1 = arith.extui %0 : i1 to i32
    %c0_i32_0 = arith.constant 0 : i32
    %2 = arith.cmpi ne, %1, %c0_i32_0 : i32
    scf.if %2 {
      %cst_12 = arith.constant 0.000000e+00 : f32
      %19 = vector.broadcast %cst_12 : f32 to vector<128x128xf32>
      %c0_13 = arith.constant 0 : index
      %c0_14 = arith.constant 0 : index
      %20 = vector.load %arg7[%c0_13, %c0_14] : memref<128x128xf32, #tpu.memory_space<vmem>>, vector<128x128xf32>
      tpu.vector_store %arg7[%c0_13, %c0_14], %19 {strides = array<i32>} : memref<128x128xf32, #tpu.memory_space<vmem>>, vector<128x128xf32>,
    } else {
    }
    %c0 = arith.constant 0 : index
    %c0_1 = arith.constant 0 : index
    %3 = vector.load %arg3[%c0, %c0_1] : memref<128x128xbf16, #tpu.memory_space<vmem>>, vector<128x128xbf16>
    %4 = arith.extf %3 : vector<128x128xbf16> to vector<128x128xf32>
    %cst = arith.constant 0.000000e+00 : f32
    %5 = vector.broadcast %cst : f32 to vector<128x128xf32>
    %6 = arith.cmpf oge, %4, %5 : vector<128x128xf32>
    %cst_2 = arith.constant 2.000000e-01 : f32
    %7 = vector.broadcast %cst_2 : f32 to vector<128x128xf32>
    %8 = arith.mulf %7, %4 : vector<128x128xf32>
    %9 = arith.select %6, %4, %8 : vector<128x128xi1>, vector<128x128xf32>
    %10 = arith.truncf %9 : vector<128x128xf32> to vector<128x128xbf16>
    %c0_3 = arith.constant 0 : index
    %c0_4 = arith.constant 0 : index
    %11 = vector.load %arg7[%c0_3, %c0_4] : memref<128x128xf32, #tpu.memory_space<vmem>>, vector<128x128xf32>
    %c0_5 = arith.constant 0 : index
    %c0_6 = arith.constant 0 : index
    %12 = vector.load %arg4[%c0_5, %c0_6] : memref<128x128xbf16, #tpu.memory_space<vmem>>, vector<128x128xbf16>
    %cst_7 = arith.constant dense<0.000000e+00> : vector<128x128xf32>
    %13 = tpu.matmul %10, %12, %cst_7 {dimension_numbers = #tpu.dot_dimension_numbers<[1], [0], [0], [1], [0, 0, 1, 1], [], []>} : vector<128x128xbf16>, vector<128x128xbf16>, vector<128x128xf32> -> vector<128x128xf32>
    %14 = arith.addf %11, %13 : vector<128x128xf32>
    %c0_8 = arith.constant 0 : index
    %c0_9 = arith.constant 0 : index
    %15 = vector.load %arg7[%c0_8, %c0_9] : memref<128x128xf32, #tpu.memory_space<vmem>>, vector<128x128xf32>
    tpu.vector_store %arg7[%c0_8, %c0_9], %14 {strides = array<i32>} : memref<128x128xf32, #tpu.memory_space<vmem>>, vector<128x128xf32>,
    %c0_i32_10 = arith.constant 0 : i32
    %16 = arith.cmpi eq, %arg2, %c0_i32_10 : i32
    %17 = arith.extui %16 : i1 to i32
    %c0_i32_11 = arith.constant 0 : i32
    %18 = arith.cmpi ne, %17, %c0_i32_11 : i32
    scf.if %18 {
      %c0_12 = arith.constant 0 : index
      %c0_13 = arith.constant 0 : index
      %19 = vector.load %arg7[%c0_12, %c0_13] : memref<128x128xf32, #tpu.memory_space<vmem>>, vector<128x128xf32>
      %c0_14 = arith.constant 0 : index
      %c0_15 = arith.constant 0 : index
      %20 = vector.load %arg5[%c0_14, %c0_15] : memref<1x128xf32, #tpu.memory_space<vmem>>, vector<1x128xf32>
      %21 = vector.broadcast %20 : vector<1x128xf32> to vector<128x128xf32>
      %22 = arith.addf %19, %21 : vector<128x128xf32>
      %23 = arith.truncf %22 : vector<128x128xf32> to vector<128x128xbf16>
      %c0_16 = arith.constant 0 : index
      %c0_17 = arith.constant 0 : index
      %24 = vector.load %arg6[%c0_16, %c0_17] : memref<128x128xbf16, #tpu.memory_space<vmem>>, vector<128x128xbf16>
      tpu.vector_store %arg6[%c0_16, %c0_17], %23 {strides = array<i32>} : memref<128x128xbf16, #tpu.memory_space<vmem>>, vector<128x128xbf16>,
    } else {
    }
    return
  }
  func.func @transform_0(%arg0: i32, %arg1: i32, %arg2: i32) -> (i32, i32) {
    %c0_i32 = arith.constant 0 : i32
    return %arg0, %arg2 : i32, i32
  }
  func.func @transform_1(%arg0: i32, %arg1: i32, %arg2: i32) -> (i32, i32) {
    %c0_i32 = arith.constant 0 : i32
    return %arg2, %arg1 : i32, i32
  }
  func.func @transform_2(%arg0: i32, %arg1: i32, %arg2: i32) -> (i32, i32) {
    %c0_i32 = arith.constant 0 : i32
    %c0_i32_0 = arith.constant 0 : i32
    return %c0_i32, %arg1 : i32, i32
  }
  func.func @transform_3(%arg0: i32, %arg1: i32, %arg2: i32) -> (i32, i32) {
    %c0_i32 = arith.constant 0 : i32
    return %arg0, %arg1 : i32, i32
  }
}

module attributes {stable_mosaic.version = 11 : i64} {
  func.func @_fused_matmul_kernel(%arg0: i32, %arg1: i32, %arg2: i32, %arg3: memref<32x256xbf16, #tpu.memory_space<vmem>>, %arg4: memref<256x128xbf16, #tpu.memory_space<vmem>>, %arg5: memref<1x128xf32, #tpu.memory_space<vmem>>, %arg6: memref<32x128xbf16, #tpu.memory_space<vmem>>, %arg7: memref<32x128xf32, #tpu.memory_space<vmem>>) attributes {dimension_semantics = [#tpu.dimension_semantics<parallel>, #tpu.dimension_semantics<parallel>, #tpu.dimension_semantics<arbitrary>], iteration_bounds = array<i64: 1, 1, 1>, scalar_prefetch = 0 : i64, scratch_operands = 1 : i64, tpu.core_type = #tpu.core_type<tc>, window_params = [{transform_indices = @transform_0, window_bounds = array<i64: 32, 256>}, {transform_indices = @transform_1, window_bounds = array<i64: 256, 128>}, {transform_indices = @transform_2, window_bounds = array<i64: 1, 128>}, {transform_indices = @transform_3, window_bounds = array<i64: 32, 128>}]} {
    %c0_i32 = arith.constant 0 : i32
    %0 = arith.cmpi eq, %arg2, %c0_i32 : i32
    %1 = arith.extui %0 : i1 to i32
    %c0_i32_0 = arith.constant 0 : i32
    %2 = arith.cmpi ne, %1, %c0_i32_0 : i32
    scf.if %2 {
      %cst_12 = arith.constant 0.000000e+00 : f32
      %19 = vector.broadcast %cst_12 : f32 to vector<32x128xf32>
      %c0_13 = arith.constant 0 : index
      %c0_14 = arith.constant 0 : index
      %20 = vector.load %arg7[%c0_13, %c0_14] : memref<32x128xf32, #tpu.memory_space<vmem>>, vector<32x128xf32>
      tpu.vector_store %arg7[%c0_13, %c0_14], %19 {strides = array<i32>} : memref<32x128xf32, #tpu.memory_space<vmem>>, vector<32x128xf32>,
    } else {
    }
    %c0 = arith.constant 0 : index
    %c0_1 = arith.constant 0 : index
    %3 = vector.load %arg3[%c0, %c0_1] : memref<32x256xbf16, #tpu.memory_space<vmem>>, vector<32x256xbf16>
    %4 = arith.extf %3 : vector<32x256xbf16> to vector<32x256xf32>
    %cst = arith.constant 0.000000e+00 : f32
    %5 = vector.broadcast %cst : f32 to vector<32x256xf32>
    %6 = arith.cmpf oge, %4, %5 : vector<32x256xf32>
    %cst_2 = arith.constant 2.000000e-01 : f32
    %7 = vector.broadcast %cst_2 : f32 to vector<32x256xf32>
    %8 = arith.mulf %7, %4 : vector<32x256xf32>
    %9 = arith.select %6, %4, %8 : vector<32x256xi1>, vector<32x256xf32>
    %10 = arith.truncf %9 : vector<32x256xf32> to vector<32x256xbf16>
    %c0_3 = arith.constant 0 : index
    %c0_4 = arith.constant 0 : index
    %11 = vector.load %arg7[%c0_3, %c0_4] : memref<32x128xf32, #tpu.memory_space<vmem>>, vector<32x128xf32>
    %c0_5 = arith.constant 0 : index
    %c0_6 = arith.constant 0 : index
    %12 = vector.load %arg4[%c0_5, %c0_6] : memref<256x128xbf16, #tpu.memory_space<vmem>>, vector<256x128xbf16>
    %cst_7 = arith.constant dense<0.000000e+00> : vector<32x128xf32>
    %13 = tpu.matmul %10, %12, %cst_7 {dimension_numbers = #tpu.dot_dimension_numbers<[1], [0], [0], [1], [0, 0, 1, 1], [], []>} : vector<32x256xbf16>, vector<256x128xbf16>, vector<32x128xf32> -> vector<32x128xf32>
    %14 = arith.addf %11, %13 : vector<32x128xf32>
    %c0_8 = arith.constant 0 : index
    %c0_9 = arith.constant 0 : index
    %15 = vector.load %arg7[%c0_8, %c0_9] : memref<32x128xf32, #tpu.memory_space<vmem>>, vector<32x128xf32>
    tpu.vector_store %arg7[%c0_8, %c0_9], %14 {strides = array<i32>} : memref<32x128xf32, #tpu.memory_space<vmem>>, vector<32x128xf32>,
    %c0_i32_10 = arith.constant 0 : i32
    %16 = arith.cmpi eq, %arg2, %c0_i32_10 : i32
    %17 = arith.extui %16 : i1 to i32
    %c0_i32_11 = arith.constant 0 : i32
    %18 = arith.cmpi ne, %17, %c0_i32_11 : i32
    scf.if %18 {
      %c0_12 = arith.constant 0 : index
      %c0_13 = arith.constant 0 : index
      %19 = vector.load %arg7[%c0_12, %c0_13] : memref<32x128xf32, #tpu.memory_space<vmem>>, vector<32x128xf32>
      %c0_14 = arith.constant 0 : index
      %c0_15 = arith.constant 0 : index
      %20 = vector.load %arg5[%c0_14, %c0_15] : memref<1x128xf32, #tpu.memory_space<vmem>>, vector<1x128xf32>
      %21 = vector.broadcast %20 : vector<1x128xf32> to vector<32x128xf32>
      %22 = arith.addf %19, %21 : vector<32x128xf32>
      %23 = arith.truncf %22 : vector<32x128xf32> to vector<32x128xbf16>
      %c0_16 = arith.constant 0 : index
      %c0_17 = arith.constant 0 : index
      %24 = vector.load %arg6[%c0_16, %c0_17] : memref<32x128xbf16, #tpu.memory_space<vmem>>, vector<32x128xbf16>
      tpu.vector_store %arg6[%c0_16, %c0_17], %23 {strides = array<i32>} : memref<32x128xbf16, #tpu.memory_space<vmem>>, vector<32x128xbf16>,
    } else {
    }
    return
  }
  func.func @transform_0(%arg0: i32, %arg1: i32, %arg2: i32) -> (i32, i32) {
    %c0_i32 = arith.constant 0 : i32
    return %arg0, %arg2 : i32, i32
  }
  func.func @transform_1(%arg0: i32, %arg1: i32, %arg2: i32) -> (i32, i32) {
    %c0_i32 = arith.constant 0 : i32
    return %arg2, %arg1 : i32, i32
  }
  func.func @transform_2(%arg0: i32, %arg1: i32, %arg2: i32) -> (i32, i32) {
    %c0_i32 = arith.constant 0 : i32
    %c0_i32_0 = arith.constant 0 : i32
    return %c0_i32, %arg1 : i32, i32
  }
  func.func @transform_3(%arg0: i32, %arg1: i32, %arg2: i32) -> (i32, i32) {
    %c0_i32 = arith.constant 0 : i32
    return %arg0, %arg1 : i32, i32
  }
}

module attributes {stable_mosaic.version = 11 : i64} {
  func.func @_fused_matmul_kernel(%arg0: i32, %arg1: i32, %arg2: i32, %arg3: memref<8x1024xbf16, #tpu.memory_space<vmem>>, %arg4: memref<1024x128xbf16, #tpu.memory_space<vmem>>, %arg5: memref<1x128xf32, #tpu.memory_space<vmem>>, %arg6: memref<8x128xbf16, #tpu.memory_space<vmem>>, %arg7: memref<8x128xf32, #tpu.memory_space<vmem>>) attributes {dimension_semantics = [#tpu.dimension_semantics<parallel>, #tpu.dimension_semantics<parallel>, #tpu.dimension_semantics<arbitrary>], iteration_bounds = array<i64: 1, 1, 1>, scalar_prefetch = 0 : i64, scratch_operands = 1 : i64, tpu.core_type = #tpu.core_type<tc>, window_params = [{transform_indices = @transform_0, window_bounds = array<i64: 8, 1024>}, {transform_indices = @transform_1, window_bounds = array<i64: 1024, 128>}, {transform_indices = @transform_2, window_bounds = array<i64: 1, 128>}, {transform_indices = @transform_3, window_bounds = array<i64: 8, 128>}]} {
    %c0_i32 = arith.constant 0 : i32
    %0 = arith.cmpi eq, %arg2, %c0_i32 : i32
    %1 = arith.extui %0 : i1 to i32
    %c0_i32_0 = arith.constant 0 : i32
    %2 = arith.cmpi ne, %1, %c0_i32_0 : i32
    scf.if %2 {
      %cst_12 = arith.constant 0.000000e+00 : f32
      %19 = vector.broadcast %cst_12 : f32 to vector<8x128xf32>
      %c0_13 = arith.constant 0 : index
      %c0_14 = arith.constant 0 : index
      %20 = vector.load %arg7[%c0_13, %c0_14] : memref<8x128xf32, #tpu.memory_space<vmem>>, vector<8x128xf32>
      tpu.vector_store %arg7[%c0_13, %c0_14], %19 {strides = array<i32>} : memref<8x128xf32, #tpu.memory_space<vmem>>, vector<8x128xf32>,
    } else {
    }
    %c0 = arith.constant 0 : index
    %c0_1 = arith.constant 0 : index
    %3 = vector.load %arg3[%c0, %c0_1] : memref<8x1024xbf16, #tpu.memory_space<vmem>>, vector<8x1024xbf16>
    %4 = arith.extf %3 : vector<8x1024xbf16> to vector<8x1024xf32>
    %cst = arith.constant 0.000000e+00 : f32
    %5 = vector.broadcast %cst : f32 to vector<8x1024xf32>
    %6 = arith.cmpf oge, %4, %5 : vector<8x1024xf32>
    %cst_2 = arith.constant 2.000000e-01 : f32
    %7 = vector.broadcast %cst_2 : f32 to vector<8x1024xf32>
    %8 = arith.mulf %7, %4 : vector<8x1024xf32>
    %9 = arith.select %6, %4, %8 : vector<8x1024xi1>, vector<8x1024xf32>
    %10 = arith.truncf %9 : vector<8x1024xf32> to vector<8x1024xbf16>
    %c0_3 = arith.constant 0 : index
    %c0_4 = arith.constant 0 : index
    %11 = vector.load %arg7[%c0_3, %c0_4] : memref<8x128xf32, #tpu.memory_space<vmem>>, vector<8x128xf32>
    %c0_5 = arith.constant 0 : index
    %c0_6 = arith.constant 0 : index
    %12 = vector.load %arg4[%c0_5, %c0_6] : memref<1024x128xbf16, #tpu.memory_space<vmem>>, vector<1024x128xbf16>
    %cst_7 = arith.constant dense<0.000000e+00> : vector<8x128xf32>
    %13 = tpu.matmul %10, %12, %cst_7 {dimension_numbers = #tpu.dot_dimension_numbers<[1], [0], [0], [1], [0, 0, 1, 1], [], []>} : vector<8x1024xbf16>, vector<1024x128xbf16>, vector<8x128xf32> -> vector<8x128xf32>
    %14 = arith.addf %11, %13 : vector<8x128xf32>
    %c0_8 = arith.constant 0 : index
    %c0_9 = arith.constant 0 : index
    %15 = vector.load %arg7[%c0_8, %c0_9] : memref<8x128xf32, #tpu.memory_space<vmem>>, vector<8x128xf32>
    tpu.vector_store %arg7[%c0_8, %c0_9], %14 {strides = array<i32>} : memref<8x128xf32, #tpu.memory_space<vmem>>, vector<8x128xf32>,
    %c0_i32_10 = arith.constant 0 : i32
    %16 = arith.cmpi eq, %arg2, %c0_i32_10 : i32
    %17 = arith.extui %16 : i1 to i32
    %c0_i32_11 = arith.constant 0 : i32
    %18 = arith.cmpi ne, %17, %c0_i32_11 : i32
    scf.if %18 {
      %c0_12 = arith.constant 0 : index
      %c0_13 = arith.constant 0 : index
      %19 = vector.load %arg7[%c0_12, %c0_13] : memref<8x128xf32, #tpu.memory_space<vmem>>, vector<8x128xf32>
      %c0_14 = arith.constant 0 : index
      %c0_15 = arith.constant 0 : index
      %20 = vector.load %arg5[%c0_14, %c0_15] : memref<1x128xf32, #tpu.memory_space<vmem>>, vector<1x128xf32>
      %21 = vector.broadcast %20 : vector<1x128xf32> to vector<8x128xf32>
      %22 = arith.addf %19, %21 : vector<8x128xf32>
      %23 = arith.truncf %22 : vector<8x128xf32> to vector<8x128xbf16>
      %c0_16 = arith.constant 0 : index
      %c0_17 = arith.constant 0 : index
      %24 = vector.load %arg6[%c0_16, %c0_17] : memref<8x128xbf16, #tpu.memory_space<vmem>>, vector<8x128xbf16>
      tpu.vector_store %arg6[%c0_16, %c0_17], %23 {strides = array<i32>} : memref<8x128xbf16, #tpu.memory_space<vmem>>, vector<8x128xbf16>,
    } else {
    }
    return
  }
  func.func @transform_0(%arg0: i32, %arg1: i32, %arg2: i32) -> (i32, i32) {
    %c0_i32 = arith.constant 0 : i32
    return %arg0, %arg2 : i32, i32
  }
  func.func @transform_1(%arg0: i32, %arg1: i32, %arg2: i32) -> (i32, i32) {
    %c0_i32 = arith.constant 0 : i32
    return %arg2, %arg1 : i32, i32
  }
  func.func @transform_2(%arg0: i32, %arg1: i32, %arg2: i32) -> (i32, i32) {
    %c0_i32 = arith.constant 0 : i32
    %c0_i32_0 = arith.constant 0 : i32
    return %c0_i32, %arg1 : i32, i32
  }
  func.func @transform_3(%arg0: i32, %arg1: i32, %arg2: i32) -> (i32, i32) {
    %c0_i32 = arith.constant 0 : i32
    return %arg0, %arg1 : i32, i32
  }
}

module attributes {stable_mosaic.version = 11 : i64} {
  func.func @_fused_matmul_kernel(%arg0: i32, %arg1: i32, %arg2: i32, %arg3: memref<8x512xbf16, #tpu.memory_space<vmem>>, %arg4: memref<512x128xbf16, #tpu.memory_space<vmem>>, %arg5: memref<1x128xf32, #tpu.memory_space<vmem>>, %arg6: memref<8x128xbf16, #tpu.memory_space<vmem>>, %arg7: memref<8x128xf32, #tpu.memory_space<vmem>>) attributes {dimension_semantics = [#tpu.dimension_semantics<parallel>, #tpu.dimension_semantics<parallel>, #tpu.dimension_semantics<arbitrary>], iteration_bounds = array<i64: 1, 1, 1>, scalar_prefetch = 0 : i64, scratch_operands = 1 : i64, tpu.core_type = #tpu.core_type<tc>, window_params = [{transform_indices = @transform_0, window_bounds = array<i64: 8, 512>}, {transform_indices = @transform_1, window_bounds = array<i64: 512, 128>}, {transform_indices = @transform_2, window_bounds = array<i64: 1, 128>}, {transform_indices = @transform_3, window_bounds = array<i64: 8, 128>}]} {
    %c0_i32 = arith.constant 0 : i32
    %0 = arith.cmpi eq, %arg2, %c0_i32 : i32
    %1 = arith.extui %0 : i1 to i32
    %c0_i32_0 = arith.constant 0 : i32
    %2 = arith.cmpi ne, %1, %c0_i32_0 : i32
    scf.if %2 {
      %cst_12 = arith.constant 0.000000e+00 : f32
      %19 = vector.broadcast %cst_12 : f32 to vector<8x128xf32>
      %c0_13 = arith.constant 0 : index
      %c0_14 = arith.constant 0 : index
      %20 = vector.load %arg7[%c0_13, %c0_14] : memref<8x128xf32, #tpu.memory_space<vmem>>, vector<8x128xf32>
      tpu.vector_store %arg7[%c0_13, %c0_14], %19 {strides = array<i32>} : memref<8x128xf32, #tpu.memory_space<vmem>>, vector<8x128xf32>,
    } else {
    }
    %c0 = arith.constant 0 : index
    %c0_1 = arith.constant 0 : index
    %3 = vector.load %arg3[%c0, %c0_1] : memref<8x512xbf16, #tpu.memory_space<vmem>>, vector<8x512xbf16>
    %4 = arith.extf %3 : vector<8x512xbf16> to vector<8x512xf32>
    %cst = arith.constant 0.000000e+00 : f32
    %5 = vector.broadcast %cst : f32 to vector<8x512xf32>
    %6 = arith.cmpf oge, %4, %5 : vector<8x512xf32>
    %cst_2 = arith.constant 2.000000e-01 : f32
    %7 = vector.broadcast %cst_2 : f32 to vector<8x512xf32>
    %8 = arith.mulf %7, %4 : vector<8x512xf32>
    %9 = arith.select %6, %4, %8 : vector<8x512xi1>, vector<8x512xf32>
    %10 = arith.truncf %9 : vector<8x512xf32> to vector<8x512xbf16>
    %c0_3 = arith.constant 0 : index
    %c0_4 = arith.constant 0 : index
    %11 = vector.load %arg7[%c0_3, %c0_4] : memref<8x128xf32, #tpu.memory_space<vmem>>, vector<8x128xf32>
    %c0_5 = arith.constant 0 : index
    %c0_6 = arith.constant 0 : index
    %12 = vector.load %arg4[%c0_5, %c0_6] : memref<512x128xbf16, #tpu.memory_space<vmem>>, vector<512x128xbf16>
    %cst_7 = arith.constant dense<0.000000e+00> : vector<8x128xf32>
    %13 = tpu.matmul %10, %12, %cst_7 {dimension_numbers = #tpu.dot_dimension_numbers<[1], [0], [0], [1], [0, 0, 1, 1], [], []>} : vector<8x512xbf16>, vector<512x128xbf16>, vector<8x128xf32> -> vector<8x128xf32>
    %14 = arith.addf %11, %13 : vector<8x128xf32>
    %c0_8 = arith.constant 0 : index
    %c0_9 = arith.constant 0 : index
    %15 = vector.load %arg7[%c0_8, %c0_9] : memref<8x128xf32, #tpu.memory_space<vmem>>, vector<8x128xf32>
    tpu.vector_store %arg7[%c0_8, %c0_9], %14 {strides = array<i32>} : memref<8x128xf32, #tpu.memory_space<vmem>>, vector<8x128xf32>,
    %c0_i32_10 = arith.constant 0 : i32
    %16 = arith.cmpi eq, %arg2, %c0_i32_10 : i32
    %17 = arith.extui %16 : i1 to i32
    %c0_i32_11 = arith.constant 0 : i32
    %18 = arith.cmpi ne, %17, %c0_i32_11 : i32
    scf.if %18 {
      %c0_12 = arith.constant 0 : index
      %c0_13 = arith.constant 0 : index
      %19 = vector.load %arg7[%c0_12, %c0_13] : memref<8x128xf32, #tpu.memory_space<vmem>>, vector<8x128xf32>
      %c0_14 = arith.constant 0 : index
      %c0_15 = arith.constant 0 : index
      %20 = vector.load %arg5[%c0_14, %c0_15] : memref<1x128xf32, #tpu.memory_space<vmem>>, vector<1x128xf32>
      %21 = vector.broadcast %20 : vector<1x128xf32> to vector<8x128xf32>
      %22 = arith.addf %19, %21 : vector<8x128xf32>
      %23 = arith.truncf %22 : vector<8x128xf32> to vector<8x128xbf16>
      %c0_16 = arith.constant 0 : index
      %c0_17 = arith.constant 0 : index
      %24 = vector.load %arg6[%c0_16, %c0_17] : memref<8x128xbf16, #tpu.memory_space<vmem>>, vector<8x128xbf16>
      tpu.vector_store %arg6[%c0_16, %c0_17], %23 {strides = array<i32>} : memref<8x128xbf16, #tpu.memory_space<vmem>>, vector<8x128xbf16>,
    } else {
    }
    return
  }
  func.func @transform_0(%arg0: i32, %arg1: i32, %arg2: i32) -> (i32, i32) {
    %c0_i32 = arith.constant 0 : i32
    return %arg0, %arg2 : i32, i32
  }
  func.func @transform_1(%arg0: i32, %arg1: i32, %arg2: i32) -> (i32, i32) {
    %c0_i32 = arith.constant 0 : i32
    return %arg2, %arg1 : i32, i32
  }
  func.func @transform_2(%arg0: i32, %arg1: i32, %arg2: i32) -> (i32, i32) {
    %c0_i32 = arith.constant 0 : i32
    %c0_i32_0 = arith.constant 0 : i32
    return %c0_i32, %arg1 : i32, i32
  }
  func.func @transform_3(%arg0: i32, %arg1: i32, %arg2: i32) -> (i32, i32) {
    %c0_i32 = arith.constant 0 : i32
    return %arg0, %arg1 : i32, i32
  }
}

module attributes {stable_mosaic.version = 11 : i64} {
  func.func @_fused_matmul_kernel(%arg0: i32, %arg1: i32, %arg2: i32, %arg3: memref<8x256xbf16, #tpu.memory_space<vmem>>, %arg4: memref<256x128xbf16, #tpu.memory_space<vmem>>, %arg5: memref<1x128xf32, #tpu.memory_space<vmem>>, %arg6: memref<8x128xbf16, #tpu.memory_space<vmem>>, %arg7: memref<8x128xf32, #tpu.memory_space<vmem>>) attributes {dimension_semantics = [#tpu.dimension_semantics<parallel>, #tpu.dimension_semantics<parallel>, #tpu.dimension_semantics<arbitrary>], iteration_bounds = array<i64: 1, 1, 1>, scalar_prefetch = 0 : i64, scratch_operands = 1 : i64, tpu.core_type = #tpu.core_type<tc>, window_params = [{transform_indices = @transform_0, window_bounds = array<i64: 8, 256>}, {transform_indices = @transform_1, window_bounds = array<i64: 256, 128>}, {transform_indices = @transform_2, window_bounds = array<i64: 1, 128>}, {transform_indices = @transform_3, window_bounds = array<i64: 8, 128>}]} {
    %c0_i32 = arith.constant 0 : i32
    %0 = arith.cmpi eq, %arg2, %c0_i32 : i32
    %1 = arith.extui %0 : i1 to i32
    %c0_i32_0 = arith.constant 0 : i32
    %2 = arith.cmpi ne, %1, %c0_i32_0 : i32
    scf.if %2 {
      %cst_11 = arith.constant 0.000000e+00 : f32
      %14 = vector.broadcast %cst_11 : f32 to vector<8x128xf32>
      %c0_12 = arith.constant 0 : index
      %c0_13 = arith.constant 0 : index
      %15 = vector.load %arg7[%c0_12, %c0_13] : memref<8x128xf32, #tpu.memory_space<vmem>>, vector<8x128xf32>
      tpu.vector_store %arg7[%c0_12, %c0_13], %14 {strides = array<i32>} : memref<8x128xf32, #tpu.memory_space<vmem>>, vector<8x128xf32>,
    } else {
    }
    %c0 = arith.constant 0 : index
    %c0_1 = arith.constant 0 : index
    %3 = vector.load %arg3[%c0, %c0_1] : memref<8x256xbf16, #tpu.memory_space<vmem>>, vector<8x256xbf16>
    %cst = arith.constant 0.000000e+00 : bf16
    %4 = vector.broadcast %cst : bf16 to vector<8x256xbf16>
    %5 = arith.maximumf %3, %4 : vector<8x256xbf16>
    %c0_2 = arith.constant 0 : index
    %c0_3 = arith.constant 0 : index
    %6 = vector.load %arg7[%c0_2, %c0_3] : memref<8x128xf32, #tpu.memory_space<vmem>>, vector<8x128xf32>
    %c0_4 = arith.constant 0 : index
    %c0_5 = arith.constant 0 : index
    %7 = vector.load %arg4[%c0_4, %c0_5] : memref<256x128xbf16, #tpu.memory_space<vmem>>, vector<256x128xbf16>
    %cst_6 = arith.constant dense<0.000000e+00> : vector<8x128xf32>
    %8 = tpu.matmul %5, %7, %cst_6 {dimension_numbers = #tpu.dot_dimension_numbers<[1], [0], [0], [1], [0, 0, 1, 1], [], []>} : vector<8x256xbf16>, vector<256x128xbf16>, vector<8x128xf32> -> vector<8x128xf32>
    %9 = arith.addf %6, %8 : vector<8x128xf32>
    %c0_7 = arith.constant 0 : index
    %c0_8 = arith.constant 0 : index
    %10 = vector.load %arg7[%c0_7, %c0_8] : memref<8x128xf32, #tpu.memory_space<vmem>>, vector<8x128xf32>
    tpu.vector_store %arg7[%c0_7, %c0_8], %9 {strides = array<i32>} : memref<8x128xf32, #tpu.memory_space<vmem>>, vector<8x128xf32>,
    %c0_i32_9 = arith.constant 0 : i32
    %11 = arith.cmpi eq, %arg2, %c0_i32_9 : i32
    %12 = arith.extui %11 : i1 to i32
    %c0_i32_10 = arith.constant 0 : i32
    %13 = arith.cmpi ne, %12, %c0_i32_10 : i32
    scf.if %13 {
      %c0_11 = arith.constant 0 : index
      %c0_12 = arith.constant 0 : index
      %14 = vector.load %arg7[%c0_11, %c0_12] : memref<8x128xf32, #tpu.memory_space<vmem>>, vector<8x128xf32>
      %c0_13 = arith.constant 0 : index
      %c0_14 = arith.constant 0 : index
      %15 = vector.load %arg5[%c0_13, %c0_14] : memref<1x128xf32, #tpu.memory_space<vmem>>, vector<1x128xf32>
      %16 = vector.broadcast %15 : vector<1x128xf32> to vector<8x128xf32>
      %17 = arith.addf %14, %16 : vector<8x128xf32>
      %18 = arith.truncf %17 : vector<8x128xf32> to vector<8x128xbf16>
      %c0_15 = arith.constant 0 : index
      %c0_16 = arith.constant 0 : index
      %19 = vector.load %arg6[%c0_15, %c0_16] : memref<8x128xbf16, #tpu.memory_space<vmem>>, vector<8x128xbf16>
      tpu.vector_store %arg6[%c0_15, %c0_16], %18 {strides = array<i32>} : memref<8x128xbf16, #tpu.memory_space<vmem>>, vector<8x128xbf16>,
    } else {
    }
    return
  }
  func.func @transform_0(%arg0: i32, %arg1: i32, %arg2: i32) -> (i32, i32) {
    %c0_i32 = arith.constant 0 : i32
    return %arg0, %arg2 : i32, i32
  }
  func.func @transform_1(%arg0: i32, %arg1: i32, %arg2: i32) -> (i32, i32) {
    %c0_i32 = arith.constant 0 : i32
    return %arg2, %arg1 : i32, i32
  }
  func.func @transform_2(%arg0: i32, %arg1: i32, %arg2: i32) -> (i32, i32) {
    %c0_i32 = arith.constant 0 : i32
    %c0_i32_0 = arith.constant 0 : i32
    return %c0_i32, %arg1 : i32, i32
  }
  func.func @transform_3(%arg0: i32, %arg1: i32, %arg2: i32) -> (i32, i32) {
    %c0_i32 = arith.constant 0 : i32
    return %arg0, %arg1 : i32, i32
  }
}

module attributes {stable_mosaic.version = 11 : i64} {
  func.func @_fused_matmul_kernel(%arg0: i32, %arg1: i32, %arg2: i32, %arg3: memref<8x512xbf16, #tpu.memory_space<vmem>>, %arg4: memref<512x128xbf16, #tpu.memory_space<vmem>>, %arg5: memref<1x128xf32, #tpu.memory_space<vmem>>, %arg6: memref<8x128xbf16, #tpu.memory_space<vmem>>, %arg7: memref<8x128xf32, #tpu.memory_space<vmem>>) attributes {dimension_semantics = [#tpu.dimension_semantics<parallel>, #tpu.dimension_semantics<parallel>, #tpu.dimension_semantics<arbitrary>], iteration_bounds = array<i64: 1, 1, 1>, scalar_prefetch = 0 : i64, scratch_operands = 1 : i64, tpu.core_type = #tpu.core_type<tc>, window_params = [{transform_indices = @transform_0, window_bounds = array<i64: 8, 512>}, {transform_indices = @transform_1, window_bounds = array<i64: 512, 128>}, {transform_indices = @transform_2, window_bounds = array<i64: 1, 128>}, {transform_indices = @transform_3, window_bounds = array<i64: 8, 128>}]} {
    %c0_i32 = arith.constant 0 : i32
    %0 = arith.cmpi eq, %arg2, %c0_i32 : i32
    %1 = arith.extui %0 : i1 to i32
    %c0_i32_0 = arith.constant 0 : i32
    %2 = arith.cmpi ne, %1, %c0_i32_0 : i32
    scf.if %2 {
      %cst_11 = arith.constant 0.000000e+00 : f32
      %14 = vector.broadcast %cst_11 : f32 to vector<8x128xf32>
      %c0_12 = arith.constant 0 : index
      %c0_13 = arith.constant 0 : index
      %15 = vector.load %arg7[%c0_12, %c0_13] : memref<8x128xf32, #tpu.memory_space<vmem>>, vector<8x128xf32>
      tpu.vector_store %arg7[%c0_12, %c0_13], %14 {strides = array<i32>} : memref<8x128xf32, #tpu.memory_space<vmem>>, vector<8x128xf32>,
    } else {
    }
    %c0 = arith.constant 0 : index
    %c0_1 = arith.constant 0 : index
    %3 = vector.load %arg3[%c0, %c0_1] : memref<8x512xbf16, #tpu.memory_space<vmem>>, vector<8x512xbf16>
    %cst = arith.constant 0.000000e+00 : bf16
    %4 = vector.broadcast %cst : bf16 to vector<8x512xbf16>
    %5 = arith.maximumf %3, %4 : vector<8x512xbf16>
    %c0_2 = arith.constant 0 : index
    %c0_3 = arith.constant 0 : index
    %6 = vector.load %arg7[%c0_2, %c0_3] : memref<8x128xf32, #tpu.memory_space<vmem>>, vector<8x128xf32>
    %c0_4 = arith.constant 0 : index
    %c0_5 = arith.constant 0 : index
    %7 = vector.load %arg4[%c0_4, %c0_5] : memref<512x128xbf16, #tpu.memory_space<vmem>>, vector<512x128xbf16>
    %cst_6 = arith.constant dense<0.000000e+00> : vector<8x128xf32>
    %8 = tpu.matmul %5, %7, %cst_6 {dimension_numbers = #tpu.dot_dimension_numbers<[1], [0], [0], [1], [0, 0, 1, 1], [], []>} : vector<8x512xbf16>, vector<512x128xbf16>, vector<8x128xf32> -> vector<8x128xf32>
    %9 = arith.addf %6, %8 : vector<8x128xf32>
    %c0_7 = arith.constant 0 : index
    %c0_8 = arith.constant 0 : index
    %10 = vector.load %arg7[%c0_7, %c0_8] : memref<8x128xf32, #tpu.memory_space<vmem>>, vector<8x128xf32>
    tpu.vector_store %arg7[%c0_7, %c0_8], %9 {strides = array<i32>} : memref<8x128xf32, #tpu.memory_space<vmem>>, vector<8x128xf32>,
    %c0_i32_9 = arith.constant 0 : i32
    %11 = arith.cmpi eq, %arg2, %c0_i32_9 : i32
    %12 = arith.extui %11 : i1 to i32
    %c0_i32_10 = arith.constant 0 : i32
    %13 = arith.cmpi ne, %12, %c0_i32_10 : i32
    scf.if %13 {
      %c0_11 = arith.constant 0 : index
      %c0_12 = arith.constant 0 : index
      %14 = vector.load %arg7[%c0_11, %c0_12] : memref<8x128xf32, #tpu.memory_space<vmem>>, vector<8x128xf32>
      %c0_13 = arith.constant 0 : index
      %c0_14 = arith.constant 0 : index
      %15 = vector.load %arg5[%c0_13, %c0_14] : memref<1x128xf32, #tpu.memory_space<vmem>>, vector<1x128xf32>
      %16 = vector.broadcast %15 : vector<1x128xf32> to vector<8x128xf32>
      %17 = arith.addf %14, %16 : vector<8x128xf32>
      %18 = arith.truncf %17 : vector<8x128xf32> to vector<8x128xbf16>
      %c0_15 = arith.constant 0 : index
      %c0_16 = arith.constant 0 : index
      %19 = vector.load %arg6[%c0_15, %c0_16] : memref<8x128xbf16, #tpu.memory_space<vmem>>, vector<8x128xbf16>
      tpu.vector_store %arg6[%c0_15, %c0_16], %18 {strides = array<i32>} : memref<8x128xbf16, #tpu.memory_space<vmem>>, vector<8x128xbf16>,
    } else {
    }
    return
  }
  func.func @transform_0(%arg0: i32, %arg1: i32, %arg2: i32) -> (i32, i32) {
    %c0_i32 = arith.constant 0 : i32
    return %arg0, %arg2 : i32, i32
  }
  func.func @transform_1(%arg0: i32, %arg1: i32, %arg2: i32) -> (i32, i32) {
    %c0_i32 = arith.constant 0 : i32
    return %arg2, %arg1 : i32, i32
  }
  func.func @transform_2(%arg0: i32, %arg1: i32, %arg2: i32) -> (i32, i32) {
    %c0_i32 = arith.constant 0 : i32
    %c0_i32_0 = arith.constant 0 : i32
    return %c0_i32, %arg1 : i32, i32
  }
  func.func @transform_3(%arg0: i32, %arg1: i32, %arg2: i32) -> (i32, i32) {
    %c0_i32 = arith.constant 0 : i32
    return %arg0, %arg1 : i32, i32
  }
}

module attributes {stable_mosaic.version = 11 : i64} {
  func.func @_fused_matmul_kernel(%arg0: i32, %arg1: i32, %arg2: i32, %arg3: memref<32x256xbf16, #tpu.memory_space<vmem>>, %arg4: memref<256x128xbf16, #tpu.memory_space<vmem>>, %arg5: memref<1x128xf32, #tpu.memory_space<vmem>>, %arg6: memref<32x128xbf16, #tpu.memory_space<vmem>>, %arg7: memref<32x128xf32, #tpu.memory_space<vmem>>) attributes {dimension_semantics = [#tpu.dimension_semantics<parallel>, #tpu.dimension_semantics<parallel>, #tpu.dimension_semantics<arbitrary>], iteration_bounds = array<i64: 1, 1, 1>, scalar_prefetch = 0 : i64, scratch_operands = 1 : i64, tpu.core_type = #tpu.core_type<tc>, window_params = [{transform_indices = @transform_0, window_bounds = array<i64: 32, 256>}, {transform_indices = @transform_1, window_bounds = array<i64: 256, 128>}, {transform_indices = @transform_2, window_bounds = array<i64: 1, 128>}, {transform_indices = @transform_3, window_bounds = array<i64: 32, 128>}]} {
    %c0_i32 = arith.constant 0 : i32
    %0 = arith.cmpi eq, %arg2, %c0_i32 : i32
    %1 = arith.extui %0 : i1 to i32
    %c0_i32_0 = arith.constant 0 : i32
    %2 = arith.cmpi ne, %1, %c0_i32_0 : i32
    scf.if %2 {
      %cst_11 = arith.constant 0.000000e+00 : f32
      %14 = vector.broadcast %cst_11 : f32 to vector<32x128xf32>
      %c0_12 = arith.constant 0 : index
      %c0_13 = arith.constant 0 : index
      %15 = vector.load %arg7[%c0_12, %c0_13] : memref<32x128xf32, #tpu.memory_space<vmem>>, vector<32x128xf32>
      tpu.vector_store %arg7[%c0_12, %c0_13], %14 {strides = array<i32>} : memref<32x128xf32, #tpu.memory_space<vmem>>, vector<32x128xf32>,
    } else {
    }
    %c0 = arith.constant 0 : index
    %c0_1 = arith.constant 0 : index
    %3 = vector.load %arg3[%c0, %c0_1] : memref<32x256xbf16, #tpu.memory_space<vmem>>, vector<32x256xbf16>
    %cst = arith.constant 0.000000e+00 : bf16
    %4 = vector.broadcast %cst : bf16 to vector<32x256xbf16>
    %5 = arith.maximumf %3, %4 : vector<32x256xbf16>
    %c0_2 = arith.constant 0 : index
    %c0_3 = arith.constant 0 : index
    %6 = vector.load %arg7[%c0_2, %c0_3] : memref<32x128xf32, #tpu.memory_space<vmem>>, vector<32x128xf32>
    %c0_4 = arith.constant 0 : index
    %c0_5 = arith.constant 0 : index
    %7 = vector.load %arg4[%c0_4, %c0_5] : memref<256x128xbf16, #tpu.memory_space<vmem>>, vector<256x128xbf16>
    %cst_6 = arith.constant dense<0.000000e+00> : vector<32x128xf32>
    %8 = tpu.matmul %5, %7, %cst_6 {dimension_numbers = #tpu.dot_dimension_numbers<[1], [0], [0], [1], [0, 0, 1, 1], [], []>} : vector<32x256xbf16>, vector<256x128xbf16>, vector<32x128xf32> -> vector<32x128xf32>
    %9 = arith.addf %6, %8 : vector<32x128xf32>
    %c0_7 = arith.constant 0 : index
    %c0_8 = arith.constant 0 : index
    %10 = vector.load %arg7[%c0_7, %c0_8] : memref<32x128xf32, #tpu.memory_space<vmem>>, vector<32x128xf32>
    tpu.vector_store %arg7[%c0_7, %c0_8], %9 {strides = array<i32>} : memref<32x128xf32, #tpu.memory_space<vmem>>, vector<32x128xf32>,
    %c0_i32_9 = arith.constant 0 : i32
    %11 = arith.cmpi eq, %arg2, %c0_i32_9 : i32
    %12 = arith.extui %11 : i1 to i32
    %c0_i32_10 = arith.constant 0 : i32
    %13 = arith.cmpi ne, %12, %c0_i32_10 : i32
    scf.if %13 {
      %c0_11 = arith.constant 0 : index
      %c0_12 = arith.constant 0 : index
      %14 = vector.load %arg7[%c0_11, %c0_12] : memref<32x128xf32, #tpu.memory_space<vmem>>, vector<32x128xf32>
      %c0_13 = arith.constant 0 : index
      %c0_14 = arith.constant 0 : index
      %15 = vector.load %arg5[%c0_13, %c0_14] : memref<1x128xf32, #tpu.memory_space<vmem>>, vector<1x128xf32>
      %16 = vector.broadcast %15 : vector<1x128xf32> to vector<32x128xf32>
      %17 = arith.addf %14, %16 : vector<32x128xf32>
      %18 = arith.truncf %17 : vector<32x128xf32> to vector<32x128xbf16>
      %c0_15 = arith.constant 0 : index
      %c0_16 = arith.constant 0 : index
      %19 = vector.load %arg6[%c0_15, %c0_16] : memref<32x128xbf16, #tpu.memory_space<vmem>>, vector<32x128xbf16>
      tpu.vector_store %arg6[%c0_15, %c0_16], %18 {strides = array<i32>} : memref<32x128xbf16, #tpu.memory_space<vmem>>, vector<32x128xbf16>,
    } else {
    }
    return
  }
  func.func @transform_0(%arg0: i32, %arg1: i32, %arg2: i32) -> (i32, i32) {
    %c0_i32 = arith.constant 0 : i32
    return %arg0, %arg2 : i32, i32
  }
  func.func @transform_1(%arg0: i32, %arg1: i32, %arg2: i32) -> (i32, i32) {
    %c0_i32 = arith.constant 0 : i32
    return %arg2, %arg1 : i32, i32
  }
  func.func @transform_2(%arg0: i32, %arg1: i32, %arg2: i32) -> (i32, i32) {
    %c0_i32 = arith.constant 0 : i32
    %c0_i32_0 = arith.constant 0 : i32
    return %c0_i32, %arg1 : i32, i32
  }
  func.func @transform_3(%arg0: i32, %arg1: i32, %arg2: i32) -> (i32, i32) {
    %c0_i32 = arith.constant 0 : i32
    return %arg0, %arg1 : i32, i32
  }
}

module attributes {stable_mosaic.version = 11 : i64} {
  func.func @_fused_matmul_kernel(%arg0: i32, %arg1: i32, %arg2: i32, %arg3: memref<128x128xbf16, #tpu.memory_space<vmem>>, %arg4: memref<128x128xbf16, #tpu.memory_space<vmem>>, %arg5: memref<1x128xf32, #tpu.memory_space<vmem>>, %arg6: memref<128x128xbf16, #tpu.memory_space<vmem>>, %arg7: memref<128x128xf32, #tpu.memory_space<vmem>>) attributes {dimension_semantics = [#tpu.dimension_semantics<parallel>, #tpu.dimension_semantics<parallel>, #tpu.dimension_semantics<arbitrary>], iteration_bounds = array<i64: 1, 1, 1>, scalar_prefetch = 0 : i64, scratch_operands = 1 : i64, tpu.core_type = #tpu.core_type<tc>, window_params = [{transform_indices = @transform_0, window_bounds = array<i64: 128, 128>}, {transform_indices = @transform_1, window_bounds = array<i64: 128, 128>}, {transform_indices = @transform_2, window_bounds = array<i64: 1, 128>}, {transform_indices = @transform_3, window_bounds = array<i64: 128, 128>}]} {
    %c0_i32 = arith.constant 0 : i32
    %0 = arith.cmpi eq, %arg2, %c0_i32 : i32
    %1 = arith.extui %0 : i1 to i32
    %c0_i32_0 = arith.constant 0 : i32
    %2 = arith.cmpi ne, %1, %c0_i32_0 : i32
    scf.if %2 {
      %cst_11 = arith.constant 0.000000e+00 : f32
      %14 = vector.broadcast %cst_11 : f32 to vector<128x128xf32>
      %c0_12 = arith.constant 0 : index
      %c0_13 = arith.constant 0 : index
      %15 = vector.load %arg7[%c0_12, %c0_13] : memref<128x128xf32, #tpu.memory_space<vmem>>, vector<128x128xf32>
      tpu.vector_store %arg7[%c0_12, %c0_13], %14 {strides = array<i32>} : memref<128x128xf32, #tpu.memory_space<vmem>>, vector<128x128xf32>,
    } else {
    }
    %c0 = arith.constant 0 : index
    %c0_1 = arith.constant 0 : index
    %3 = vector.load %arg3[%c0, %c0_1] : memref<128x128xbf16, #tpu.memory_space<vmem>>, vector<128x128xbf16>
    %cst = arith.constant 0.000000e+00 : bf16
    %4 = vector.broadcast %cst : bf16 to vector<128x128xbf16>
    %5 = arith.maximumf %3, %4 : vector<128x128xbf16>
    %c0_2 = arith.constant 0 : index
    %c0_3 = arith.constant 0 : index
    %6 = vector.load %arg7[%c0_2, %c0_3] : memref<128x128xf32, #tpu.memory_space<vmem>>, vector<128x128xf32>
    %c0_4 = arith.constant 0 : index
    %c0_5 = arith.constant 0 : index
    %7 = vector.load %arg4[%c0_4, %c0_5] : memref<128x128xbf16, #tpu.memory_space<vmem>>, vector<128x128xbf16>
    %cst_6 = arith.constant dense<0.000000e+00> : vector<128x128xf32>
    %8 = tpu.matmul %5, %7, %cst_6 {dimension_numbers = #tpu.dot_dimension_numbers<[1], [0], [0], [1], [0, 0, 1, 1], [], []>} : vector<128x128xbf16>, vector<128x128xbf16>, vector<128x128xf32> -> vector<128x128xf32>
    %9 = arith.addf %6, %8 : vector<128x128xf32>
    %c0_7 = arith.constant 0 : index
    %c0_8 = arith.constant 0 : index
    %10 = vector.load %arg7[%c0_7, %c0_8] : memref<128x128xf32, #tpu.memory_space<vmem>>, vector<128x128xf32>
    tpu.vector_store %arg7[%c0_7, %c0_8], %9 {strides = array<i32>} : memref<128x128xf32, #tpu.memory_space<vmem>>, vector<128x128xf32>,
    %c0_i32_9 = arith.constant 0 : i32
    %11 = arith.cmpi eq, %arg2, %c0_i32_9 : i32
    %12 = arith.extui %11 : i1 to i32
    %c0_i32_10 = arith.constant 0 : i32
    %13 = arith.cmpi ne, %12, %c0_i32_10 : i32
    scf.if %13 {
      %c0_11 = arith.constant 0 : index
      %c0_12 = arith.constant 0 : index
      %14 = vector.load %arg7[%c0_11, %c0_12] : memref<128x128xf32, #tpu.memory_space<vmem>>, vector<128x128xf32>
      %c0_13 = arith.constant 0 : index
      %c0_14 = arith.constant 0 : index
      %15 = vector.load %arg5[%c0_13, %c0_14] : memref<1x128xf32, #tpu.memory_space<vmem>>, vector<1x128xf32>
      %16 = vector.broadcast %15 : vector<1x128xf32> to vector<128x128xf32>
      %17 = arith.addf %14, %16 : vector<128x128xf32>
      %18 = arith.truncf %17 : vector<128x128xf32> to vector<128x128xbf16>
      %c0_15 = arith.constant 0 : index
      %c0_16 = arith.constant 0 : index
      %19 = vector.load %arg6[%c0_15, %c0_16] : memref<128x128xbf16, #tpu.memory_space<vmem>>, vector<128x128xbf16>
      tpu.vector_store %arg6[%c0_15, %c0_16], %18 {strides = array<i32>} : memref<128x128xbf16, #tpu.memory_space<vmem>>, vector<128x128xbf16>,
    } else {
    }
    return
  }
  func.func @transform_0(%arg0: i32, %arg1: i32, %arg2: i32) -> (i32, i32) {
    %c0_i32 = arith.constant 0 : i32
    return %arg0, %arg2 : i32, i32
  }
  func.func @transform_1(%arg0: i32, %arg1: i32, %arg2: i32) -> (i32, i32) {
    %c0_i32 = arith.constant 0 : i32
    return %arg2, %arg1 : i32, i32
  }
  func.func @transform_2(%arg0: i32, %arg1: i32, %arg2: i32) -> (i32, i32) {
    %c0_i32 = arith.constant 0 : i32
    %c0_i32_0 = arith.constant 0 : i32
    return %c0_i32, %arg1 : i32, i32
  }
  func.func @transform_3(%arg0: i32, %arg1: i32, %arg2: i32) -> (i32, i32) {
    %c0_i32 = arith.constant 0 : i32
    return %arg0, %arg1 : i32, i32
  }
}

module attributes {stable_mosaic.version = 11 : i64} {
  func.func @_fused_matmul_kernel(%arg0: i32, %arg1: i32, %arg2: i32, %arg3: memref<512x64xbf16, #tpu.memory_space<vmem>>, %arg4: memref<64x128xbf16, #tpu.memory_space<vmem>>, %arg5: memref<1x128xf32, #tpu.memory_space<vmem>>, %arg6: memref<512x128xf32, #tpu.memory_space<vmem>>, %arg7: memref<512x128xf32, #tpu.memory_space<vmem>>) attributes {dimension_semantics = [#tpu.dimension_semantics<parallel>, #tpu.dimension_semantics<parallel>, #tpu.dimension_semantics<arbitrary>], iteration_bounds = array<i64: 1, 1, 1>, scalar_prefetch = 0 : i64, scratch_operands = 1 : i64, tpu.core_type = #tpu.core_type<tc>, window_params = [{transform_indices = @transform_0, window_bounds = array<i64: 512, 64>}, {transform_indices = @transform_1, window_bounds = array<i64: 64, 128>}, {transform_indices = @transform_2, window_bounds = array<i64: 1, 128>}, {transform_indices = @transform_3, window_bounds = array<i64: 512, 128>}]} {
    %c0_i32 = arith.constant 0 : i32
    %0 = arith.cmpi eq, %arg2, %c0_i32 : i32
    %1 = arith.extui %0 : i1 to i32
    %c0_i32_0 = arith.constant 0 : i32
    %2 = arith.cmpi ne, %1, %c0_i32_0 : i32
    scf.if %2 {
      %cst_11 = arith.constant 0.000000e+00 : f32
      %14 = vector.broadcast %cst_11 : f32 to vector<512x128xf32>
      %c0_12 = arith.constant 0 : index
      %c0_13 = arith.constant 0 : index
      %15 = vector.load %arg7[%c0_12, %c0_13] : memref<512x128xf32, #tpu.memory_space<vmem>>, vector<512x128xf32>
      tpu.vector_store %arg7[%c0_12, %c0_13], %14 {strides = array<i32>} : memref<512x128xf32, #tpu.memory_space<vmem>>, vector<512x128xf32>,
    } else {
    }
    %c0 = arith.constant 0 : index
    %c0_1 = arith.constant 0 : index
    %3 = vector.load %arg3[%c0, %c0_1] : memref<512x64xbf16, #tpu.memory_space<vmem>>, vector<512x64xbf16>
    %cst = arith.constant 0.000000e+00 : bf16
    %4 = vector.broadcast %cst : bf16 to vector<512x64xbf16>
    %5 = arith.maximumf %3, %4 : vector<512x64xbf16>
    %c0_2 = arith.constant 0 : index
    %c0_3 = arith.constant 0 : index
    %6 = vector.load %arg7[%c0_2, %c0_3] : memref<512x128xf32, #tpu.memory_space<vmem>>, vector<512x128xf32>
    %c0_4 = arith.constant 0 : index
    %c0_5 = arith.constant 0 : index
    %7 = vector.load %arg4[%c0_4, %c0_5] : memref<64x128xbf16, #tpu.memory_space<vmem>>, vector<64x128xbf16>
    %cst_6 = arith.constant dense<0.000000e+00> : vector<512x128xf32>
    %8 = tpu.matmul %5, %7, %cst_6 {dimension_numbers = #tpu.dot_dimension_numbers<[1], [0], [0], [1], [0, 0, 1, 1], [], []>} : vector<512x64xbf16>, vector<64x128xbf16>, vector<512x128xf32> -> vector<512x128xf32>
    %9 = arith.addf %6, %8 : vector<512x128xf32>
    %c0_7 = arith.constant 0 : index
    %c0_8 = arith.constant 0 : index
    %10 = vector.load %arg7[%c0_7, %c0_8] : memref<512x128xf32, #tpu.memory_space<vmem>>, vector<512x128xf32>
    tpu.vector_store %arg7[%c0_7, %c0_8], %9 {strides = array<i32>} : memref<512x128xf32, #tpu.memory_space<vmem>>, vector<512x128xf32>,
    %c0_i32_9 = arith.constant 0 : i32
    %11 = arith.cmpi eq, %arg2, %c0_i32_9 : i32
    %12 = arith.extui %11 : i1 to i32
    %c0_i32_10 = arith.constant 0 : i32
    %13 = arith.cmpi ne, %12, %c0_i32_10 : i32
    scf.if %13 {
      %c0_11 = arith.constant 0 : index
      %c0_12 = arith.constant 0 : index
      %14 = vector.load %arg7[%c0_11, %c0_12] : memref<512x128xf32, #tpu.memory_space<vmem>>, vector<512x128xf32>
      %c0_13 = arith.constant 0 : index
      %c0_14 = arith.constant 0 : index
      %15 = vector.load %arg5[%c0_13, %c0_14] : memref<1x128xf32, #tpu.memory_space<vmem>>, vector<1x128xf32>
      %16 = vector.broadcast %15 : vector<1x128xf32> to vector<512x128xf32>
      %17 = arith.addf %14, %16 : vector<512x128xf32>
      %18 = math.tanh %17 : vector<512x128xf32>
      %c0_15 = arith.constant 0 : index
      %c0_16 = arith.constant 0 : index
      %19 = vector.load %arg6[%c0_15, %c0_16] : memref<512x128xf32, #tpu.memory_space<vmem>>, vector<512x128xf32>
      tpu.vector_store %arg6[%c0_15, %c0_16], %18 {strides = array<i32>} : memref<512x128xf32, #tpu.memory_space<vmem>>, vector<512x128xf32>,
    } else {
    }
    return
  }
  func.func @transform_0(%arg0: i32, %arg1: i32, %arg2: i32) -> (i32, i32) {
    %c0_i32 = arith.constant 0 : i32
    return %arg0, %arg2 : i32, i32
  }
  func.func @transform_1(%arg0: i32, %arg1: i32, %arg2: i32) -> (i32, i32) {
    %c0_i32 = arith.constant 0 : i32
    return %arg2, %arg1 : i32, i32
  }
  func.func @transform_2(%arg0: i32, %arg1: i32, %arg2: i32) -> (i32, i32) {
    %c0_i32 = arith.constant 0 : i32
    %c0_i32_0 = arith.constant 0 : i32
    return %c0_i32, %arg1 : i32, i32
  }
  func.func @transform_3(%arg0: i32, %arg1: i32, %arg2: i32) -> (i32, i32) {
    %c0_i32 = arith.constant 0 : i32
    return %arg0, %arg1 : i32, i32
  }
}

</mosaic_0001>

<bundles_post_ra>
// kernel: _lambda_.25
= control target key start
LH: loop header
LB: loop body
LE: loop exit
PB: predicated region body
PF: predicated region fallthrough
CT: control target
= control target key end

     0   :  { %vm395_vm0 = vcmask 392192   ;;  %s1786_s1 = inlined_call_operand.vmem [shape: bf16[48,128], index: 1, kind: input, shape index: {}]   ;;  %s1787_s2 = inlined_call_operand.vmem [shape: f32[1,128], index: 2, kind: input, shape index: {}]   ;;  %s1788_s0 = inlined_call_operand.vmem [shape: bf16[512,48], index: 0, kind: input, shape index: {}]   ;;  %s1789_s3 = inlined_call_operand.vmem [shape: bf16[512,128], index: 3, kind: output, shape index: {}]  }
   0x1   :  { %v1262_v0 = vld [vmem:[%s1786_s1 + $0x10] sm:$0xff]  ;;  %v1261_v1 = vld [vmem:[%s1786_s1 + $0x8] sm:$0xff]  ;;  %v1260_v2 = vld [vmem:[%s1786_s1] sm:$0xff] }
   0x2   :  { %497 = vmatpush.bf16.msra.mxu0 %v1262_v0  ;;  %1454 = vmatpush.bf16.msra.mxu1 %v1262_v0  ;;  %v1228_v3 = vld [vmem:[%s1788_s0] sm:$0xff]  ;;  %v1229_v7 = vld [vmem:[%s1788_s0 + $0x8] sm:$0xff]  ;;  %v1230_v11 = vld [vmem:[%s1788_s0 + $0x10] sm:$0xff] }
   0x3   :  { %1455 = vmatpush.bf16.msra.mxu2 %v1262_v0  ;;  %1456 = vmatpush.bf16.msra.mxu3 %v1262_v0  ;;  %v1236_v4 = vld [vmem:[%s1788_s0 + $0x40] sm:$0xff]  ;;  %v1237_v8 = vld [vmem:[%s1788_s0 + $0x48] sm:$0xff]  ;;  %v1238_v12 = vld [vmem:[%s1788_s0 + $0x50] sm:$0xff] }
   0x4   :  { %v1244_v5 = vld [vmem:[%s1788_s0 + $0x80] sm:$0xff]  ;;  %v1245_v9 = vld [vmem:[%s1788_s0 + $0x88] sm:$0xff]  ;;  %v1246_v13 = vld [vmem:[%s1788_s0 + $0x90] sm:$0xff] }
   0x5   :  { %v1252_v6 = vld [vmem:[%s1788_s0 + $0xc0] sm:$0xff]  ;;  %v1253_v10 = vld [vmem:[%s1788_s0 + $0xc8] sm:$0xff]  ;;  %v1254_v14 = vld [vmem:[%s1788_s0 + $0xd0] sm:$0xff] }
   0x6   :  { %498 = vmatpush.bf16.msra.mxu0 %v1261_v1  ;;  %1457 = vmatpush.bf16.msra.mxu1 %v1261_v1  ;;  %v1231_v15 = vld [vmem:[%s1788_s0 + $0x18] sm:$0xff]  ;;  %v1232_v19 = vld [vmem:[%s1788_s0 + $0x20] sm:$0xff]  ;;  %v1233_v23 = vld [vmem:[%s1788_s0 + $0x28] sm:$0xff] }
   0x7   :  { %1458 = vmatpush.bf16.msra.mxu2 %v1261_v1  ;;  %1459 = vmatpush.bf16.msra.mxu3 %v1261_v1  ;;  %v1239_v16 = vld [vmem:[%s1788_s0 + $0x58] sm:$0xff]  ;;  %v1240_v20 = vld [vmem:[%s1788_s0 + $0x60] sm:$0xff]  ;;  %v1241_v24 = vld [vmem:[%s1788_s0 + $0x68] sm:$0xff] }
   0x8   :  { %v1247_v17 = vld [vmem:[%s1788_s0 + $0x98] sm:$0xff]  ;;  %v1248_v21 = vld [vmem:[%s1788_s0 + $0xa0] sm:$0xff]  ;;  %v1249_v25 = vld [vmem:[%s1788_s0 + $0xa8] sm:$0xff] }
   0x9   :  { %v1255_v18 = vld [vmem:[%s1788_s0 + $0xd8] sm:$0xff]  ;;  %v1256_v22 = vld [vmem:[%s1788_s0 + $0xe0] sm:$0xff]  ;;  %v1257_v26 = vld [vmem:[%s1788_s0 + $0xe8] sm:$0xff] }
   0xa   :  { %499 = vmatpush.bf16.msra.mxu0 %v1260_v2  ;;  %1460 = vmatpush.bf16.msra.mxu1 %v1260_v2  ;;  %v1234_v27 = vld [vmem:[%s1788_s0 + $0x30] sm:$0xff]  ;;  %v1235_v31 = vld [vmem:[%s1788_s0 + $0x38] sm:$0xff]  ;;  %v1624_v37 = vld [vmem:[%s1787_s2] ss:$0 sm:$0xff] }
   0xb   :  { %1461 = vmatpush.bf16.msra.mxu2 %v1260_v2  ;;  %1462 = vmatpush.bf16.msra.mxu3 %v1260_v2  ;;  %v1242_v28 = vld [vmem:[%s1788_s0 + $0x70] sm:$0xff]  ;;  %v1243_v32 = vld [vmem:[%s1788_s0 + $0x78] sm:$0xff] }
   0xc   :  { %v1250_v29 = vld [vmem:[%s1788_s0 + $0xb0] sm:$0xff]  ;;  %v1251_v33 = vld [vmem:[%s1788_s0 + $0xb8] sm:$0xff] }
   0xd   :  { %1196 = vmatmul.msk.bf16.vlgmr.msra.gmra.mxu0 %vm395_vm0, %v1228_v3  ;;  %1204 = vmatmul.msk.bf16.vlgmr.msra.gmra.mxu1 %vm395_vm0, %v1236_v4  ;;  %v1258_v30 = vld [vmem:[%s1788_s0 + $0xf0] sm:$0xff]  ;;  %v1259_v34 = vld [vmem:[%s1788_s0 + $0xf8] sm:$0xff] }
   0xe   :  { %1212 = vmatmul.msk.bf16.vlgmr.msra.gmra.mxu2 %vm395_vm0, %v1244_v5  ;;  %1220 = vmatmul.msk.bf16.vlgmr.msra.gmra.mxu3 %vm395_vm0, %v1252_v6 }
  0x1d   :  { %1197 = vmatmul.msk.bf16.gmra.mxu0 %vm395_vm0, %v1229_v7  ;;  %1205 = vmatmul.msk.bf16.gmra.mxu1 %vm395_vm0, %v1237_v8 }
  0x1e   :  { %1213 = vmatmul.msk.bf16.gmra.mxu2 %vm395_vm0, %v1245_v9  ;;  %1221 = vmatmul.msk.bf16.gmra.mxu3 %vm395_vm0, %v1253_v10 }
  0x2d   :  { %1198 = vmatmul.msk.bf16.gmra.mxu0 %vm395_vm0, %v1230_v11  ;;  %1206 = vmatmul.msk.bf16.gmra.mxu1 %vm395_vm0, %v1238_v12 }
  0x2e   :  { %1214 = vmatmul.msk.bf16.gmra.mxu2 %vm395_vm0, %v1246_v13  ;;  %1222 = vmatmul.msk.bf16.gmra.mxu3 %vm395_vm0, %v1254_v14 }
  0x3d   :  { %1199 = vmatmul.msk.bf16.gmra.mxu0 %vm395_vm0, %v1231_v15  ;;  %1207 = vmatmul.msk.bf16.gmra.mxu1 %vm395_vm0, %v1239_v16 }
  0x3e   :  { %1215 = vmatmul.msk.bf16.gmra.mxu2 %vm395_vm0, %v1247_v17  ;;  %1223 = vmatmul.msk.bf16.gmra.mxu3 %vm395_vm0, %v1255_v18 }
  0x4d   :  { %1200 = vmatmul.msk.bf16.gmra.mxu0 %vm395_vm0, %v1232_v19  ;;  %1208 = vmatmul.msk.bf16.gmra.mxu1 %vm395_vm0, %v1240_v20 }
  0x4e   :  { %1216 = vmatmul.msk.bf16.gmra.mxu2 %vm395_vm0, %v1248_v21  ;;  %1224 = vmatmul.msk.bf16.gmra.mxu3 %vm395_vm0, %v1256_v22 }
  0x5d   :  { %1201 = vmatmul.msk.bf16.gmra.mxu0 %vm395_vm0, %v1233_v23  ;;  %1209 = vmatmul.msk.bf16.gmra.mxu1 %vm395_vm0, %v1241_v24 }
  0x5e   :  { %1217 = vmatmul.msk.bf16.gmra.mxu2 %vm395_vm0, %v1249_v25  ;;  %1225 = vmatmul.msk.bf16.gmra.mxu3 %vm395_vm0, %v1257_v26 }
  0x6d   :  { %1202 = vmatmul.msk.bf16.gmra.mxu0 %vm395_vm0, %v1234_v27  ;;  %1210 = vmatmul.msk.bf16.gmra.mxu1 %vm395_vm0, %v1242_v28 }
  0x6e   :  { %1218 = vmatmul.msk.bf16.gmra.mxu2 %vm395_vm0, %v1250_v29  ;;  %1226 = vmatmul.msk.bf16.gmra.mxu3 %vm395_vm0, %v1258_v30 }
  0x7d   :  { %1203 = vmatmul.msk.bf16.gmra.mxu0 %vm395_vm0, %v1235_v31  ;;  %1211 = vmatmul.msk.bf16.gmra.mxu1 %vm395_vm0, %v1243_v32 }
  0x7e   :  { %1219 = vmatmul.msk.bf16.gmra.mxu2 %vm395_vm0, %v1251_v33  ;;  %1227 = vmatmul.msk.bf16.gmra.mxu3 %vm395_vm0, %v1259_v34 }
  0x8a   :  { %v501_v35 = vpop.f32.mrf.mxu0  ;;  %v541_v36 = vpop.f32.mrf.mxu1 }
  0x8b   :  { %v860_v42 = vadd.f32 %v1624_v37, %v501_v35  ;;  %v876_v43 = vadd.f32 %v1624_v37, %v541_v36 }
  0x91   :  { %v581_v38 = vpop.f32.mrf.mxu2  ;;  %v621_v39 = vpop.f32.mrf.mxu3 }
  0x92   :  { %v503_v40 = vpop.f32.mrf.mxu0  ;;  %v543_v41 = vpop.f32.mrf.mxu1  ;;  %v892_v50 = vadd.f32 %v1624_v37, %v581_v38  ;;  %v908_v51 = vadd.f32 %v1624_v37, %v621_v39 }
  0x93   :  { %v861_v44 = vadd.f32 %v1624_v37, %v503_v40  ;;  %v877_v45 = vadd.f32 %v1624_v37, %v543_v41 }
  0x95   :  { %v1266_v46 = vpack.c.bf16 %v861_v44, %v860_v42  ;;  %v1306_v47 = vpack.c.bf16 %v877_v45, %v876_v43 }
  0x97   :  { %1267 = vst [vmem:[%s1789_s3] sm:$0xff] %v1266_v46  }
  0x98   :  { %1430 = vst [vmem:[%s1789_s3 + $0x40] sm:$0xff] %v1306_v47  }
  0x99   :  { %v583_v48 = vpop.f32.mrf.mxu2  ;;  %v623_v49 = vpop.f32.mrf.mxu3 }
  0x9a   :  { %v893_v52 = vadd.f32 %v1624_v37, %v583_v48  ;;  %v909_v53 = vadd.f32 %v1624_v37, %v623_v49  ;;  %v506_v54 = vpop.f32.mrf.mxu0  ;;  %v546_v55 = vpop.f32.mrf.mxu1 }
  0x9b   :  { %v862_v62 = vadd.f32 %v1624_v37, %v506_v54  ;;  %v878_v63 = vadd.f32 %v1624_v37, %v546_v55 }
  0x9c   :  { %v1346_v56 = vpack.c.bf16 %v893_v52, %v892_v50  ;;  %v1386_v57 = vpack.c.bf16 %v909_v53, %v908_v51 }
  0x9e   :  { %1438 = vst [vmem:[%s1789_s3 + $0x80] sm:$0xff] %v1346_v56  }
  0x9f   :  { %1446 = vst [vmem:[%s1789_s3 + $0xc0] sm:$0xff] %v1386_v57  }
  0xa1   :  { %v586_v58 = vpop.f32.mrf.mxu2  ;;  %v626_v59 = vpop.f32.mrf.mxu3 }
  0xa2   :  { %v508_v60 = vpop.f32.mrf.mxu0  ;;  %v548_v61 = vpop.f32.mrf.mxu1  ;;  %v894_v6 = vadd.f32 %v1624_v37, %v586_v58  ;;  %v910_v7 = vadd.f32 %v1624_v37, %v626_v59 }
  0xa3   :  { %v863_v0 = vadd.f32 %v1624_v37, %v508_v60  ;;  %v879_v1 = vadd.f32 %v1624_v37, %v548_v61 }
  0xa5   :  { %v1271_v2 = vpack.c.bf16 %v863_v0, %v862_v62  ;;  %v1311_v3 = vpack.c.bf16 %v879_v1, %v878_v63 }
  0xa7   :  { %1423 = vst [vmem:[%s1789_s3 + $0x8] sm:$0xff] %v1271_v2  }
  0xa8   :  { %1431 = vst [vmem:[%s1789_s3 + $0x48] sm:$0xff] %v1311_v3  }
  0xa9   :  { %v588_v4 = vpop.f32.mrf.mxu2  ;;  %v628_v5 = vpop.f32.mrf.mxu3 }
  0xaa   :  { %v895_v8 = vadd.f32 %v1624_v37, %v588_v4  ;;  %v911_v9 = vadd.f32 %v1624_v37, %v628_v5  ;;  %v511_v10 = vpop.f32.mrf.mxu0  ;;  %v551_v11 = vpop.f32.mrf.mxu1 }
  0xab   :  { %v864_v18 = vadd.f32 %v1624_v37, %v511_v10  ;;  %v880_v19 = vadd.f32 %v1624_v37, %v551_v11 }
  0xac   :  { %v1351_v12 = vpack.c.bf16 %v895_v8, %v894_v6  ;;  %v1391_v13 = vpack.c.bf16 %v911_v9, %v910_v7 }
  0xae   :  { %1439 = vst [vmem:[%s1789_s3 + $0x88] sm:$0xff] %v1351_v12  }
  0xaf   :  { %1447 = vst [vmem:[%s1789_s3 + $0xc8] sm:$0xff] %v1391_v13  }
  0xb1   :  { %v591_v14 = vpop.f32.mrf.mxu2  ;;  %v631_v15 = vpop.f32.mrf.mxu3 }
  0xb2   :  { %v513_v16 = vpop.f32.mrf.mxu0  ;;  %v553_v17 = vpop.f32.mrf.mxu1  ;;  %v896_v26 = vadd.f32 %v1624_v37, %v591_v14  ;;  %v912_v27 = vadd.f32 %v1624_v37, %v631_v15 }
  0xb3   :  { %v865_v20 = vadd.f32 %v1624_v37, %v513_v16  ;;  %v881_v21 = vadd.f32 %v1624_v37, %v553_v17 }
  0xb5   :  { %v1276_v22 = vpack.c.bf16 %v865_v20, %v864_v18  ;;  %v1316_v23 = vpack.c.bf16 %v881_v21, %v880_v19 }
  0xb7   :  { %1424 = vst [vmem:[%s1789_s3 + $0x10] sm:$0xff] %v1276_v22  }
  0xb8   :  { %1432 = vst [vmem:[%s1789_s3 + $0x50] sm:$0xff] %v1316_v23  }
  0xb9   :  { %v593_v24 = vpop.f32.mrf.mxu2  ;;  %v633_v25 = vpop.f32.mrf.mxu3 }
  0xba   :  { %v897_v28 = vadd.f32 %v1624_v37, %v593_v24  ;;  %v913_v29 = vadd.f32 %v1624_v37, %v633_v25  ;;  %v516_v30 = vpop.f32.mrf.mxu0  ;;  %v556_v31 = vpop.f32.mrf.mxu1 }
  0xbb   :  { %v866_v39 = vadd.f32 %v1624_v37, %v516_v30  ;;  %v882_v40 = vadd.f32 %v1624_v37, %v556_v31 }
  0xbc   :  { %v1356_v32 = vpack.c.bf16 %v897_v28, %v896_v26  ;;  %v1396_v33 = vpack.c.bf16 %v913_v29, %v912_v27 }
  0xbe   :  { %1440 = vst [vmem:[%s1789_s3 + $0x90] sm:$0xff] %v1356_v32  }
  0xbf   :  { %1448 = vst [vmem:[%s1789_s3 + $0xd0] sm:$0xff] %v1396_v33  }
  0xc1   :  { %v596_v34 = vpop.f32.mrf.mxu2  ;;  %v636_v35 = vpop.f32.mrf.mxu3 }
  0xc2   :  { %v518_v36 = vpop.f32.mrf.mxu0  ;;  %v558_v38 = vpop.f32.mrf.mxu1  ;;  %v898_v47 = vadd.f32 %v1624_v37, %v596_v34  ;;  %v914_v48 = vadd.f32 %v1624_v37, %v636_v35 }
  0xc3   :  { %v867_v41 = vadd.f32 %v1624_v37, %v518_v36  ;;  %v883_v42 = vadd.f32 %v1624_v37, %v558_v38 }
  0xc5   :  { %v1281_v43 = vpack.c.bf16 %v867_v41, %v866_v39  ;;  %v1321_v44 = vpack.c.bf16 %v883_v42, %v882_v40 }
  0xc7   :  { %1425 = vst [vmem:[%s1789_s3 + $0x18] sm:$0xff] %v1281_v43  }
  0xc8   :  { %1433 = vst [vmem:[%s1789_s3 + $0x58] sm:$0xff] %v1321_v44  }
  0xc9   :  { %v598_v45 = vpop.f32.mrf.mxu2  ;;  %v638_v46 = vpop.f32.mrf.mxu3 }
  0xca   :  { %v899_v49 = vadd.f32 %v1624_v37, %v598_v45  ;;  %v915_v50 = vadd.f32 %v1624_v37, %v638_v46  ;;  %v521_v51 = vpop.f32.mrf.mxu0  ;;  %v561_v52 = vpop.f32.mrf.mxu1 }
  0xcb   :  { %v868_v59 = vadd.f32 %v1624_v37, %v521_v51  ;;  %v884_v60 = vadd.f32 %v1624_v37, %v561_v52 }
  0xcc   :  { %v1361_v53 = vpack.c.bf16 %v899_v49, %v898_v47  ;;  %v1401_v54 = vpack.c.bf16 %v915_v50, %v914_v48 }
  0xce   :  { %1441 = vst [vmem:[%s1789_s3 + $0x98] sm:$0xff] %v1361_v53  }
  0xcf   :  { %1449 = vst [vmem:[%s1789_s3 + $0xd8] sm:$0xff] %v1401_v54  }
  0xd1   :  { %v601_v55 = vpop.f32.mrf.mxu2  ;;  %v641_v56 = vpop.f32.mrf.mxu3 }
  0xd2   :  { %v523_v57 = vpop.f32.mrf.mxu0  ;;  %v563_v58 = vpop.f32.mrf.mxu1  ;;  %v900_v3 = vadd.f32 %v1624_v37, %v601_v55  ;;  %v916_v4 = vadd.f32 %v1624_v37, %v641_v56 }
  0xd3   :  { %v869_v61 = vadd.f32 %v1624_v37, %v523_v57  ;;  %v885_v62 = vadd.f32 %v1624_v37, %v563_v58 }
  0xd5   :  { %v1286_v63 = vpack.c.bf16 %v869_v61, %v868_v59  ;;  %v1326_v0 = vpack.c.bf16 %v885_v62, %v884_v60 }
  0xd7   :  { %1426 = vst [vmem:[%s1789_s3 + $0x20] sm:$0xff] %v1286_v63  }
  0xd8   :  { %1434 = vst [vmem:[%s1789_s3 + $0x60] sm:$0xff] %v1326_v0  }
  0xd9   :  { %v603_v1 = vpop.f32.mrf.mxu2  ;;  %v643_v2 = vpop.f32.mrf.mxu3 }
  0xda   :  { %v901_v5 = vadd.f32 %v1624_v37, %v603_v1  ;;  %v917_v6 = vadd.f32 %v1624_v37, %v643_v2  ;;  %v526_v7 = vpop.f32.mrf.mxu0  ;;  %v566_v8 = vpop.f32.mrf.mxu1 }
  0xdb   :  { %v870_v15 = vadd.f32 %v1624_v37, %v526_v7  ;;  %v886_v16 = vadd.f32 %v1624_v37, %v566_v8 }
  0xdc   :  { %v1366_v9 = vpack.c.bf16 %v901_v5, %v900_v3  ;;  %v1406_v10 = vpack.c.bf16 %v917_v6, %v916_v4 }
  0xde   :  { %1442 = vst [vmem:[%s1789_s3 + $0xa0] sm:$0xff] %v1366_v9  }
  0xdf   :  { %1450 = vst [vmem:[%s1789_s3 + $0xe0] sm:$0xff] %v1406_v10  }
  0xe1   :  { %v606_v11 = vpop.f32.mrf.mxu2  ;;  %v646_v12 = vpop.f32.mrf.mxu3 }
  0xe2   :  { %v528_v13 = vpop.f32.mrf.mxu0  ;;  %v568_v14 = vpop.f32.mrf.mxu1  ;;  %v902_v23 = vadd.f32 %v1624_v37, %v606_v11  ;;  %v918_v24 = vadd.f32 %v1624_v37, %v646_v12 }
  0xe3   :  { %v871_v17 = vadd.f32 %v1624_v37, %v528_v13  ;;  %v887_v18 = vadd.f32 %v1624_v37, %v568_v14 }
  0xe5   :  { %v1291_v19 = vpack.c.bf16 %v871_v17, %v870_v15  ;;  %v1331_v20 = vpack.c.bf16 %v887_v18, %v886_v16 }
  0xe7   :  { %1427 = vst [vmem:[%s1789_s3 + $0x28] sm:$0xff] %v1291_v19  }
  0xe8   :  { %1435 = vst [vmem:[%s1789_s3 + $0x68] sm:$0xff] %v1331_v20  }
  0xe9   :  { %v608_v21 = vpop.f32.mrf.mxu2  ;;  %v648_v22 = vpop.f32.mrf.mxu3 }
  0xea   :  { %v903_v25 = vadd.f32 %v1624_v37, %v608_v21  ;;  %v919_v26 = vadd.f32 %v1624_v37, %v648_v22  ;;  %v531_v27 = vpop.f32.mrf.mxu0  ;;  %v571_v28 = vpop.f32.mrf.mxu1 }
  0xeb   :  { %v872_v35 = vadd.f32 %v1624_v37, %v531_v27  ;;  %v888_v36 = vadd.f32 %v1624_v37, %v571_v28 }
  0xec   :  { %v1371_v29 = vpack.c.bf16 %v903_v25, %v902_v23  ;;  %v1411_v30 = vpack.c.bf16 %v919_v26, %v918_v24 }
  0xee   :  { %1443 = vst [vmem:[%s1789_s3 + $0xa8] sm:$0xff] %v1371_v29  }
  0xef   :  { %1451 = vst [vmem:[%s1789_s3 + $0xe8] sm:$0xff] %v1411_v30  }
  0xf1   :  { %v611_v31 = vpop.f32.mrf.mxu2  ;;  %v651_v32 = vpop.f32.mrf.mxu3 }
  0xf2   :  { %v533_v33 = vpop.f32.mrf.mxu0  ;;  %v573_v34 = vpop.f32.mrf.mxu1  ;;  %v904_v44 = vadd.f32 %v1624_v37, %v611_v31  ;;  %v920_v45 = vadd.f32 %v1624_v37, %v651_v32 }
  0xf3   :  { %v873_v38 = vadd.f32 %v1624_v37, %v533_v33  ;;  %v889_v39 = vadd.f32 %v1624_v37, %v573_v34 }
  0xf5   :  { %v1296_v40 = vpack.c.bf16 %v873_v38, %v872_v35  ;;  %v1336_v41 = vpack.c.bf16 %v889_v39, %v888_v36 }
  0xf7   :  { %1428 = vst [vmem:[%s1789_s3 + $0x30] sm:$0xff] %v1296_v40  }
  0xf8   :  { %1436 = vst [vmem:[%s1789_s3 + $0x70] sm:$0xff] %v1336_v41  }
  0xf9   :  { %v613_v42 = vpop.f32.mrf.mxu2  ;;  %v653_v43 = vpop.f32.mrf.mxu3 }
  0xfa   :  { %v905_v46 = vadd.f32 %v1624_v37, %v613_v42  ;;  %v921_v47 = vadd.f32 %v1624_v37, %v653_v43  ;;  %v536_v48 = vpop.f32.mrf.mxu0  ;;  %v576_v49 = vpop.f32.mrf.mxu1 }
  0xfb   :  { %v874_v56 = vadd.f32 %v1624_v37, %v536_v48  ;;  %v890_v57 = vadd.f32 %v1624_v37, %v576_v49 }
  0xfc   :  { %v1376_v50 = vpack.c.bf16 %v905_v46, %v904_v44  ;;  %v1416_v51 = vpack.c.bf16 %v921_v47, %v920_v45 }
  0xfe   :  { %1444 = vst [vmem:[%s1789_s3 + $0xb0] sm:$0xff] %v1376_v50  }
  0xff   :  { %1452 = vst [vmem:[%s1789_s3 + $0xf0] sm:$0xff] %v1416_v51  }
 0x101   :  { %v616_v52 = vpop.f32.mrf.mxu2  ;;  %v656_v53 = vpop.f32.mrf.mxu3 }
 0x102   :  { %v538_v54 = vpop.f32.mrf.mxu0  ;;  %v578_v55 = vpop.f32.mrf.mxu1  ;;  %v906_v0 = vadd.f32 %v1624_v37, %v616_v52  ;;  %v922_v1 = vadd.f32 %v1624_v37, %v656_v53 }
 0x103   :  { %v875_v58 = vadd.f32 %v1624_v37, %v538_v54  ;;  %v891_v59 = vadd.f32 %v1624_v37, %v578_v55 }
 0x105   :  { %v1301_v60 = vpack.c.bf16 %v875_v58, %v874_v56  ;;  %v1341_v61 = vpack.c.bf16 %v891_v59, %v890_v57 }
 0x107   :  { %1429 = vst [vmem:[%s1789_s3 + $0x38] sm:$0xff] %v1301_v60  }
 0x108   :  { %1437 = vst [vmem:[%s1789_s3 + $0x78] sm:$0xff] %v1341_v61  }
 0x109   :  { %v618_v62 = vpop.f32.mrf.mxu2  ;;  %v658_v63 = vpop.f32.mrf.mxu3 }
 0x10a   :  { %v907_v2 = vadd.f32 %v1624_v37, %v618_v62  ;;  %v923_v3 = vadd.f32 %v1624_v37, %v658_v63 }
 0x10c   :  { %v1381_v4 = vpack.c.bf16 %v907_v2, %v906_v0  ;;  %v1421_v5 = vpack.c.bf16 %v923_v3, %v922_v1 }
 0x10e   :  { %1445 = vst [vmem:[%s1789_s3 + $0xb8] sm:$0xff] %v1381_v4  }
 0x10f   :  { %1453 = vst [vmem:[%s1789_s3 + $0xf8] sm:$0xff] %v1421_v5  }

// kernel: _lambda_.26
= control target key start
LH: loop header
LB: loop body
LE: loop exit
PB: predicated region body
PF: predicated region fallthrough
CT: control target
= control target key end

     0   :  { %s611_s1 = inlined_call_operand.vmem [shape: bf16[128,128], index: 1, kind: input, shape index: {}]   ;;  %s612_s2 = inlined_call_operand.vmem [shape: f32[1,128], index: 2, kind: input, shape index: {}]   ;;  %s613_s0 = inlined_call_operand.vmem [shape: bf16[128,128], index: 0, kind: input, shape index: {}]   ;;  %s614_s3 = inlined_call_operand.vmem [shape: bf16[128,128], index: 3, kind: output, shape index: {}]  }
   0x1   :  { %v397_v0 = vld [vmem:[%s611_s1 + $0x38] sm:$0xff]  ;;  %v396_v1 = vld [vmem:[%s611_s1 + $0x30] sm:$0xff]  ;;  %v395_v2 = vld [vmem:[%s611_s1 + $0x28] sm:$0xff] }
   0x2   :  { %202 = vmatpush.bf16.msra.mxu0 %v397_v0  ;;  %484 = vmatpush.bf16.msra.mxu1 %v397_v0  ;;  %v394_v3 = vld [vmem:[%s611_s1 + $0x20] sm:$0xff]  ;;  %v393_v5 = vld [vmem:[%s611_s1 + $0x18] sm:$0xff]  ;;  %v471_v6 = vld [vmem:[%s613_s0 + $0x10] sm:$0xff]  }
   0x3   :  { %485 = vmatpush.bf16.msra.mxu2 %v397_v0  ;;  %486 = vmatpush.bf16.msra.mxu3 %v397_v0  ;;  %v399_v4 = vld [vmem:[%s613_s0] sm:$0xff]   ;;  %v475_v9 = vld [vmem:[%s613_s0 + $0x30] sm:$0xff]   ;;  %v408_v11 = vunpack.c.l.bf16 %v471_v6  ;;  %v409_v13 = vunpack.c.h.bf16 %v471_v6  ;;  %v391_v18 = vld [vmem:[%s611_s1 + $0x8] sm:$0xff] }
   0x4   :  { %v473_v7 = vld [vmem:[%s613_s0 + $0x20] sm:$0xff]   ;;  %v400_v8 = vunpack.c.l.bf16 %v399_v4  ;;  %v401_v10 = vunpack.c.h.bf16 %v399_v4  ;;  %v392_v12 = vld [vmem:[%s611_s1 + $0x10] sm:$0xff]  ;;  %v424_v16 = vunpack.c.l.bf16 %v475_v9  ;;  %v425_v17 = vunpack.c.h.bf16 %v475_v9  ;;  %v470_v38 = vld [vmem:[%s613_s0 + $0x8] sm:$0xff]  }
   0x5   :  { %v416_v14 = vunpack.c.l.bf16 %v473_v7  ;;  %v417_v15 = vunpack.c.h.bf16 %v473_v7  ;;  %vm70_vm2 = vcmp.ge.f32.partialorder %v408_v11, 0.0  ;;  %v86_v21 = vmul.f32 0.2, %v408_v11  ;;  %v390_v29 = vld [vmem:[%s611_s1] sm:$0xff]  ;;  %v472_v41 = vld [vmem:[%s613_s0 + $0x18] sm:$0xff]   ;;  %v474_v42 = vld [vmem:[%s613_s0 + $0x28] sm:$0xff]  }
   0x6   :  { %203 = vmatpush.bf16.msra.mxu0 %v396_v1  ;;  %487 = vmatpush.bf16.msra.mxu1 %v396_v1  ;;  %vm66_vm0 = vcmp.ge.f32.partialorder %v400_v8, 0.0  ;;  %v82_v19 = vmul.f32 0.2, %v400_v8  ;;  %vm67_vm1 = vcmp.ge.f32.partialorder %v401_v10, 0.0  ;;  %v83_v20 = vmul.f32 0.2, %v401_v10 }
   0x7   :  { %488 = vmatpush.bf16.msra.mxu2 %v396_v1  ;;  %489 = vmatpush.bf16.msra.mxu3 %v396_v1  ;;  %vm71_vm3 = vcmp.ge.f32.partialorder %v409_v13, 0.0  ;;  %v87_v22 = vmul.f32 0.2, %v409_v13  ;;  %vm74_vm4 = vcmp.ge.f32.partialorder %v416_v14, 0.0  ;;  %v90_v23 = vmul.f32 0.2, %v416_v14 }
   0x8   :  { %v91_v24 = vmul.f32 0.2, %v417_v15  ;;  %v94_v25 = vmul.f32 0.2, %v424_v16  ;;  %v95_v26 = vmul.f32 0.2, %v425_v17  ;;  %v98_v27 = vsel %vm66_vm0, %v400_v8, %v82_v19 }
   0x9   :  { %vm75_vm5 = vcmp.ge.f32.partialorder %v417_v15, 0.0  ;;  %vm78_vm6 = vcmp.ge.f32.partialorder %v424_v16, 0.0  ;;  %vm79_vm7 = vcmp.ge.f32.partialorder %v425_v17, 0.0  ;;  %v99_v28 = vsel %vm67_vm1, %v401_v10, %v83_v20  ;;  %v476_v45 = vld [vmem:[%s613_s0 + $0x38] sm:$0xff]   ;;  %v508_v10 = vld [vmem:[%s612_s2] ss:$0 sm:$0xff] }
   0xa   :  { %204 = vmatpush.bf16.msra.mxu0 %v395_v2  ;;  %490 = vmatpush.bf16.msra.mxu1 %v395_v2  ;;  %v102_v30 = vsel %vm70_vm2, %v408_v11, %v86_v21  ;;  %v103_v31 = vsel %vm71_vm3, %v409_v13, %v87_v22  ;;  %v106_v32 = vsel %vm74_vm4, %v416_v14, %v90_v23  ;;  %v404_v43 = vunpack.c.l.bf16 %v470_v38 }
   0xb   :  { %491 = vmatpush.bf16.msra.mxu2 %v395_v2  ;;  %492 = vmatpush.bf16.msra.mxu3 %v395_v2  ;;  %v107_v33 = vsel %vm75_vm5, %v417_v15, %v91_v24  ;;  %v110_v34 = vsel %vm78_vm6, %v424_v16, %v94_v25  ;;  %v111_v35 = vsel %vm79_vm7, %v425_v17, %v95_v26  ;;  %v405_v44 = vunpack.c.h.bf16 %v470_v38 }
   0xc   :  { %v114_v36 = vpack.c.bf16 %v99_v28, %v98_v27  ;;  %v116_v37 = vpack.c.bf16 %v103_v31, %v102_v30  ;;  %v118_v39 = vpack.c.bf16 %v107_v33, %v106_v32  ;;  %v120_v40 = vpack.c.bf16 %v111_v35, %v110_v34 }
   0xd   :  { %v412_v46 = vunpack.c.l.bf16 %v472_v41  ;;  %v413_v47 = vunpack.c.h.bf16 %v472_v41  ;;  %v420_v48 = vunpack.c.l.bf16 %v474_v42  ;;  %v421_v49 = vunpack.c.h.bf16 %v474_v42 }
   0xe   :  { %205 = vmatpush.bf16.msra.mxu0 %v394_v3  ;;  %493 = vmatpush.bf16.msra.mxu1 %v394_v3  ;;  %v428_v50 = vunpack.c.l.bf16 %v476_v45  ;;  %v429_v51 = vunpack.c.h.bf16 %v476_v45  ;;  %vm68_vm8 = vcmp.ge.f32.partialorder %v404_v43, 0.0  ;;  %vm69_vm9 = vcmp.ge.f32.partialorder %v405_v44, 0.0 }
   0xf   :  { %494 = vmatpush.bf16.msra.mxu2 %v394_v3  ;;  %495 = vmatpush.bf16.msra.mxu3 %v394_v3  ;;  %v84_v52 = vmul.f32 0.2, %v404_v43  ;;  %v85_v53 = vmul.f32 0.2, %v405_v44  ;;  %vm72_vm10 = vcmp.ge.f32.partialorder %v412_v46, 0.0  ;;  %vm73_vm11 = vcmp.ge.f32.partialorder %v413_v47, 0.0 }
  0x10   :  { %v88_v54 = vmul.f32 0.2, %v412_v46  ;;  %v89_v55 = vmul.f32 0.2, %v413_v47  ;;  %v92_v56 = vmul.f32 0.2, %v420_v48 }
  0x11   :  { %v93_v57 = vmul.f32 0.2, %v421_v49  ;;  %v96_v58 = vmul.f32 0.2, %v428_v50  ;;  %v97_v59 = vmul.f32 0.2, %v429_v51  ;;  %v100_v60 = vsel %vm68_vm8, %v404_v43, %v84_v52 }
  0x12   :  { %206 = vmatpush.bf16.msra.mxu0 %v393_v5  ;;  %496 = vmatpush.bf16.msra.mxu1 %v393_v5  ;;  %vm76_vm12 = vcmp.ge.f32.partialorder %v420_v48, 0.0  ;;  %vm77_vm13 = vcmp.ge.f32.partialorder %v421_v49, 0.0  ;;  %vm80_vm14 = vcmp.ge.f32.partialorder %v428_v50, 0.0  ;;  %vm81_vm15 = vcmp.ge.f32.partialorder %v429_v51, 0.0 }
  0x13   :  { %497 = vmatpush.bf16.msra.mxu2 %v393_v5  ;;  %498 = vmatpush.bf16.msra.mxu3 %v393_v5  ;;  %v101_v61 = vsel %vm69_vm9, %v405_v44, %v85_v53  ;;  %v104_v62 = vsel %vm72_vm10, %v412_v46, %v88_v54  ;;  %v105_v63 = vsel %vm73_vm11, %v413_v47, %v89_v55 }
  0x14   :  { %v108_v0 = vsel %vm76_vm12, %v420_v48, %v92_v56  ;;  %v109_v1 = vsel %vm77_vm13, %v421_v49, %v93_v57  ;;  %v112_v2 = vsel %vm80_vm14, %v428_v50, %v96_v58  ;;  %v113_v3 = vsel %vm81_vm15, %v429_v51, %v97_v59 }
  0x15   :  { %v115_v4 = vpack.c.bf16 %v101_v61, %v100_v60  ;;  %v117_v5 = vpack.c.bf16 %v105_v63, %v104_v62  ;;  %v119_v6 = vpack.c.bf16 %v109_v1, %v108_v0  ;;  %v121_v7 = vpack.c.bf16 %v113_v3, %v112_v2 }
  0x16   :  { %207 = vmatpush.bf16.msra.mxu0 %v392_v12  ;;  %499 = vmatpush.bf16.msra.mxu1 %v392_v12 }
  0x17   :  { %500 = vmatpush.bf16.msra.mxu2 %v392_v12  ;;  %501 = vmatpush.bf16.msra.mxu3 %v392_v12 }
  0x1a   :  { %208 = vmatpush.bf16.msra.mxu0 %v391_v18  ;;  %502 = vmatpush.bf16.msra.mxu1 %v391_v18 }
  0x1b   :  { %503 = vmatpush.bf16.msra.mxu2 %v391_v18  ;;  %504 = vmatpush.bf16.msra.mxu3 %v391_v18 }
  0x1e   :  { %209 = vmatpush.bf16.msra.mxu0 %v390_v29  ;;  %505 = vmatpush.bf16.msra.mxu1 %v390_v29 }
  0x1f   :  { %506 = vmatpush.bf16.msra.mxu2 %v390_v29  ;;  %507 = vmatpush.bf16.msra.mxu3 %v390_v29 }
  0x21   :  { %210 = vmatmul.bf16.vlgmr.msra.gmra.mxu0 %v114_v36  ;;  %220 = vmatmul.bf16.vlgmr.msra.gmra.mxu1 %v116_v37 }
  0x22   :  { %230 = vmatmul.bf16.vlgmr.msra.gmra.mxu2 %v118_v39  ;;  %240 = vmatmul.bf16.vlgmr.msra.gmra.mxu3 %v120_v40 }
  0x31   :  { %215 = vmatmul.bf16.gmra.mxu0 %v115_v4  ;;  %225 = vmatmul.bf16.gmra.mxu1 %v117_v5 }
  0x32   :  { %235 = vmatmul.bf16.gmra.mxu2 %v119_v6  ;;  %245 = vmatmul.bf16.gmra.mxu3 %v121_v7 }
  0x9e   :  { %v211_v8 = vpop.f32.mrf.mxu0  ;;  %v221_v9 = vpop.f32.mrf.mxu1 }
  0x9f   :  { %v306_v15 = vadd.f32 %v508_v10, %v211_v8  ;;  %v310_v16 = vadd.f32 %v508_v10, %v221_v9 }
  0xa5   :  { %v231_v11 = vpop.f32.mrf.mxu2  ;;  %v241_v12 = vpop.f32.mrf.mxu3 }
  0xa6   :  { %v213_v13 = vpop.f32.mrf.mxu0  ;;  %v223_v14 = vpop.f32.mrf.mxu1  ;;  %v314_v23 = vadd.f32 %v508_v10, %v231_v11  ;;  %v318_v24 = vadd.f32 %v508_v10, %v241_v12 }
  0xa7   :  { %v307_v17 = vadd.f32 %v508_v10, %v213_v13  ;;  %v311_v18 = vadd.f32 %v508_v10, %v223_v14 }
  0xa9   :  { %v433_v19 = vpack.c.bf16 %v307_v17, %v306_v15  ;;  %v443_v20 = vpack.c.bf16 %v311_v18, %v310_v16 }
  0xab   :  { %434 = vst [vmem:[%s614_s3] sm:$0xff] %v433_v19  }
  0xac   :  { %478 = vst [vmem:[%s614_s3 + $0x10] sm:$0xff] %v443_v20  }
  0xad   :  { %v233_v21 = vpop.f32.mrf.mxu2  ;;  %v243_v22 = vpop.f32.mrf.mxu3 }
  0xae   :  { %v315_v25 = vadd.f32 %v508_v10, %v233_v21  ;;  %v319_v26 = vadd.f32 %v508_v10, %v243_v22  ;;  %v216_v27 = vpop.f32.mrf.mxu0  ;;  %v226_v28 = vpop.f32.mrf.mxu1 }
  0xaf   :  { %v308_v35 = vadd.f32 %v508_v10, %v216_v27  ;;  %v312_v36 = vadd.f32 %v508_v10, %v226_v28 }
  0xb0   :  { %v453_v29 = vpack.c.bf16 %v315_v25, %v314_v23  ;;  %v463_v30 = vpack.c.bf16 %v319_v26, %v318_v24 }
  0xb2   :  { %480 = vst [vmem:[%s614_s3 + $0x20] sm:$0xff] %v453_v29  }
  0xb3   :  { %482 = vst [vmem:[%s614_s3 + $0x30] sm:$0xff] %v463_v30  }
  0xb5   :  { %v236_v31 = vpop.f32.mrf.mxu2  ;;  %v246_v32 = vpop.f32.mrf.mxu3 }
  0xb6   :  { %v218_v33 = vpop.f32.mrf.mxu0  ;;  %v228_v34 = vpop.f32.mrf.mxu1  ;;  %v316_v43 = vadd.f32 %v508_v10, %v236_v31  ;;  %v320_v44 = vadd.f32 %v508_v10, %v246_v32 }
  0xb7   :  { %v309_v37 = vadd.f32 %v508_v10, %v218_v33  ;;  %v313_v38 = vadd.f32 %v508_v10, %v228_v34 }
  0xb9   :  { %v438_v39 = vpack.c.bf16 %v309_v37, %v308_v35  ;;  %v448_v40 = vpack.c.bf16 %v313_v38, %v312_v36 }
  0xbb   :  { %477 = vst [vmem:[%s614_s3 + $0x8] sm:$0xff] %v438_v39  }
  0xbc   :  { %479 = vst [vmem:[%s614_s3 + $0x18] sm:$0xff] %v448_v40  }
  0xbd   :  { %v238_v41 = vpop.f32.mrf.mxu2  ;;  %v248_v42 = vpop.f32.mrf.mxu3 }
  0xbe   :  { %v317_v45 = vadd.f32 %v508_v10, %v238_v41  ;;  %v321_v46 = vadd.f32 %v508_v10, %v248_v42 }
  0xc0   :  { %v458_v47 = vpack.c.bf16 %v317_v45, %v316_v43  ;;  %v468_v48 = vpack.c.bf16 %v321_v46, %v320_v44 }
  0xc2   :  { %481 = vst [vmem:[%s614_s3 + $0x28] sm:$0xff] %v458_v47  }
  0xc3   :  { %483 = vst [vmem:[%s614_s3 + $0x38] sm:$0xff] %v468_v48  }

// kernel: _lambda_.27
= control target key start
LH: loop header
LB: loop body
LE: loop exit
PB: predicated region body
PF: predicated region fallthrough
CT: control target
= control target key end

     0   :  { %s469_s1 = inlined_call_operand.vmem [shape: bf16[256,128], index: 1, kind: input, shape index: {}]   ;;  %s470_s0 = inlined_call_operand.vmem [shape: bf16[32,256], index: 0, kind: input, shape index: {}]   ;;  %s471_s2 = inlined_call_operand.vmem [shape: f32[1,128], index: 2, kind: input, shape index: {}]   ;;  %s472_s3 = inlined_call_operand.vmem [shape: bf16[32,128], index: 3, kind: output, shape index: {}]  }
   0x1   :  { %v338_v0 = vld [vmem:[%s469_s1 + $0x38] sm:$0xff]  ;;  %v337_v2 = vld [vmem:[%s469_s1 + $0x30] sm:$0xff]  ;;  %v336_v4 = vld [vmem:[%s469_s1 + $0x28] sm:$0xff] }
   0x2   :  { %v346_v1 = vld [vmem:[%s469_s1 + $0x78] sm:$0xff]  ;;  %194 = vmatpush.bf16.msra.mxu0 %v338_v0  ;;  %358 = vmatpush.bf16.msra.mxu2 %v338_v0  ;;  %v345_v3 = vld [vmem:[%s469_s1 + $0x70] sm:$0xff]  ;;  %v344_v5 = vld [vmem:[%s469_s1 + $0x68] sm:$0xff] }
   0x3   :  { %213 = vmatpush.bf16.msra.mxu1 %v346_v1  ;;  %366 = vmatpush.bf16.msra.mxu3 %v346_v1  ;;  %v335_v6 = vld [vmem:[%s469_s1 + $0x20] sm:$0xff]  ;;  %v334_v9 = vld [vmem:[%s469_s1 + $0x18] sm:$0xff]  ;;  %v23_v10 = vld [vmem:[%s470_s0 + $0x8] sm:$0xff] }
   0x4   :  { %v343_v7 = vld [vmem:[%s469_s1 + $0x60] sm:$0xff]  ;;  %v24_v11 = vld [vmem:[%s470_s0 + $0x10] sm:$0xff]  ;;  %v342_v12 = vld [vmem:[%s469_s1 + $0x58] sm:$0xff]  ;;  %v28_v15 = vunpack.c.l.bf16 %v23_v10  ;;  %v29_v21 = vunpack.c.h.bf16 %v23_v10 }
   0x5   :  { %v22_v8 = vld [vmem:[%s470_s0] sm:$0xff]  ;;  %v25_v13 = vld [vmem:[%s470_s0 + $0x18] sm:$0xff]  ;;  %v30_v16 = vunpack.c.l.bf16 %v24_v11  ;;  %v333_v17 = vld [vmem:[%s469_s1 + $0x10] sm:$0xff]  ;;  %v31_v22 = vunpack.c.h.bf16 %v24_v11 }
   0x6   :  { %195 = vmatpush.bf16.msra.mxu0 %v337_v2  ;;  %359 = vmatpush.bf16.msra.mxu2 %v337_v2  ;;  %v26_v14 = vunpack.c.l.bf16 %v22_v8  ;;  %v32_v18 = vunpack.c.l.bf16 %v25_v13  ;;  %v27_v19 = vunpack.c.h.bf16 %v22_v8  ;;  %v341_v20 = vld [vmem:[%s469_s1 + $0x50] sm:$0xff]  ;;  %v33_v23 = vunpack.c.h.bf16 %v25_v13  ;;  %v332_v24 = vld [vmem:[%s469_s1 + $0x8] sm:$0xff]  ;;  %v331_v36 = vld [vmem:[%s469_s1] sm:$0xff] }
   0x7   :  { %214 = vmatpush.bf16.msra.mxu1 %v345_v3  ;;  %367 = vmatpush.bf16.msra.mxu3 %v345_v3  ;;  %v340_v26 = vld [vmem:[%s469_s1 + $0x48] sm:$0xff]  ;;  %vm36_vm1 = vcmp.ge.f32.partialorder %v28_v15, 0.0  ;;  %v44_v27 = vmul.f32 0.2, %v28_v15  ;;  %vm38_vm2 = vcmp.ge.f32.partialorder %v30_v16, 0.0  ;;  %vm37_vm5 = vcmp.ge.f32.partialorder %v29_v21, 0.0 }
   0x8   :  { %vm34_vm0 = vcmp.ge.f32.partialorder %v26_v14, 0.0  ;;  %v42_v25 = vmul.f32 0.2, %v26_v14  ;;  %v46_v28 = vmul.f32 0.2, %v30_v16  ;;  %vm40_vm3 = vcmp.ge.f32.partialorder %v32_v18, 0.0 }
   0x9   :  { %v48_v29 = vmul.f32 0.2, %v32_v18  ;;  %vm35_vm4 = vcmp.ge.f32.partialorder %v27_v19, 0.0  ;;  %v43_v30 = vmul.f32 0.2, %v27_v19  ;;  %vm39_vm6 = vcmp.ge.f32.partialorder %v31_v22, 0.0 }
   0xa   :  { %196 = vmatpush.bf16.msra.mxu0 %v336_v4  ;;  %360 = vmatpush.bf16.msra.mxu2 %v336_v4  ;;  %v45_v31 = vmul.f32 0.2, %v29_v21  ;;  %v47_v32 = vmul.f32 0.2, %v31_v22  ;;  %v49_v33 = vmul.f32 0.2, %v33_v23  ;;  %v50_v34 = vsel %vm34_vm0, %v26_v14, %v42_v25 }
   0xb   :  { %215 = vmatpush.bf16.msra.mxu1 %v344_v5  ;;  %368 = vmatpush.bf16.msra.mxu3 %v344_v5  ;;  %vm41_vm7 = vcmp.ge.f32.partialorder %v33_v23, 0.0  ;;  %v52_v35 = vsel %vm36_vm1, %v28_v15, %v44_v27  ;;  %v54_v37 = vsel %vm38_vm2, %v30_v16, %v46_v28  ;;  %v56_v38 = vsel %vm40_vm3, %v32_v18, %v48_v29  ;;  %v339_v40 = vld [vmem:[%s469_s1 + $0x40] sm:$0xff] }
   0xc   :  { %v51_v39 = vsel %vm35_vm4, %v27_v19, %v43_v30  ;;  %v53_v41 = vsel %vm37_vm5, %v29_v21, %v45_v31  ;;  %v55_v42 = vsel %vm39_vm6, %v31_v22, %v47_v32  ;;  %v57_v43 = vsel %vm41_vm7, %v33_v23, %v49_v33  ;;  %v374_v53 = vld [vmem:[%s471_s2] ss:$0 sm:$0xff] }
   0xd   :  { %v58_v44 = vpack.c.bf16 %v52_v35, %v50_v34  ;;  %v60_v45 = vpack.c.bf16 %v56_v38, %v54_v37  ;;  %v59_v46 = vpack.c.bf16 %v53_v41, %v51_v39  ;;  %v61_v47 = vpack.c.bf16 %v57_v43, %v55_v42 }
   0xe   :  { %197 = vmatpush.bf16.msra.mxu0 %v335_v6  ;;  %361 = vmatpush.bf16.msra.mxu2 %v335_v6 }
   0xf   :  { %216 = vmatpush.bf16.msra.mxu1 %v343_v7  ;;  %369 = vmatpush.bf16.msra.mxu3 %v343_v7 }
  0x12   :  { %198 = vmatpush.bf16.msra.mxu0 %v334_v9  ;;  %362 = vmatpush.bf16.msra.mxu2 %v334_v9 }
  0x13   :  { %217 = vmatpush.bf16.msra.mxu1 %v342_v12  ;;  %370 = vmatpush.bf16.msra.mxu3 %v342_v12 }
  0x16   :  { %199 = vmatpush.bf16.msra.mxu0 %v333_v17  ;;  %363 = vmatpush.bf16.msra.mxu2 %v333_v17 }
  0x17   :  { %218 = vmatpush.bf16.msra.mxu1 %v341_v20  ;;  %371 = vmatpush.bf16.msra.mxu3 %v341_v20 }
  0x1a   :  { %200 = vmatpush.bf16.msra.mxu0 %v332_v24  ;;  %364 = vmatpush.bf16.msra.mxu2 %v332_v24 }
  0x1b   :  { %219 = vmatpush.bf16.msra.mxu1 %v340_v26  ;;  %372 = vmatpush.bf16.msra.mxu3 %v340_v26 }
  0x1e   :  { %201 = vmatpush.bf16.msra.mxu0 %v331_v36  ;;  %365 = vmatpush.bf16.msra.mxu2 %v331_v36 }
  0x1f   :  { %220 = vmatpush.bf16.msra.mxu1 %v339_v40  ;;  %373 = vmatpush.bf16.msra.mxu3 %v339_v40 }
  0x21   :  { %202 = vmatmul.bf16.vlgmr.msra.gmra.mxu0 %v58_v44  ;;  %207 = vmatmul.bf16.vlgmr.msra.gmra.mxu2 %v60_v45 }
  0x22   :  { %221 = vmatmul.bf16.vlgmr.msra.gmra.mxu1 %v59_v46  ;;  %226 = vmatmul.bf16.vlgmr.msra.gmra.mxu3 %v61_v47 }
  0x9e   :  { %v203_v48 = vpop.f32.mrf.mxu0 }
  0x9f   :  { %v222_v49 = vpop.f32.mrf.mxu1 }
  0xa0   :  { %v223_v52 = vadd.f32 %v222_v49, %v203_v48 }
  0xa2   :  { %v251_v57 = vadd.f32 %v374_v53, %v223_v52 }
  0xa4   :  { %v208_v50 = vpop.f32.mrf.mxu2 }
  0xa5   :  { %v227_v51 = vpop.f32.mrf.mxu3 }
  0xa6   :  { %v205_v54 = vpop.f32.mrf.mxu0  ;;  %v228_v59 = vadd.f32 %v227_v51, %v208_v50 }
  0xa7   :  { %v224_v55 = vpop.f32.mrf.mxu1 }
  0xa8   :  { %v225_v56 = vadd.f32 %v224_v55, %v205_v54  ;;  %v253_v0 = vadd.f32 %v374_v53, %v228_v59 }
  0xaa   :  { %v252_v58 = vadd.f32 %v374_v53, %v225_v56 }
  0xac   :  { %v350_v60 = vpack.c.bf16 %v252_v58, %v251_v57  ;;  %v210_v61 = vpop.f32.mrf.mxu2 }
  0xad   :  { %v229_v62 = vpop.f32.mrf.mxu3 }
  0xae   :  { %351 = vst [vmem:[%s472_s3] sm:$0xff] %v350_v60   ;;  %v230_v63 = vadd.f32 %v229_v62, %v210_v61 }
  0xb0   :  { %v254_v1 = vadd.f32 %v374_v53, %v230_v63 }
  0xb2   :  { %v355_v2 = vpack.c.bf16 %v254_v1, %v253_v0 }
  0xb4   :  { %357 = vst [vmem:[%s472_s3 + $0x8] sm:$0xff] %v355_v2  }

// kernel: _lambda_.28
= control target key start
LH: loop header
LB: loop body
LE: loop exit
PB: predicated region body
PF: predicated region fallthrough
CT: control target
= control target key end

     0   :  { %s656_s1 = inlined_call_operand.vmem [shape: bf16[512,128], index: 1, kind: input, shape index: {}]   ;;  %s657_s0 = inlined_call_operand.vmem [shape: bf16[8,512], index: 0, kind: input, shape index: {}]   ;;  %s658_s2 = inlined_call_operand.vmem [shape: f32[1,128], index: 2, kind: input, shape index: {}]   ;;  %s659_s3 = inlined_call_operand.vmem [shape: bf16[8,128], index: 3, kind: output, shape index: {}]  }
   0x1   :  { %v502_v0 = vld [vmem:[%s656_s1 + $0x38] sm:$0xff]  ;;  %v501_v4 = vld [vmem:[%s656_s1 + $0x30] sm:$0xff]  ;;  %v500_v8 = vld [vmem:[%s656_s1 + $0x28] sm:$0xff] }
   0x2   :  { %v510_v1 = vld [vmem:[%s656_s1 + $0x78] sm:$0xff]  ;;  %298 = vmatpush.bf16.msra.mxu0 %v502_v0  ;;  %v509_v5 = vld [vmem:[%s656_s1 + $0x70] sm:$0xff]  ;;  %v508_v9 = vld [vmem:[%s656_s1 + $0x68] sm:$0xff] }
   0x3   :  { %v518_v2 = vld [vmem:[%s656_s1 + $0xb8] sm:$0xff]  ;;  %311 = vmatpush.bf16.msra.mxu1 %v510_v1  ;;  %v517_v6 = vld [vmem:[%s656_s1 + $0xb0] sm:$0xff]  ;;  %v516_v10 = vld [vmem:[%s656_s1 + $0xa8] sm:$0xff] }
   0x4   :  { %v526_v3 = vld [vmem:[%s656_s1 + $0xf8] sm:$0xff]  ;;  %324 = vmatpush.bf16.msra.mxu2 %v518_v2  ;;  %v525_v7 = vld [vmem:[%s656_s1 + $0xf0] sm:$0xff]  ;;  %v524_v11 = vld [vmem:[%s656_s1 + $0xe8] sm:$0xff] }
   0x5   :  { %337 = vmatpush.bf16.msra.mxu3 %v526_v3  ;;  %v499_v12 = vld [vmem:[%s656_s1 + $0x20] sm:$0xff]  ;;  %v498_v16 = vld [vmem:[%s656_s1 + $0x18] sm:$0xff]  ;;  %v20_v21 = vld [vmem:[%s657_s0 + $0x8] sm:$0xff] }
   0x6   :  { %299 = vmatpush.bf16.msra.mxu0 %v501_v4  ;;  %v507_v13 = vld [vmem:[%s656_s1 + $0x60] sm:$0xff]  ;;  %v506_v17 = vld [vmem:[%s656_s1 + $0x58] sm:$0xff]  ;;  %v497_v22 = vld [vmem:[%s656_s1 + $0x10] sm:$0xff]  ;;  %v23_v28 = vunpack.c.l.bf16 %v20_v21  ;;  %v24_v29 = vunpack.c.h.bf16 %v20_v21 }
   0x7   :  { %312 = vmatpush.bf16.msra.mxu1 %v509_v5  ;;  %v515_v14 = vld [vmem:[%s656_s1 + $0xa0] sm:$0xff]  ;;  %v514_v18 = vld [vmem:[%s656_s1 + $0x98] sm:$0xff]  ;;  %v505_v23 = vld [vmem:[%s656_s1 + $0x50] sm:$0xff] }
   0x8   :  { %325 = vmatpush.bf16.msra.mxu2 %v517_v6  ;;  %v523_v15 = vld [vmem:[%s656_s1 + $0xe0] sm:$0xff]  ;;  %v522_v19 = vld [vmem:[%s656_s1 + $0xd8] sm:$0xff]  ;;  %v513_v26 = vld [vmem:[%s656_s1 + $0x90] sm:$0xff]  ;;  %v31_v36 = vmul.f32 0.2, %v23_v28  ;;  %vm27_vm2 = vcmp.ge.f32.partialorder %v23_v28, 0.0 }
   0x9   :  { %338 = vmatpush.bf16.msra.mxu3 %v525_v7  ;;  %v19_v20 = vld [vmem:[%s657_s0] sm:$0xff]  ;;  %v521_v27 = vld [vmem:[%s656_s1 + $0xd0] sm:$0xff]  ;;  %v496_v30 = vld [vmem:[%s656_s1 + $0x8] sm:$0xff]  ;;  %v32_v37 = vmul.f32 0.2, %v24_v29  ;;  %vm28_vm3 = vcmp.ge.f32.partialorder %v24_v29, 0.0 }
   0xa   :  { %300 = vmatpush.bf16.msra.mxu0 %v500_v8  ;;  %v21_v24 = vunpack.c.l.bf16 %v19_v20  ;;  %v22_v25 = vunpack.c.h.bf16 %v19_v20  ;;  %v504_v31 = vld [vmem:[%s656_s1 + $0x48] sm:$0xff]  ;;  %v495_v38 = vld [vmem:[%s656_s1] sm:$0xff]  ;;  %v35_v44 = vsel %vm27_vm2, %v23_v28, %v31_v36 }
   0xb   :  { %313 = vmatpush.bf16.msra.mxu1 %v508_v9  ;;  %v512_v32 = vld [vmem:[%s656_s1 + $0x88] sm:$0xff]  ;;  %v503_v39 = vld [vmem:[%s656_s1 + $0x40] sm:$0xff]  ;;  %v36_v45 = vsel %vm28_vm3, %v24_v29, %v32_v37  ;;  %v39_v48 = vpack.c.bf16 %v35_v44, %v35_v44 }
   0xc   :  { %326 = vmatpush.bf16.msra.mxu2 %v516_v10  ;;  %v520_v33 = vld [vmem:[%s656_s1 + $0xc8] sm:$0xff]  ;;  %v29_v34 = vmul.f32 0.2, %v21_v24  ;;  %v30_v35 = vmul.f32 0.2, %v22_v25  ;;  %vm25_vm0 = vcmp.ge.f32.partialorder %v21_v24, 0.0  ;;  %v40_v49 = vpack.c.bf16 %v36_v45, %v36_v45 }
   0xd   :  { %339 = vmatpush.bf16.msra.mxu3 %v524_v11  ;;  %vm26_vm1 = vcmp.ge.f32.partialorder %v22_v25, 0.0  ;;  %v511_v42 = vld [vmem:[%s656_s1 + $0x80] sm:$0xff] }
   0xe   :  { %301 = vmatpush.bf16.msra.mxu0 %v499_v12  ;;  %v33_v40 = vsel %vm25_vm0, %v21_v24, %v29_v34  ;;  %v34_v41 = vsel %vm26_vm1, %v22_v25, %v30_v35  ;;  %v519_v43 = vld [vmem:[%s656_s1 + $0xc0] sm:$0xff] }
   0xf   :  { %314 = vmatpush.bf16.msra.mxu1 %v507_v13  ;;  %v37_v46 = vpack.c.bf16 %v33_v40, %v33_v40  ;;  %v38_v47 = vpack.c.bf16 %v34_v41, %v34_v41  ;;  %v527_v56 = vld [vmem:[%s658_s2] ss:$0 sm:$0xff] }
  0x10   :  { %327 = vmatpush.bf16.msra.mxu2 %v515_v14 }
  0x11   :  { %340 = vmatpush.bf16.msra.mxu3 %v523_v15 }
  0x12   :  { %302 = vmatpush.bf16.msra.mxu0 %v498_v16 }
  0x13   :  { %315 = vmatpush.bf16.msra.mxu1 %v506_v17 }
  0x14   :  { %328 = vmatpush.bf16.msra.mxu2 %v514_v18 }
  0x15   :  { %341 = vmatpush.bf16.msra.mxu3 %v522_v19 }
  0x16   :  { %303 = vmatpush.bf16.msra.mxu0 %v497_v22 }
  0x17   :  { %316 = vmatpush.bf16.msra.mxu1 %v505_v23 }
  0x18   :  { %329 = vmatpush.bf16.msra.mxu2 %v513_v26 }
  0x19   :  { %342 = vmatpush.bf16.msra.mxu3 %v521_v27 }
  0x1a   :  { %304 = vmatpush.bf16.msra.mxu0 %v496_v30 }
  0x1b   :  { %317 = vmatpush.bf16.msra.mxu1 %v504_v31 }
  0x1c   :  { %330 = vmatpush.bf16.msra.mxu2 %v512_v32 }
  0x1d   :  { %343 = vmatpush.bf16.msra.mxu3 %v520_v33 }
  0x1e   :  { %305 = vmatpush.bf16.msra.mxu0 %v495_v38 }
  0x1f   :  { %318 = vmatpush.bf16.msra.mxu1 %v503_v39 }
  0x20   :  { %331 = vmatpush.bf16.msra.mxu2 %v511_v42 }
  0x21   :  { %344 = vmatpush.bf16.msra.mxu3 %v519_v43  ;;  %306 = vmatmul.bf16.vlgmr.msra.gmra.mxu0 %v37_v46 }
  0x22   :  { %319 = vmatmul.bf16.vlgmr.msra.gmra.mxu1 %v38_v47 }
  0x23   :  { %332 = vmatmul.bf16.vlgmr.msra.gmra.mxu2 %v39_v48 }
  0x24   :  { %345 = vmatmul.bf16.vlgmr.msra.gmra.mxu3 %v40_v49 }
  0x9e   :  { %v307_v50 = vpop.f32.mrf.mxu0 }
  0x9f   :  { %v320_v51 = vpop.f32.mrf.mxu1 }
  0xa0   :  { %v321_v52 = vadd.f32 %v320_v51, %v307_v50 }
  0xa6   :  { %v333_v53 = vpop.f32.mrf.mxu2  ;;  %v309_v57 = vpop.f32.mrf.mxu0 }
  0xa7   :  { %v346_v54 = vpop.f32.mrf.mxu3  ;;  %v334_v55 = vadd.f32 %v333_v53, %v321_v52  ;;  %v322_v58 = vpop.f32.mrf.mxu1 }
  0xa9   :  { %v347_v59 = vadd.f32 %v346_v54, %v334_v55 }
  0xab   :  { %v360_v60 = vadd.f32 %v527_v56, %v347_v59 }
  0xad   :  { %v361_v61 = vpack.c.bf16 %v360_v60, %v360_v60 }
  0xae   :  { %v335_v62 = vpop.f32.mrf.mxu2 }
  0xaf   :  { %v348_v63 = vpop.f32.mrf.mxu3  ;;  %362 = vst [vmem:[%s659_s3] sm:$0xf] %v361_v61 }

// kernel: _lambda_.29
= control target key start
LH: loop header
LB: loop body
LE: loop exit
PB: predicated region body
PF: predicated region fallthrough
CT: control target
= control target key end

     0   :  { %s1248_s1 = inlined_call_operand.vmem [shape: bf16[1024,128], index: 1, kind: input, shape index: {}]   ;;  %s1249_s0 = inlined_call_operand.vmem [shape: bf16[8,1024], index: 0, kind: input, shape index: {}]   ;;  %s1250_s2 = inlined_call_operand.vmem [shape: f32[1,128], index: 2, kind: input, shape index: {}]   ;;  %s1251_s3 = inlined_call_operand.vmem [shape: bf16[8,128], index: 3, kind: output, shape index: {}]  }
   0x1   :  { %v960_v0 = vld [vmem:[%s1248_s1 + $0x38] sm:$0xff]  ;;  %v959_v4 = vld [vmem:[%s1248_s1 + $0x30] sm:$0xff]  ;;  %v958_v8 = vld [vmem:[%s1248_s1 + $0x28] sm:$0xff] }
   0x2   :  { %v968_v1 = vld [vmem:[%s1248_s1 + $0x78] sm:$0xff]  ;;  %576 = vmatpush.bf16.msra.mxu0 %v960_v0  ;;  %v967_v5 = vld [vmem:[%s1248_s1 + $0x70] sm:$0xff]  ;;  %v966_v9 = vld [vmem:[%s1248_s1 + $0x68] sm:$0xff] }
   0x3   :  { %v976_v2 = vld [vmem:[%s1248_s1 + $0xb8] sm:$0xff]  ;;  %589 = vmatpush.bf16.msra.mxu1 %v968_v1  ;;  %v975_v6 = vld [vmem:[%s1248_s1 + $0xb0] sm:$0xff]  ;;  %v974_v10 = vld [vmem:[%s1248_s1 + $0xa8] sm:$0xff] }
   0x4   :  { %v984_v3 = vld [vmem:[%s1248_s1 + $0xf8] sm:$0xff]  ;;  %602 = vmatpush.bf16.msra.mxu2 %v976_v2  ;;  %v983_v7 = vld [vmem:[%s1248_s1 + $0xf0] sm:$0xff]  ;;  %v982_v11 = vld [vmem:[%s1248_s1 + $0xe8] sm:$0xff] }
   0x5   :  { %615 = vmatpush.bf16.msra.mxu3 %v984_v3  ;;  %v957_v12 = vld [vmem:[%s1248_s1 + $0x20] sm:$0xff]  ;;  %v956_v16 = vld [vmem:[%s1248_s1 + $0x18] sm:$0xff]  ;;  %v20_v20 = vld [vmem:[%s1249_s0 + $0x8] sm:$0xff] }
   0x6   :  { %577 = vmatpush.bf16.msra.mxu0 %v959_v4  ;;  %v965_v13 = vld [vmem:[%s1248_s1 + $0x60] sm:$0xff]  ;;  %v964_v17 = vld [vmem:[%s1248_s1 + $0x58] sm:$0xff]  ;;  %v955_v22 = vld [vmem:[%s1248_s1 + $0x10] sm:$0xff]  ;;  %v25_v26 = vunpack.c.l.bf16 %v20_v20  ;;  %v26_v27 = vunpack.c.h.bf16 %v20_v20 }
   0x7   :  { %590 = vmatpush.bf16.msra.mxu1 %v967_v5  ;;  %v973_v14 = vld [vmem:[%s1248_s1 + $0xa0] sm:$0xff]  ;;  %v972_v18 = vld [vmem:[%s1248_s1 + $0x98] sm:$0xff]  ;;  %v963_v23 = vld [vmem:[%s1248_s1 + $0x50] sm:$0xff] }
   0x8   :  { %603 = vmatpush.bf16.msra.mxu2 %v975_v6  ;;  %v981_v15 = vld [vmem:[%s1248_s1 + $0xe0] sm:$0xff]  ;;  %v980_v19 = vld [vmem:[%s1248_s1 + $0xd8] sm:$0xff]  ;;  %v971_v24 = vld [vmem:[%s1248_s1 + $0x90] sm:$0xff]  ;;  %v41_v34 = vmul.f32 0.2, %v25_v26  ;;  %vm33_vm0 = vcmp.ge.f32.partialorder %v25_v26, 0.0 }
   0x9   :  { %616 = vmatpush.bf16.msra.mxu3 %v983_v7  ;;  %v19_v21 = vld [vmem:[%s1249_s0] sm:$0xff]  ;;  %v979_v25 = vld [vmem:[%s1248_s1 + $0xd0] sm:$0xff]  ;;  %v954_v30 = vld [vmem:[%s1248_s1 + $0x8] sm:$0xff]  ;;  %v42_v35 = vmul.f32 0.2, %v26_v27  ;;  %vm34_vm1 = vcmp.ge.f32.partialorder %v26_v27, 0.0 }
   0xa   :  { %578 = vmatpush.bf16.msra.mxu0 %v958_v8  ;;  %v23_v28 = vunpack.c.l.bf16 %v19_v21  ;;  %v24_v29 = vunpack.c.h.bf16 %v19_v21  ;;  %v962_v31 = vld [vmem:[%s1248_s1 + $0x48] sm:$0xff]  ;;  %v953_v38 = vld [vmem:[%s1248_s1] sm:$0xff]  ;;  %v49_v42 = vsel %vm33_vm0, %v25_v26, %v41_v34  ;;  %v992_v44 = vld [vmem:[%s1248_s1 + $0x138] sm:$0xff] }
   0xb   :  { %591 = vmatpush.bf16.msra.mxu1 %v966_v9  ;;  %v970_v32 = vld [vmem:[%s1248_s1 + $0x88] sm:$0xff]  ;;  %v961_v39 = vld [vmem:[%s1248_s1 + $0x40] sm:$0xff]  ;;  %v50_v43 = vsel %vm34_vm1, %v26_v27, %v42_v35  ;;  %v1000_v45 = vld [vmem:[%s1248_s1 + $0x178] sm:$0xff]  ;;  %v57_v50 = vpack.c.bf16 %v49_v42, %v49_v42 }
   0xc   :  { %604 = vmatpush.bf16.msra.mxu2 %v974_v10  ;;  %v978_v33 = vld [vmem:[%s1248_s1 + $0xc8] sm:$0xff]  ;;  %v39_v36 = vmul.f32 0.2, %v23_v28  ;;  %v40_v37 = vmul.f32 0.2, %v24_v29  ;;  %vm31_vm2 = vcmp.ge.f32.partialorder %v23_v28, 0.0  ;;  %v58_v51 = vpack.c.bf16 %v50_v43, %v50_v43 }
   0xd   :  { %617 = vmatpush.bf16.msra.mxu3 %v982_v11  ;;  %vm32_vm3 = vcmp.ge.f32.partialorder %v24_v29, 0.0  ;;  %v969_v40 = vld [vmem:[%s1248_s1 + $0x80] sm:$0xff]  ;;  %v1008_v48 = vld [vmem:[%s1248_s1 + $0x1b8] sm:$0xff]  ;;  %v991_v54 = vld [vmem:[%s1248_s1 + $0x130] sm:$0xff] }
   0xe   :  { %579 = vmatpush.bf16.msra.mxu0 %v957_v12  ;;  %v977_v41 = vld [vmem:[%s1248_s1 + $0xc0] sm:$0xff]  ;;  %v47_v46 = vsel %vm31_vm2, %v23_v28, %v39_v36  ;;  %v48_v47 = vsel %vm32_vm3, %v24_v29, %v40_v37  ;;  %v1016_v49 = vld [vmem:[%s1248_s1 + $0x1f8] sm:$0xff]  ;;  %v999_v55 = vld [vmem:[%s1248_s1 + $0x170] sm:$0xff] }
   0xf   :  { %592 = vmatpush.bf16.msra.mxu1 %v965_v13  ;;  %v55_v52 = vpack.c.bf16 %v47_v46, %v47_v46  ;;  %v56_v53 = vpack.c.bf16 %v48_v47, %v48_v47  ;;  %v1007_v56 = vld [vmem:[%s1248_s1 + $0x1b0] sm:$0xff]  ;;  %v990_v58 = vld [vmem:[%s1248_s1 + $0x128] sm:$0xff]  ;;  %v989_v62 = vld [vmem:[%s1248_s1 + $0x120] sm:$0xff] }
  0x10   :  { %605 = vmatpush.bf16.msra.mxu2 %v973_v14  ;;  %v1015_v57 = vld [vmem:[%s1248_s1 + $0x1f0] sm:$0xff]  ;;  %v998_v59 = vld [vmem:[%s1248_s1 + $0x168] sm:$0xff]  ;;  %v997_v63 = vld [vmem:[%s1248_s1 + $0x160] sm:$0xff] }
  0x11   :  { %618 = vmatpush.bf16.msra.mxu3 %v981_v15  ;;  %v1006_v60 = vld [vmem:[%s1248_s1 + $0x1a8] sm:$0xff]  ;;  %v1005_v0 = vld [vmem:[%s1248_s1 + $0x1a0] sm:$0xff]  ;;  %v988_v2 = vld [vmem:[%s1248_s1 + $0x118] sm:$0xff] }
  0x12   :  { %580 = vmatpush.bf16.msra.mxu0 %v956_v16  ;;  %v1014_v61 = vld [vmem:[%s1248_s1 + $0x1e8] sm:$0xff]  ;;  %v1013_v1 = vld [vmem:[%s1248_s1 + $0x1e0] sm:$0xff]  ;;  %v996_v3 = vld [vmem:[%s1248_s1 + $0x158] sm:$0xff] }
  0x13   :  { %593 = vmatpush.bf16.msra.mxu1 %v964_v17  ;;  %v1004_v4 = vld [vmem:[%s1248_s1 + $0x198] sm:$0xff]  ;;  %v21_v6 = vld [vmem:[%s1249_s0 + $0x10] sm:$0xff]  ;;  %v986_v16 = vld [vmem:[%s1248_s1 + $0x108] sm:$0xff] }
  0x14   :  { %606 = vmatpush.bf16.msra.mxu2 %v972_v18  ;;  %v1012_v5 = vld [vmem:[%s1248_s1 + $0x1d8] sm:$0xff]  ;;  %v987_v8 = vld [vmem:[%s1248_s1 + $0x110] sm:$0xff]  ;;  %v27_v10 = vunpack.c.l.bf16 %v21_v6  ;;  %v28_v11 = vunpack.c.h.bf16 %v21_v6  ;;  %v994_v17 = vld [vmem:[%s1248_s1 + $0x148] sm:$0xff] }
  0x15   :  { %619 = vmatpush.bf16.msra.mxu3 %v980_v19  ;;  %v22_v7 = vld [vmem:[%s1249_s0 + $0x18] sm:$0xff]  ;;  %v995_v9 = vld [vmem:[%s1248_s1 + $0x150] sm:$0xff]  ;;  %v1002_v18 = vld [vmem:[%s1248_s1 + $0x188] sm:$0xff] }
  0x16   :  { %581 = vmatpush.bf16.msra.mxu0 %v955_v22  ;;  %v1003_v12 = vld [vmem:[%s1248_s1 + $0x190] sm:$0xff]  ;;  %v29_v14 = vunpack.c.l.bf16 %v22_v7  ;;  %v30_v15 = vunpack.c.h.bf16 %v22_v7  ;;  %v1010_v19 = vld [vmem:[%s1248_s1 + $0x1c8] sm:$0xff]  ;;  %v43_v20 = vmul.f32 0.2, %v27_v10  ;;  %v44_v21 = vmul.f32 0.2, %v28_v11 }
  0x17   :  { %594 = vmatpush.bf16.msra.mxu1 %v963_v23  ;;  %v1011_v13 = vld [vmem:[%s1248_s1 + $0x1d0] sm:$0xff]  ;;  %vm35_vm4 = vcmp.ge.f32.partialorder %v27_v10, 0.0  ;;  %vm36_vm5 = vcmp.ge.f32.partialorder %v28_v11, 0.0  ;;  %v1001_v28 = vld [vmem:[%s1248_s1 + $0x180] sm:$0xff] }
  0x18   :  { %607 = vmatpush.bf16.msra.mxu2 %v971_v24  ;;  %v45_v22 = vmul.f32 0.2, %v29_v14  ;;  %v46_v23 = vmul.f32 0.2, %v30_v15  ;;  %vm37_vm6 = vcmp.ge.f32.partialorder %v29_v14, 0.0  ;;  %vm38_vm7 = vcmp.ge.f32.partialorder %v30_v15, 0.0 }
  0x19   :  { %620 = vmatpush.bf16.msra.mxu3 %v979_v25  ;;  %v985_v24 = vld [vmem:[%s1248_s1 + $0x100] sm:$0xff]  ;;  %v51_v26 = vsel %vm35_vm4, %v27_v10, %v43_v20  ;;  %v52_v27 = vsel %vm36_vm5, %v28_v11, %v44_v21 }
  0x1a   :  { %582 = vmatpush.bf16.msra.mxu0 %v954_v30  ;;  %v993_v25 = vld [vmem:[%s1248_s1 + $0x140] sm:$0xff]  ;;  %v53_v30 = vsel %vm37_vm6, %v29_v14, %v45_v22 }
  0x1b   :  { %595 = vmatpush.bf16.msra.mxu1 %v962_v31  ;;  %v1009_v29 = vld [vmem:[%s1248_s1 + $0x1c0] sm:$0xff]  ;;  %v54_v31 = vsel %vm38_vm7, %v30_v15, %v46_v23  ;;  %v61_v34 = vpack.c.bf16 %v53_v30, %v53_v30 }
  0x1c   :  { %608 = vmatpush.bf16.msra.mxu2 %v970_v32  ;;  %v59_v32 = vpack.c.bf16 %v51_v26, %v51_v26  ;;  %v62_v35 = vpack.c.bf16 %v54_v31, %v54_v31 }
  0x1d   :  { %621 = vmatpush.bf16.msra.mxu3 %v978_v33  ;;  %v60_v33 = vpack.c.bf16 %v52_v27, %v52_v27 }
  0x1e   :  { %583 = vmatpush.bf16.msra.mxu0 %v953_v38 }
  0x1f   :  { %596 = vmatpush.bf16.msra.mxu1 %v961_v39 }
  0x20   :  { %609 = vmatpush.bf16.msra.mxu2 %v969_v40 }
  0x21   :  { %622 = vmatpush.bf16.msra.mxu3 %v977_v41  ;;  %584 = vmatmul.bf16.vlgmr.msra.gmra.mxu0 %v55_v52 }
  0x22   :  { %628 = vmatpush.bf16.msrb.mxu0 %v992_v44  ;;  %597 = vmatmul.bf16.vlgmr.msra.gmra.mxu1 %v56_v53 }
  0x23   :  { %641 = vmatpush.bf16.msrb.mxu1 %v1000_v45  ;;  %610 = vmatmul.bf16.vlgmr.msra.gmra.mxu2 %v57_v50 }
  0x24   :  { %654 = vmatpush.bf16.msrb.mxu2 %v1008_v48  ;;  %623 = vmatmul.bf16.vlgmr.msra.gmra.mxu3 %v58_v51 }
  0x25   :  { %667 = vmatpush.bf16.msrb.mxu3 %v1016_v49 }
  0x26   :  { %629 = vmatpush.bf16.msrb.mxu0 %v991_v54  ;;  %v1017_v54 = vld [vmem:[%s1250_s2] ss:$0 sm:$0xff] }
  0x27   :  { %642 = vmatpush.bf16.msrb.mxu1 %v999_v55 }
  0x28   :  { %655 = vmatpush.bf16.msrb.mxu2 %v1007_v56 }
  0x29   :  { %668 = vmatpush.bf16.msrb.mxu3 %v1015_v57 }
  0x2a   :  { %630 = vmatpush.bf16.msrb.mxu0 %v990_v58 }
  0x2b   :  { %643 = vmatpush.bf16.msrb.mxu1 %v998_v59 }
  0x2c   :  { %656 = vmatpush.bf16.msrb.mxu2 %v1006_v60 }
  0x2d   :  { %669 = vmatpush.bf16.msrb.mxu3 %v1014_v61 }
  0x2e   :  { %631 = vmatpush.bf16.msrb.mxu0 %v989_v62 }
  0x2f   :  { %644 = vmatpush.bf16.msrb.mxu1 %v997_v63 }
  0x30   :  { %657 = vmatpush.bf16.msrb.mxu2 %v1005_v0 }
  0x31   :  { %670 = vmatpush.bf16.msrb.mxu3 %v1013_v1 }
  0x32   :  { %632 = vmatpush.bf16.msrb.mxu0 %v988_v2 }
  0x33   :  { %645 = vmatpush.bf16.msrb.mxu1 %v996_v3 }
  0x34   :  { %658 = vmatpush.bf16.msrb.mxu2 %v1004_v4 }
  0x35   :  { %671 = vmatpush.bf16.msrb.mxu3 %v1012_v5 }
  0x36   :  { %633 = vmatpush.bf16.msrb.mxu0 %v987_v8 }
  0x37   :  { %646 = vmatpush.bf16.msrb.mxu1 %v995_v9 }
  0x38   :  { %659 = vmatpush.bf16.msrb.mxu2 %v1003_v12 }
  0x39   :  { %672 = vmatpush.bf16.msrb.mxu3 %v1011_v13 }
  0x3a   :  { %634 = vmatpush.bf16.msrb.mxu0 %v986_v16 }
  0x3b   :  { %647 = vmatpush.bf16.msrb.mxu1 %v994_v17 }
  0x3c   :  { %660 = vmatpush.bf16.msrb.mxu2 %v1002_v18 }
  0x3d   :  { %673 = vmatpush.bf16.msrb.mxu3 %v1010_v19 }
  0x3e   :  { %635 = vmatpush.bf16.msrb.mxu0 %v985_v24 }
  0x3f   :  { %648 = vmatpush.bf16.msrb.mxu1 %v993_v25 }
  0x40   :  { %661 = vmatpush.bf16.msrb.mxu2 %v1001_v28 }
  0x41   :  { %674 = vmatpush.bf16.msrb.mxu3 %v1009_v29  ;;  %636 = vmatmul.bf16.vlgmr.msrb.gmra.mxu0 %v59_v32 }
  0x42   :  { %649 = vmatmul.bf16.vlgmr.msrb.gmra.mxu1 %v60_v33 }
  0x43   :  { %662 = vmatmul.bf16.vlgmr.msrb.gmra.mxu2 %v61_v34 }
  0x44   :  { %675 = vmatmul.bf16.vlgmr.msrb.gmra.mxu3 %v62_v35 }
  0x9e   :  { %v585_v36 = vpop.f32.mrf.mxu0 }
  0x9f   :  { %v598_v37 = vpop.f32.mrf.mxu1 }
  0xa0   :  { %v599_v44 = vadd.f32 %v598_v37, %v585_v36 }
  0xa6   :  { %v611_v38 = vpop.f32.mrf.mxu2  ;;  %v587_v40 = vpop.f32.mrf.mxu0 }
  0xa7   :  { %v624_v39 = vpop.f32.mrf.mxu3  ;;  %v600_v41 = vpop.f32.mrf.mxu1  ;;  %v612_v45 = vadd.f32 %v611_v38, %v599_v44 }
  0xa9   :  { %v625_v46 = vadd.f32 %v624_v39, %v612_v45 }
  0xae   :  { %v613_v42 = vpop.f32.mrf.mxu2 }
  0xaf   :  { %v626_v43 = vpop.f32.mrf.mxu3 }
  0xbe   :  { %v637_v47 = vpop.f32.mrf.mxu0 }
  0xbf   :  { %v650_v48 = vpop.f32.mrf.mxu1  ;;  %v638_v49 = vadd.f32 %v637_v47, %v625_v46 }
  0xc1   :  { %v651_v50 = vadd.f32 %v650_v48, %v638_v49 }
  0xc6   :  { %v663_v51 = vpop.f32.mrf.mxu2  ;;  %v639_v55 = vpop.f32.mrf.mxu0 }
  0xc7   :  { %v676_v52 = vpop.f32.mrf.mxu3  ;;  %v664_v53 = vadd.f32 %v663_v51, %v651_v50  ;;  %v652_v56 = vpop.f32.mrf.mxu1 }
  0xc9   :  { %v677_v57 = vadd.f32 %v676_v52, %v664_v53 }
  0xcb   :  { %v690_v58 = vadd.f32 %v1017_v54, %v677_v57 }
  0xcd   :  { %v691_v59 = vpack.c.bf16 %v690_v58, %v690_v58 }
  0xce   :  { %v665_v60 = vpop.f32.mrf.mxu2 }
  0xcf   :  { %v678_v61 = vpop.f32.mrf.mxu3  ;;  %692 = vst [vmem:[%s1251_s3] sm:$0xf] %v691_v59 }

// kernel: _lambda_.30
= control target key start
LH: loop header
LB: loop body
LE: loop exit
PB: predicated region body
PF: predicated region fallthrough
CT: control target
= control target key end

     0   :  { %s356_s1 = inlined_call_operand.vmem [shape: bf16[256,128], index: 1, kind: input, shape index: {}]   ;;  %s357_s0 = inlined_call_operand.vmem [shape: bf16[8,256], index: 0, kind: input, shape index: {}]   ;;  %s358_s2 = inlined_call_operand.vmem [shape: f32[1,128], index: 2, kind: input, shape index: {}]   ;;  %s359_s3 = inlined_call_operand.vmem [shape: bf16[8,128], index: 3, kind: output, shape index: {}]  }
   0x1   :  { %v269_v0 = vld [vmem:[%s356_s1 + $0x38] sm:$0xff]  ;;  %v268_v2 = vld [vmem:[%s356_s1 + $0x30] sm:$0xff]  ;;  %v267_v4 = vld [vmem:[%s356_s1 + $0x28] sm:$0xff] }
   0x2   :  { %v277_v1 = vld [vmem:[%s356_s1 + $0x78] sm:$0xff]  ;;  %155 = vmatpush.bf16.msra.mxu0 %v269_v0  ;;  %v276_v3 = vld [vmem:[%s356_s1 + $0x70] sm:$0xff]  ;;  %v275_v5 = vld [vmem:[%s356_s1 + $0x68] sm:$0xff] }
   0x3   :  { %168 = vmatpush.bf16.msra.mxu1 %v277_v1  ;;  %v266_v6 = vld [vmem:[%s356_s1 + $0x20] sm:$0xff]  ;;  %v265_v8 = vld [vmem:[%s356_s1 + $0x18] sm:$0xff]  ;;  %v264_v10 = vld [vmem:[%s356_s1 + $0x10] sm:$0xff] }
   0x4   :  { %v274_v7 = vld [vmem:[%s356_s1 + $0x60] sm:$0xff]  ;;  %v273_v9 = vld [vmem:[%s356_s1 + $0x58] sm:$0xff]  ;;  %v272_v11 = vld [vmem:[%s356_s1 + $0x50] sm:$0xff] }
   0x5   :  { %v19_v12 = vld [vmem:[%s357_s0] sm:$0xff]  ;;  %v263_v15 = vld [vmem:[%s356_s1 + $0x8] sm:$0xff] }
   0x6   :  { %156 = vmatpush.bf16.msra.mxu0 %v268_v2  ;;  %v20_v13 = vunpack.c.l.bf16 %v19_v12  ;;  %v21_v14 = vunpack.c.h.bf16 %v19_v12  ;;  %v271_v16 = vld [vmem:[%s356_s1 + $0x48] sm:$0xff]  ;;  %v262_v19 = vld [vmem:[%s356_s1] sm:$0xff] }
   0x7   :  { %169 = vmatpush.bf16.msra.mxu1 %v276_v3  ;;  %v270_v20 = vld [vmem:[%s356_s1 + $0x40] sm:$0xff] }
   0x8   :  { %v22_v17 = vmax.f32 %v20_v13, 0.0  ;;  %v23_v18 = vmax.f32 %v21_v14, 0.0  ;;  %v278_v23 = vld [vmem:[%s358_s2] ss:$0 sm:$0xff] }
   0xa   :  { %157 = vmatpush.bf16.msra.mxu0 %v267_v4  ;;  %v24_v21 = vpack.c.bf16 %v22_v17, %v22_v17  ;;  %v25_v22 = vpack.c.bf16 %v23_v18, %v23_v18 }
   0xb   :  { %170 = vmatpush.bf16.msra.mxu1 %v275_v5 }
   0xe   :  { %158 = vmatpush.bf16.msra.mxu0 %v266_v6 }
   0xf   :  { %171 = vmatpush.bf16.msra.mxu1 %v274_v7 }
  0x12   :  { %159 = vmatpush.bf16.msra.mxu0 %v265_v8 }
  0x13   :  { %172 = vmatpush.bf16.msra.mxu1 %v273_v9 }
  0x16   :  { %160 = vmatpush.bf16.msra.mxu0 %v264_v10 }
  0x17   :  { %173 = vmatpush.bf16.msra.mxu1 %v272_v11 }
  0x1a   :  { %161 = vmatpush.bf16.msra.mxu0 %v263_v15 }
  0x1b   :  { %174 = vmatpush.bf16.msra.mxu1 %v271_v16 }
  0x1e   :  { %162 = vmatpush.bf16.msra.mxu0 %v262_v19 }
  0x1f   :  { %175 = vmatpush.bf16.msra.mxu1 %v270_v20 }
  0x21   :  { %163 = vmatmul.bf16.vlgmr.msra.gmra.mxu0 %v24_v21 }
  0x22   :  { %176 = vmatmul.bf16.vlgmr.msra.gmra.mxu1 %v25_v22 }
  0x9e   :  { %v164_v24 = vpop.f32.mrf.mxu0 }
  0x9f   :  { %v177_v25 = vpop.f32.mrf.mxu1 }
  0xa0   :  { %v178_v26 = vadd.f32 %v177_v25, %v164_v24 }
  0xa2   :  { %v191_v27 = vadd.f32 %v278_v23, %v178_v26 }
  0xa4   :  { %v192_v28 = vpack.c.bf16 %v191_v27, %v191_v27 }
  0xa6   :  { %193 = vst [vmem:[%s359_s3] sm:$0xf] %v192_v28  ;;  %v166_v29 = vpop.f32.mrf.mxu0 }
  0xa7   :  { %v179_v30 = vpop.f32.mrf.mxu1 }

// kernel: _lambda_.34
= control target key start
LH: loop header
LB: loop body
LE: loop exit
PB: predicated region body
PF: predicated region fallthrough
CT: control target
= control target key end

     0   :  { %s648_s1 = inlined_call_operand.vmem [shape: bf16[512,128], index: 1, kind: input, shape index: {}]   ;;  %s649_s0 = inlined_call_operand.vmem [shape: bf16[8,512], index: 0, kind: input, shape index: {}]   ;;  %s650_s2 = inlined_call_operand.vmem [shape: f32[1,128], index: 2, kind: input, shape index: {}]   ;;  %s651_s3 = inlined_call_operand.vmem [shape: bf16[8,128], index: 3, kind: output, shape index: {}]  }
   0x1   :  { %v494_v0 = vld [vmem:[%s648_s1 + $0x38] sm:$0xff]  ;;  %v493_v4 = vld [vmem:[%s648_s1 + $0x30] sm:$0xff]  ;;  %v492_v8 = vld [vmem:[%s648_s1 + $0x28] sm:$0xff] }
   0x2   :  { %v502_v1 = vld [vmem:[%s648_s1 + $0x78] sm:$0xff]  ;;  %290 = vmatpush.bf16.msra.mxu0 %v494_v0  ;;  %v501_v5 = vld [vmem:[%s648_s1 + $0x70] sm:$0xff]  ;;  %v500_v9 = vld [vmem:[%s648_s1 + $0x68] sm:$0xff] }
   0x3   :  { %v510_v2 = vld [vmem:[%s648_s1 + $0xb8] sm:$0xff]  ;;  %303 = vmatpush.bf16.msra.mxu1 %v502_v1  ;;  %v509_v6 = vld [vmem:[%s648_s1 + $0xb0] sm:$0xff]  ;;  %v508_v10 = vld [vmem:[%s648_s1 + $0xa8] sm:$0xff] }
   0x4   :  { %v518_v3 = vld [vmem:[%s648_s1 + $0xf8] sm:$0xff]  ;;  %316 = vmatpush.bf16.msra.mxu2 %v510_v2  ;;  %v517_v7 = vld [vmem:[%s648_s1 + $0xf0] sm:$0xff]  ;;  %v516_v11 = vld [vmem:[%s648_s1 + $0xe8] sm:$0xff] }
   0x5   :  { %329 = vmatpush.bf16.msra.mxu3 %v518_v3  ;;  %v491_v12 = vld [vmem:[%s648_s1 + $0x20] sm:$0xff]  ;;  %v490_v16 = vld [vmem:[%s648_s1 + $0x18] sm:$0xff]  ;;  %v489_v20 = vld [vmem:[%s648_s1 + $0x10] sm:$0xff] }
   0x6   :  { %291 = vmatpush.bf16.msra.mxu0 %v493_v4  ;;  %v499_v13 = vld [vmem:[%s648_s1 + $0x60] sm:$0xff]  ;;  %v498_v17 = vld [vmem:[%s648_s1 + $0x58] sm:$0xff]  ;;  %v497_v21 = vld [vmem:[%s648_s1 + $0x50] sm:$0xff] }
   0x7   :  { %304 = vmatpush.bf16.msra.mxu1 %v501_v5  ;;  %v507_v14 = vld [vmem:[%s648_s1 + $0xa0] sm:$0xff]  ;;  %v506_v18 = vld [vmem:[%s648_s1 + $0x98] sm:$0xff]  ;;  %v505_v23 = vld [vmem:[%s648_s1 + $0x90] sm:$0xff] }
   0x8   :  { %317 = vmatpush.bf16.msra.mxu2 %v509_v6  ;;  %v515_v15 = vld [vmem:[%s648_s1 + $0xe0] sm:$0xff]  ;;  %v514_v19 = vld [vmem:[%s648_s1 + $0xd8] sm:$0xff]  ;;  %v513_v24 = vld [vmem:[%s648_s1 + $0xd0] sm:$0xff] }
   0x9   :  { %330 = vmatpush.bf16.msra.mxu3 %v517_v7  ;;  %v19_v22 = vld [vmem:[%s649_s0] sm:$0xff]  ;;  %v20_v25 = vld [vmem:[%s649_s0 + $0x8] sm:$0xff] }
   0xa   :  { %292 = vmatpush.bf16.msra.mxu0 %v492_v8  ;;  %v21_v26 = vunpack.c.l.bf16 %v19_v22  ;;  %v22_v27 = vunpack.c.h.bf16 %v19_v22  ;;  %v488_v28 = vld [vmem:[%s648_s1 + $0x8] sm:$0xff]  ;;  %v23_v30 = vunpack.c.l.bf16 %v20_v25  ;;  %v24_v31 = vunpack.c.h.bf16 %v20_v25  ;;  %v487_v36 = vld [vmem:[%s648_s1] sm:$0xff] }
   0xb   :  { %305 = vmatpush.bf16.msra.mxu1 %v500_v9  ;;  %v496_v29 = vld [vmem:[%s648_s1 + $0x48] sm:$0xff]  ;;  %v495_v37 = vld [vmem:[%s648_s1 + $0x40] sm:$0xff] }
   0xc   :  { %318 = vmatpush.bf16.msra.mxu2 %v508_v10  ;;  %v504_v32 = vld [vmem:[%s648_s1 + $0x88] sm:$0xff]  ;;  %v25_v34 = vmax.f32 %v21_v26, 0.0  ;;  %v26_v35 = vmax.f32 %v22_v27, 0.0  ;;  %v27_v38 = vmax.f32 %v23_v30, 0.0  ;;  %v28_v39 = vmax.f32 %v24_v31, 0.0  ;;  %v503_v40 = vld [vmem:[%s648_s1 + $0x80] sm:$0xff] }
   0xd   :  { %331 = vmatpush.bf16.msra.mxu3 %v516_v11  ;;  %v512_v33 = vld [vmem:[%s648_s1 + $0xc8] sm:$0xff]  ;;  %v511_v41 = vld [vmem:[%s648_s1 + $0xc0] sm:$0xff] }
   0xe   :  { %293 = vmatpush.bf16.msra.mxu0 %v491_v12  ;;  %v29_v42 = vpack.c.bf16 %v25_v34, %v25_v34  ;;  %v30_v43 = vpack.c.bf16 %v26_v35, %v26_v35  ;;  %v31_v44 = vpack.c.bf16 %v27_v38, %v27_v38  ;;  %v32_v45 = vpack.c.bf16 %v28_v39, %v28_v39  ;;  %v519_v52 = vld [vmem:[%s650_s2] ss:$0 sm:$0xff] }
   0xf   :  { %306 = vmatpush.bf16.msra.mxu1 %v499_v13 }
  0x10   :  { %319 = vmatpush.bf16.msra.mxu2 %v507_v14 }
  0x11   :  { %332 = vmatpush.bf16.msra.mxu3 %v515_v15 }
  0x12   :  { %294 = vmatpush.bf16.msra.mxu0 %v490_v16 }
  0x13   :  { %307 = vmatpush.bf16.msra.mxu1 %v498_v17 }
  0x14   :  { %320 = vmatpush.bf16.msra.mxu2 %v506_v18 }
  0x15   :  { %333 = vmatpush.bf16.msra.mxu3 %v514_v19 }
  0x16   :  { %295 = vmatpush.bf16.msra.mxu0 %v489_v20 }
  0x17   :  { %308 = vmatpush.bf16.msra.mxu1 %v497_v21 }
  0x18   :  { %321 = vmatpush.bf16.msra.mxu2 %v505_v23 }
  0x19   :  { %334 = vmatpush.bf16.msra.mxu3 %v513_v24 }
  0x1a   :  { %296 = vmatpush.bf16.msra.mxu0 %v488_v28 }
  0x1b   :  { %309 = vmatpush.bf16.msra.mxu1 %v496_v29 }
  0x1c   :  { %322 = vmatpush.bf16.msra.mxu2 %v504_v32 }
  0x1d   :  { %335 = vmatpush.bf16.msra.mxu3 %v512_v33 }
  0x1e   :  { %297 = vmatpush.bf16.msra.mxu0 %v487_v36 }
  0x1f   :  { %310 = vmatpush.bf16.msra.mxu1 %v495_v37 }
  0x20   :  { %323 = vmatpush.bf16.msra.mxu2 %v503_v40 }
  0x21   :  { %336 = vmatpush.bf16.msra.mxu3 %v511_v41  ;;  %298 = vmatmul.bf16.vlgmr.msra.gmra.mxu0 %v29_v42 }
  0x22   :  { %311 = vmatmul.bf16.vlgmr.msra.gmra.mxu1 %v30_v43 }
  0x23   :  { %324 = vmatmul.bf16.vlgmr.msra.gmra.mxu2 %v31_v44 }
  0x24   :  { %337 = vmatmul.bf16.vlgmr.msra.gmra.mxu3 %v32_v45 }
  0x9e   :  { %v299_v46 = vpop.f32.mrf.mxu0 }
  0x9f   :  { %v312_v47 = vpop.f32.mrf.mxu1 }
  0xa0   :  { %v313_v48 = vadd.f32 %v312_v47, %v299_v46 }
  0xa6   :  { %v325_v49 = vpop.f32.mrf.mxu2  ;;  %v301_v53 = vpop.f32.mrf.mxu0 }
  0xa7   :  { %v338_v50 = vpop.f32.mrf.mxu3  ;;  %v326_v51 = vadd.f32 %v325_v49, %v313_v48  ;;  %v314_v54 = vpop.f32.mrf.mxu1 }
  0xa9   :  { %v339_v55 = vadd.f32 %v338_v50, %v326_v51 }
  0xab   :  { %v352_v56 = vadd.f32 %v519_v52, %v339_v55 }
  0xad   :  { %v353_v57 = vpack.c.bf16 %v352_v56, %v352_v56 }
  0xae   :  { %v327_v58 = vpop.f32.mrf.mxu2 }
  0xaf   :  { %v340_v59 = vpop.f32.mrf.mxu3  ;;  %354 = vst [vmem:[%s651_s3] sm:$0xf] %v353_v57 }

// kernel: _lambda_.38
= control target key start
LH: loop header
LB: loop body
LE: loop exit
PB: predicated region body
PF: predicated region fallthrough
CT: control target
= control target key end

     0   :  { %s448_s1 = inlined_call_operand.vmem [shape: bf16[256,128], index: 1, kind: input, shape index: {}]   ;;  %s449_s0 = inlined_call_operand.vmem [shape: bf16[32,256], index: 0, kind: input, shape index: {}]   ;;  %s450_s2 = inlined_call_operand.vmem [shape: f32[1,128], index: 2, kind: input, shape index: {}]   ;;  %s451_s3 = inlined_call_operand.vmem [shape: bf16[32,128], index: 3, kind: output, shape index: {}]  }
   0x1   :  { %v322_v0 = vld [vmem:[%s448_s1 + $0x38] sm:$0xff]  ;;  %v321_v2 = vld [vmem:[%s448_s1 + $0x30] sm:$0xff]  ;;  %v320_v4 = vld [vmem:[%s448_s1 + $0x28] sm:$0xff] }
   0x2   :  { %v330_v1 = vld [vmem:[%s448_s1 + $0x78] sm:$0xff]  ;;  %178 = vmatpush.bf16.msra.mxu0 %v322_v0  ;;  %342 = vmatpush.bf16.msra.mxu2 %v322_v0  ;;  %v329_v3 = vld [vmem:[%s448_s1 + $0x70] sm:$0xff]  ;;  %v328_v5 = vld [vmem:[%s448_s1 + $0x68] sm:$0xff] }
   0x3   :  { %197 = vmatpush.bf16.msra.mxu1 %v330_v1  ;;  %350 = vmatpush.bf16.msra.mxu3 %v330_v1  ;;  %v319_v6 = vld [vmem:[%s448_s1 + $0x20] sm:$0xff]  ;;  %v318_v8 = vld [vmem:[%s448_s1 + $0x18] sm:$0xff]  ;;  %v317_v10 = vld [vmem:[%s448_s1 + $0x10] sm:$0xff] }
   0x4   :  { %v327_v7 = vld [vmem:[%s448_s1 + $0x60] sm:$0xff]  ;;  %v326_v9 = vld [vmem:[%s448_s1 + $0x58] sm:$0xff]  ;;  %v23_v12 = vld [vmem:[%s449_s0 + $0x8] sm:$0xff] }
   0x5   :  { %v22_v11 = vld [vmem:[%s449_s0] sm:$0xff]  ;;  %v24_v13 = vld [vmem:[%s449_s0 + $0x10] sm:$0xff]  ;;  %v25_v14 = vld [vmem:[%s449_s0 + $0x18] sm:$0xff]  ;;  %v28_v17 = vunpack.c.l.bf16 %v23_v12  ;;  %v29_v22 = vunpack.c.h.bf16 %v23_v12 }
   0x6   :  { %179 = vmatpush.bf16.msra.mxu0 %v321_v2  ;;  %343 = vmatpush.bf16.msra.mxu2 %v321_v2  ;;  %v325_v15 = vld [vmem:[%s448_s1 + $0x50] sm:$0xff]  ;;  %v26_v16 = vunpack.c.l.bf16 %v22_v11  ;;  %v30_v18 = vunpack.c.l.bf16 %v24_v13  ;;  %v32_v19 = vunpack.c.l.bf16 %v25_v14  ;;  %v316_v20 = vld [vmem:[%s448_s1 + $0x8] sm:$0xff]  ;;  %v27_v21 = vunpack.c.h.bf16 %v22_v11  ;;  %v315_v30 = vld [vmem:[%s448_s1] sm:$0xff] }
   0x7   :  { %198 = vmatpush.bf16.msra.mxu1 %v329_v3  ;;  %351 = vmatpush.bf16.msra.mxu3 %v329_v3  ;;  %v31_v23 = vunpack.c.h.bf16 %v24_v13  ;;  %v33_v24 = vunpack.c.h.bf16 %v25_v14  ;;  %v324_v25 = vld [vmem:[%s448_s1 + $0x48] sm:$0xff]  ;;  %v36_v27 = vmax.f32 %v28_v17, 0.0  ;;  %v37_v32 = vmax.f32 %v29_v22, 0.0  ;;  %v323_v35 = vld [vmem:[%s448_s1 + $0x40] sm:$0xff] }
   0x8   :  { %v34_v26 = vmax.f32 %v26_v16, 0.0  ;;  %v38_v28 = vmax.f32 %v30_v18, 0.0  ;;  %v40_v29 = vmax.f32 %v32_v19, 0.0  ;;  %v35_v31 = vmax.f32 %v27_v21, 0.0  ;;  %v358_v45 = vld [vmem:[%s450_s2] ss:$0 sm:$0xff] }
   0x9   :  { %v39_v33 = vmax.f32 %v31_v23, 0.0  ;;  %v41_v34 = vmax.f32 %v33_v24, 0.0 }
   0xa   :  { %180 = vmatpush.bf16.msra.mxu0 %v320_v4  ;;  %344 = vmatpush.bf16.msra.mxu2 %v320_v4  ;;  %v42_v36 = vpack.c.bf16 %v36_v27, %v34_v26  ;;  %v44_v37 = vpack.c.bf16 %v40_v29, %v38_v28  ;;  %v43_v38 = vpack.c.bf16 %v37_v32, %v35_v31 }
   0xb   :  { %199 = vmatpush.bf16.msra.mxu1 %v328_v5  ;;  %352 = vmatpush.bf16.msra.mxu3 %v328_v5  ;;  %v45_v39 = vpack.c.bf16 %v41_v34, %v39_v33 }
   0xe   :  { %181 = vmatpush.bf16.msra.mxu0 %v319_v6  ;;  %345 = vmatpush.bf16.msra.mxu2 %v319_v6 }
   0xf   :  { %200 = vmatpush.bf16.msra.mxu1 %v327_v7  ;;  %353 = vmatpush.bf16.msra.mxu3 %v327_v7 }
  0x12   :  { %182 = vmatpush.bf16.msra.mxu0 %v318_v8  ;;  %346 = vmatpush.bf16.msra.mxu2 %v318_v8 }
  0x13   :  { %201 = vmatpush.bf16.msra.mxu1 %v326_v9  ;;  %354 = vmatpush.bf16.msra.mxu3 %v326_v9 }
  0x16   :  { %183 = vmatpush.bf16.msra.mxu0 %v317_v10  ;;  %347 = vmatpush.bf16.msra.mxu2 %v317_v10 }
  0x17   :  { %202 = vmatpush.bf16.msra.mxu1 %v325_v15  ;;  %355 = vmatpush.bf16.msra.mxu3 %v325_v15 }
  0x1a   :  { %184 = vmatpush.bf16.msra.mxu0 %v316_v20  ;;  %348 = vmatpush.bf16.msra.mxu2 %v316_v20 }
  0x1b   :  { %203 = vmatpush.bf16.msra.mxu1 %v324_v25  ;;  %356 = vmatpush.bf16.msra.mxu3 %v324_v25 }
  0x1e   :  { %185 = vmatpush.bf16.msra.mxu0 %v315_v30  ;;  %349 = vmatpush.bf16.msra.mxu2 %v315_v30 }
  0x1f   :  { %204 = vmatpush.bf16.msra.mxu1 %v323_v35  ;;  %357 = vmatpush.bf16.msra.mxu3 %v323_v35 }
  0x21   :  { %186 = vmatmul.bf16.vlgmr.msra.gmra.mxu0 %v42_v36  ;;  %191 = vmatmul.bf16.vlgmr.msra.gmra.mxu2 %v44_v37 }
  0x22   :  { %205 = vmatmul.bf16.vlgmr.msra.gmra.mxu1 %v43_v38  ;;  %210 = vmatmul.bf16.vlgmr.msra.gmra.mxu3 %v45_v39 }
  0x9e   :  { %v187_v40 = vpop.f32.mrf.mxu0 }
  0x9f   :  { %v206_v41 = vpop.f32.mrf.mxu1 }
  0xa0   :  { %v207_v44 = vadd.f32 %v206_v41, %v187_v40 }
  0xa2   :  { %v235_v49 = vadd.f32 %v358_v45, %v207_v44 }
  0xa4   :  { %v192_v42 = vpop.f32.mrf.mxu2 }
  0xa5   :  { %v211_v43 = vpop.f32.mrf.mxu3 }
  0xa6   :  { %v189_v46 = vpop.f32.mrf.mxu0  ;;  %v212_v51 = vadd.f32 %v211_v43, %v192_v42 }
  0xa7   :  { %v208_v47 = vpop.f32.mrf.mxu1 }
  0xa8   :  { %v209_v48 = vadd.f32 %v208_v47, %v189_v46  ;;  %v237_v56 = vadd.f32 %v358_v45, %v212_v51 }
  0xaa   :  { %v236_v50 = vadd.f32 %v358_v45, %v209_v48 }
  0xac   :  { %v334_v52 = vpack.c.bf16 %v236_v50, %v235_v49  ;;  %v194_v53 = vpop.f32.mrf.mxu2 }
  0xad   :  { %v213_v54 = vpop.f32.mrf.mxu3 }
  0xae   :  { %335 = vst [vmem:[%s451_s3] sm:$0xff] %v334_v52   ;;  %v214_v55 = vadd.f32 %v213_v54, %v194_v53 }
  0xb0   :  { %v238_v57 = vadd.f32 %v358_v45, %v214_v55 }
  0xb2   :  { %v339_v58 = vpack.c.bf16 %v238_v57, %v237_v56 }
  0xb4   :  { %341 = vst [vmem:[%s451_s3 + $0x8] sm:$0xff] %v339_v58  }

// kernel: _lambda_.42
= control target key start
LH: loop header
LB: loop body
LE: loop exit
PB: predicated region body
PF: predicated region fallthrough
CT: control target
= control target key end

     0   :  { %s572_s1 = inlined_call_operand.vmem [shape: bf16[128,128], index: 1, kind: input, shape index: {}]   ;;  %s573_s2 = inlined_call_operand.vmem [shape: f32[1,128], index: 2, kind: input, shape index: {}]   ;;  %s574_s0 = inlined_call_operand.vmem [shape: bf16[128,128], index: 0, kind: input, shape index: {}]   ;;  %s575_s3 = inlined_call_operand.vmem [shape: bf16[128,128], index: 3, kind: output, shape index: {}]  }
   0x1   :  { %v365_v0 = vld [vmem:[%s572_s1 + $0x38] sm:$0xff]  ;;  %v364_v1 = vld [vmem:[%s572_s1 + $0x30] sm:$0xff]  ;;  %v363_v2 = vld [vmem:[%s572_s1 + $0x28] sm:$0xff] }
   0x2   :  { %170 = vmatpush.bf16.msra.mxu0 %v365_v0  ;;  %452 = vmatpush.bf16.msra.mxu1 %v365_v0  ;;  %v362_v3 = vld [vmem:[%s572_s1 + $0x20] sm:$0xff]  ;;  %v361_v4 = vld [vmem:[%s572_s1 + $0x18] sm:$0xff]  ;;  %v360_v5 = vld [vmem:[%s572_s1 + $0x10] sm:$0xff] }
   0x3   :  { %453 = vmatpush.bf16.msra.mxu2 %v365_v0  ;;  %454 = vmatpush.bf16.msra.mxu3 %v365_v0  ;;  %v367_v6 = vld [vmem:[%s574_s0] sm:$0xff]   ;;  %v439_v7 = vld [vmem:[%s574_s0 + $0x10] sm:$0xff]   ;;  %v359_v14 = vld [vmem:[%s572_s1 + $0x8] sm:$0xff] }
   0x4   :  { %v441_v8 = vld [vmem:[%s574_s0 + $0x20] sm:$0xff]   ;;  %v443_v9 = vld [vmem:[%s574_s0 + $0x30] sm:$0xff]   ;;  %v368_v10 = vunpack.c.l.bf16 %v367_v6  ;;  %v369_v11 = vunpack.c.h.bf16 %v367_v6  ;;  %v376_v12 = vunpack.c.l.bf16 %v439_v7  ;;  %v377_v13 = vunpack.c.h.bf16 %v439_v7  ;;  %v438_v32 = vld [vmem:[%s574_s0 + $0x8] sm:$0xff]  }
   0x5   :  { %v384_v15 = vunpack.c.l.bf16 %v441_v8  ;;  %v385_v16 = vunpack.c.h.bf16 %v441_v8  ;;  %v392_v17 = vunpack.c.l.bf16 %v443_v9  ;;  %v393_v18 = vunpack.c.h.bf16 %v443_v9  ;;  %v358_v23 = vld [vmem:[%s572_s1] sm:$0xff]  ;;  %v440_v33 = vld [vmem:[%s574_s0 + $0x18] sm:$0xff]   ;;  %v442_v34 = vld [vmem:[%s574_s0 + $0x28] sm:$0xff]  }
   0x6   :  { %171 = vmatpush.bf16.msra.mxu0 %v364_v1  ;;  %455 = vmatpush.bf16.msra.mxu1 %v364_v1  ;;  %v66_v19 = vmax.f32 %v368_v10, 0.0  ;;  %v67_v20 = vmax.f32 %v369_v11, 0.0  ;;  %v70_v21 = vmax.f32 %v376_v12, 0.0  ;;  %v71_v22 = vmax.f32 %v377_v13, 0.0  ;;  %v444_v35 = vld [vmem:[%s574_s0 + $0x38] sm:$0xff]  }
   0x7   :  { %456 = vmatpush.bf16.msra.mxu2 %v364_v1  ;;  %457 = vmatpush.bf16.msra.mxu3 %v364_v1  ;;  %v74_v24 = vmax.f32 %v384_v15, 0.0  ;;  %v75_v25 = vmax.f32 %v385_v16, 0.0  ;;  %v78_v26 = vmax.f32 %v392_v17, 0.0  ;;  %v79_v27 = vmax.f32 %v393_v18, 0.0  ;;  %v476_v58 = vld [vmem:[%s573_s2] ss:$0 sm:$0xff] }
   0x8   :  { %v82_v28 = vpack.c.bf16 %v67_v20, %v66_v19  ;;  %v84_v29 = vpack.c.bf16 %v71_v22, %v70_v21  ;;  %v372_v36 = vunpack.c.l.bf16 %v438_v32  ;;  %v373_v37 = vunpack.c.h.bf16 %v438_v32 }
   0x9   :  { %v86_v30 = vpack.c.bf16 %v75_v25, %v74_v24  ;;  %v88_v31 = vpack.c.bf16 %v79_v27, %v78_v26  ;;  %v380_v38 = vunpack.c.l.bf16 %v440_v33  ;;  %v381_v39 = vunpack.c.h.bf16 %v440_v33 }
   0xa   :  { %172 = vmatpush.bf16.msra.mxu0 %v363_v2  ;;  %458 = vmatpush.bf16.msra.mxu1 %v363_v2  ;;  %v388_v40 = vunpack.c.l.bf16 %v442_v34  ;;  %v389_v41 = vunpack.c.h.bf16 %v442_v34  ;;  %v396_v42 = vunpack.c.l.bf16 %v444_v35  ;;  %v397_v43 = vunpack.c.h.bf16 %v444_v35 }
   0xb   :  { %459 = vmatpush.bf16.msra.mxu2 %v363_v2  ;;  %460 = vmatpush.bf16.msra.mxu3 %v363_v2  ;;  %v68_v44 = vmax.f32 %v372_v36, 0.0  ;;  %v69_v45 = vmax.f32 %v373_v37, 0.0  ;;  %v72_v46 = vmax.f32 %v380_v38, 0.0  ;;  %v73_v47 = vmax.f32 %v381_v39, 0.0 }
   0xc   :  { %v76_v48 = vmax.f32 %v388_v40, 0.0  ;;  %v77_v49 = vmax.f32 %v389_v41, 0.0  ;;  %v80_v50 = vmax.f32 %v396_v42, 0.0  ;;  %v81_v51 = vmax.f32 %v397_v43, 0.0 }
   0xd   :  { %v83_v52 = vpack.c.bf16 %v69_v45, %v68_v44  ;;  %v85_v53 = vpack.c.bf16 %v73_v47, %v72_v46 }
   0xe   :  { %173 = vmatpush.bf16.msra.mxu0 %v362_v3  ;;  %461 = vmatpush.bf16.msra.mxu1 %v362_v3  ;;  %v87_v54 = vpack.c.bf16 %v77_v49, %v76_v48  ;;  %v89_v55 = vpack.c.bf16 %v81_v51, %v80_v50 }
   0xf   :  { %462 = vmatpush.bf16.msra.mxu2 %v362_v3  ;;  %463 = vmatpush.bf16.msra.mxu3 %v362_v3 }
  0x12   :  { %174 = vmatpush.bf16.msra.mxu0 %v361_v4  ;;  %464 = vmatpush.bf16.msra.mxu1 %v361_v4 }
  0x13   :  { %465 = vmatpush.bf16.msra.mxu2 %v361_v4  ;;  %466 = vmatpush.bf16.msra.mxu3 %v361_v4 }
  0x16   :  { %175 = vmatpush.bf16.msra.mxu0 %v360_v5  ;;  %467 = vmatpush.bf16.msra.mxu1 %v360_v5 }
  0x17   :  { %468 = vmatpush.bf16.msra.mxu2 %v360_v5  ;;  %469 = vmatpush.bf16.msra.mxu3 %v360_v5 }
  0x1a   :  { %176 = vmatpush.bf16.msra.mxu0 %v359_v14  ;;  %470 = vmatpush.bf16.msra.mxu1 %v359_v14 }
  0x1b   :  { %471 = vmatpush.bf16.msra.mxu2 %v359_v14  ;;  %472 = vmatpush.bf16.msra.mxu3 %v359_v14 }
  0x1e   :  { %177 = vmatpush.bf16.msra.mxu0 %v358_v23  ;;  %473 = vmatpush.bf16.msra.mxu1 %v358_v23 }
  0x1f   :  { %474 = vmatpush.bf16.msra.mxu2 %v358_v23  ;;  %475 = vmatpush.bf16.msra.mxu3 %v358_v23 }
  0x21   :  { %178 = vmatmul.bf16.vlgmr.msra.gmra.mxu0 %v82_v28  ;;  %188 = vmatmul.bf16.vlgmr.msra.gmra.mxu1 %v84_v29 }
  0x22   :  { %198 = vmatmul.bf16.vlgmr.msra.gmra.mxu2 %v86_v30  ;;  %208 = vmatmul.bf16.vlgmr.msra.gmra.mxu3 %v88_v31 }
  0x31   :  { %183 = vmatmul.bf16.gmra.mxu0 %v83_v52  ;;  %193 = vmatmul.bf16.gmra.mxu1 %v85_v53 }
  0x32   :  { %203 = vmatmul.bf16.gmra.mxu2 %v87_v54  ;;  %213 = vmatmul.bf16.gmra.mxu3 %v89_v55 }
  0x9e   :  { %v179_v56 = vpop.f32.mrf.mxu0  ;;  %v189_v57 = vpop.f32.mrf.mxu1 }
  0x9f   :  { %v274_v63 = vadd.f32 %v476_v58, %v179_v56  ;;  %v278_v0 = vadd.f32 %v476_v58, %v189_v57 }
  0xa5   :  { %v199_v59 = vpop.f32.mrf.mxu2  ;;  %v209_v60 = vpop.f32.mrf.mxu3 }
  0xa6   :  { %v181_v61 = vpop.f32.mrf.mxu0  ;;  %v191_v62 = vpop.f32.mrf.mxu1  ;;  %v282_v7 = vadd.f32 %v476_v58, %v199_v59  ;;  %v286_v8 = vadd.f32 %v476_v58, %v209_v60 }
  0xa7   :  { %v275_v1 = vadd.f32 %v476_v58, %v181_v61  ;;  %v279_v2 = vadd.f32 %v476_v58, %v191_v62 }
  0xa9   :  { %v401_v3 = vpack.c.bf16 %v275_v1, %v274_v63  ;;  %v411_v4 = vpack.c.bf16 %v279_v2, %v278_v0 }
  0xab   :  { %402 = vst [vmem:[%s575_s3] sm:$0xff] %v401_v3  }
  0xac   :  { %446 = vst [vmem:[%s575_s3 + $0x10] sm:$0xff] %v411_v4  }
  0xad   :  { %v201_v5 = vpop.f32.mrf.mxu2  ;;  %v211_v6 = vpop.f32.mrf.mxu3 }
  0xae   :  { %v283_v9 = vadd.f32 %v476_v58, %v201_v5  ;;  %v287_v10 = vadd.f32 %v476_v58, %v211_v6  ;;  %v184_v11 = vpop.f32.mrf.mxu0  ;;  %v194_v12 = vpop.f32.mrf.mxu1 }
  0xaf   :  { %v276_v19 = vadd.f32 %v476_v58, %v184_v11  ;;  %v280_v20 = vadd.f32 %v476_v58, %v194_v12 }
  0xb0   :  { %v421_v13 = vpack.c.bf16 %v283_v9, %v282_v7  ;;  %v431_v14 = vpack.c.bf16 %v287_v10, %v286_v8 }
  0xb2   :  { %448 = vst [vmem:[%s575_s3 + $0x20] sm:$0xff] %v421_v13  }
  0xb3   :  { %450 = vst [vmem:[%s575_s3 + $0x30] sm:$0xff] %v431_v14  }
  0xb5   :  { %v204_v15 = vpop.f32.mrf.mxu2  ;;  %v214_v16 = vpop.f32.mrf.mxu3 }
  0xb6   :  { %v186_v17 = vpop.f32.mrf.mxu0  ;;  %v196_v18 = vpop.f32.mrf.mxu1  ;;  %v284_v27 = vadd.f32 %v476_v58, %v204_v15  ;;  %v288_v28 = vadd.f32 %v476_v58, %v214_v16 }
  0xb7   :  { %v277_v21 = vadd.f32 %v476_v58, %v186_v17  ;;  %v281_v22 = vadd.f32 %v476_v58, %v196_v18 }
  0xb9   :  { %v406_v23 = vpack.c.bf16 %v277_v21, %v276_v19  ;;  %v416_v24 = vpack.c.bf16 %v281_v22, %v280_v20 }
  0xbb   :  { %445 = vst [vmem:[%s575_s3 + $0x8] sm:$0xff] %v406_v23  }
  0xbc   :  { %447 = vst [vmem:[%s575_s3 + $0x18] sm:$0xff] %v416_v24  }
  0xbd   :  { %v206_v25 = vpop.f32.mrf.mxu2  ;;  %v216_v26 = vpop.f32.mrf.mxu3 }
  0xbe   :  { %v285_v29 = vadd.f32 %v476_v58, %v206_v25  ;;  %v289_v30 = vadd.f32 %v476_v58, %v216_v26 }
  0xc0   :  { %v426_v31 = vpack.c.bf16 %v285_v29, %v284_v27  ;;  %v436_v32 = vpack.c.bf16 %v289_v30, %v288_v28 }
  0xc2   :  { %449 = vst [vmem:[%s575_s3 + $0x28] sm:$0xff] %v426_v31  }
  0xc3   :  { %451 = vst [vmem:[%s575_s3 + $0x38] sm:$0xff] %v436_v32  }

// kernel: _lambda_.46
= control target key start
LH: loop header
LB: loop body
LE: loop exit
PB: predicated region body
PF: predicated region fallthrough
CT: control target
= control target key end

     0   :  { %vm403_vm0 = vcmask 523264   ;;  %s1837_s1 = inlined_call_operand.vmem [shape: bf16[64,128], index: 1, kind: input, shape index: {}]   ;;  %s1838_s0 = inlined_call_operand.vmem [shape: bf16[512,64], index: 0, kind: input, shape index: {}]   ;;  %s1839_s2 = inlined_call_operand.vmem [shape: f32[1,128], index: 2, kind: input, shape index: {}]   ;;  %s1840_s3 = inlined_call_operand.vmem [shape: f32[512,128], index: 3, kind: output, shape index: {}]  }
   0x1   :  { %v1115_v0 = vld [vmem:[%s1837_s1 + $0x18] sm:$0xff]  ;;  %v1114_v1 = vld [vmem:[%s1837_s1 + $0x10] sm:$0xff]  ;;  %v1117_v2 = vld [vmem:[%s1838_s0] sm:$0xff]  }
   0x2   :  { %504 = vmatpush.bf16.msra.mxu0 %v1115_v0  ;;  %1275 = vmatpush.bf16.msra.mxu1 %v1115_v0  ;;  %v1251_v3 = vld [vmem:[%s1838_s0 + $0x40] sm:$0xff]   ;;  %v1118_v6 = vunpack.c.l.bf16 %v1117_v2  ;;  %v1119_v7 = vunpack.c.h.bf16 %v1117_v2  ;;  %v1113_v10 = vld [vmem:[%s1837_s1 + $0x8] sm:$0xff]  ;;  %v1245_v52 = vld [vmem:[%s1838_s0 + $0x10] sm:$0xff]  }
   0x3   :  { %1276 = vmatpush.bf16.msra.mxu2 %v1115_v0  ;;  %1277 = vmatpush.bf16.msra.mxu3 %v1115_v0  ;;  %v1259_v4 = vld [vmem:[%s1838_s0 + $0x80] sm:$0xff]   ;;  %v1150_v8 = vunpack.c.l.bf16 %v1251_v3  ;;  %v1151_v9 = vunpack.c.h.bf16 %v1251_v3  ;;  %v1244_v28 = vld [vmem:[%s1838_s0 + $0x8] sm:$0xff]   ;;  %v1253_v53 = vld [vmem:[%s1838_s0 + $0x50] sm:$0xff]   ;;  %v1126_v56 = vunpack.c.l.bf16 %v1245_v52  ;;  %v1127_v57 = vunpack.c.h.bf16 %v1245_v52 }
   0x4   :  { %v1267_v5 = vld [vmem:[%s1838_s0 + $0xc0] sm:$0xff]   ;;  %v1182_v11 = vunpack.c.l.bf16 %v1259_v4  ;;  %v1183_v12 = vunpack.c.h.bf16 %v1259_v4  ;;  %v211_v15 = vmax.f32 %v1118_v6, 0.0  ;;  %v212_v16 = vmax.f32 %v1119_v7, 0.0  ;;  %v1252_v29 = vld [vmem:[%s1838_s0 + $0x48] sm:$0xff]   ;;  %v1261_v54 = vld [vmem:[%s1838_s0 + $0x90] sm:$0xff]  }
   0x5   :  { %v1214_v13 = vunpack.c.l.bf16 %v1267_v5  ;;  %v1215_v14 = vunpack.c.h.bf16 %v1267_v5  ;;  %v227_v17 = vmax.f32 %v1150_v8, 0.0  ;;  %v228_v18 = vmax.f32 %v1151_v9, 0.0  ;;  %v1112_v19 = vld [vmem:[%s1837_s1] sm:$0xff]  ;;  %v1260_v30 = vld [vmem:[%s1838_s0 + $0x88] sm:$0xff]   ;;  %v1269_v55 = vld [vmem:[%s1838_s0 + $0xd0] sm:$0xff]  }
   0x6   :  { %505 = vmatpush.bf16.msra.mxu0 %v1114_v1  ;;  %1278 = vmatpush.bf16.msra.mxu1 %v1114_v1  ;;  %v243_v20 = vmax.f32 %v1182_v11, 0.0  ;;  %v244_v21 = vmax.f32 %v1183_v12, 0.0  ;;  %v275_v24 = vpack.c.bf16 %v212_v16, %v211_v15  ;;  %v1268_v31 = vld [vmem:[%s1838_s0 + $0xc8] sm:$0xff]   ;;  %v1122_v32 = vunpack.c.l.bf16 %v1244_v28  ;;  %v1246_v12 = vld [vmem:[%s1838_s0 + $0x18] sm:$0xff]  }
   0x7   :  { %1279 = vmatpush.bf16.msra.mxu2 %v1114_v1  ;;  %1280 = vmatpush.bf16.msra.mxu3 %v1114_v1  ;;  %v259_v22 = vmax.f32 %v1214_v13, 0.0  ;;  %v260_v23 = vmax.f32 %v1215_v14, 0.0  ;;  %v283_v25 = vpack.c.bf16 %v228_v18, %v227_v17  ;;  %v1123_v33 = vunpack.c.h.bf16 %v1244_v28  ;;  %v1254_v13 = vld [vmem:[%s1838_s0 + $0x58] sm:$0xff]  }
   0x8   :  { %v291_v26 = vpack.c.bf16 %v244_v21, %v243_v20  ;;  %v1154_v34 = vunpack.c.l.bf16 %v1252_v29  ;;  %v1155_v35 = vunpack.c.h.bf16 %v1252_v29  ;;  %v1186_v36 = vunpack.c.l.bf16 %v1260_v30  ;;  %v1262_v14 = vld [vmem:[%s1838_s0 + $0x98] sm:$0xff]  }
   0x9   :  { %v299_v27 = vpack.c.bf16 %v260_v23, %v259_v22  ;;  %v1187_v37 = vunpack.c.h.bf16 %v1260_v30  ;;  %v1218_v38 = vunpack.c.l.bf16 %v1268_v31  ;;  %v1219_v39 = vunpack.c.h.bf16 %v1268_v31  ;;  %v1270_v15 = vld [vmem:[%s1838_s0 + $0xd8] sm:$0xff]  }
   0xa   :  { %506 = vmatpush.bf16.msra.mxu0 %v1113_v10  ;;  %1281 = vmatpush.bf16.msra.mxu1 %v1113_v10  ;;  %v213_v40 = vmax.f32 %v1122_v32, 0.0  ;;  %v214_v41 = vmax.f32 %v1123_v33, 0.0  ;;  %v229_v42 = vmax.f32 %v1154_v34, 0.0  ;;  %v230_v43 = vmax.f32 %v1155_v35, 0.0 }
   0xb   :  { %1282 = vmatpush.bf16.msra.mxu2 %v1113_v10  ;;  %1283 = vmatpush.bf16.msra.mxu3 %v1113_v10  ;;  %v245_v44 = vmax.f32 %v1186_v36, 0.0  ;;  %v246_v45 = vmax.f32 %v1187_v37, 0.0  ;;  %v261_v46 = vmax.f32 %v1218_v38, 0.0  ;;  %v262_v47 = vmax.f32 %v1219_v39, 0.0  ;;  %v1247_v36 = vld [vmem:[%s1838_s0 + $0x20] sm:$0xff]  }
   0xc   :  { %v276_v48 = vpack.c.bf16 %v214_v41, %v213_v40  ;;  %v284_v49 = vpack.c.bf16 %v230_v43, %v229_v42  ;;  %v1158_v58 = vunpack.c.l.bf16 %v1253_v53  ;;  %v1159_v59 = vunpack.c.h.bf16 %v1253_v53  ;;  %v1255_v37 = vld [vmem:[%s1838_s0 + $0x60] sm:$0xff]  }
   0xd   :  { %v292_v50 = vpack.c.bf16 %v246_v45, %v245_v44  ;;  %v300_v51 = vpack.c.bf16 %v262_v47, %v261_v46  ;;  %v1190_v60 = vunpack.c.l.bf16 %v1261_v54  ;;  %v1191_v61 = vunpack.c.h.bf16 %v1261_v54  ;;  %v1263_v38 = vld [vmem:[%s1838_s0 + $0xa0] sm:$0xff]  }
   0xe   :  { %507 = vmatpush.bf16.msra.mxu0 %v1112_v19  ;;  %1284 = vmatpush.bf16.msra.mxu1 %v1112_v19  ;;  %v1222_v62 = vunpack.c.l.bf16 %v1269_v55  ;;  %v1223_v63 = vunpack.c.h.bf16 %v1269_v55  ;;  %v215_v0 = vmax.f32 %v1126_v56, 0.0  ;;  %v216_v1 = vmax.f32 %v1127_v57, 0.0  ;;  %v1271_v39 = vld [vmem:[%s1838_s0 + $0xe0] sm:$0xff]  }
   0xf   :  { %1285 = vmatpush.bf16.msra.mxu2 %v1112_v19  ;;  %1286 = vmatpush.bf16.msra.mxu3 %v1112_v19  ;;  %v231_v2 = vmax.f32 %v1158_v58, 0.0  ;;  %v232_v3 = vmax.f32 %v1159_v59, 0.0  ;;  %v247_v4 = vmax.f32 %v1190_v60, 0.0  ;;  %v248_v5 = vmax.f32 %v1191_v61, 0.0  ;;  %v1248_v60 = vld [vmem:[%s1838_s0 + $0x28] sm:$0xff]  }
  0x10   :  { %v263_v6 = vmax.f32 %v1222_v62, 0.0  ;;  %v264_v7 = vmax.f32 %v1223_v63, 0.0  ;;  %v277_v8 = vpack.c.bf16 %v216_v1, %v215_v0  ;;  %v1130_v16 = vunpack.c.l.bf16 %v1246_v12  ;;  %v1256_v61 = vld [vmem:[%s1838_s0 + $0x68] sm:$0xff]  }
  0x11   :  { %1080 = vmatmul.msk.bf16.vlgmr.msra.gmra.mxu0 %vm403_vm0, %v275_v24  ;;  %1088 = vmatmul.msk.bf16.vlgmr.msra.gmra.mxu1 %vm403_vm0, %v283_v25  ;;  %v285_v9 = vpack.c.bf16 %v232_v3, %v231_v2  ;;  %v293_v10 = vpack.c.bf16 %v248_v5, %v247_v4  ;;  %v1131_v17 = vunpack.c.h.bf16 %v1246_v12  ;;  %v1162_v18 = vunpack.c.l.bf16 %v1254_v13  ;;  %v1264_v62 = vld [vmem:[%s1838_s0 + $0xa8] sm:$0xff]  }
  0x12   :  { %1096 = vmatmul.msk.bf16.vlgmr.msra.gmra.mxu2 %vm403_vm0, %v291_v26  ;;  %1104 = vmatmul.msk.bf16.vlgmr.msra.gmra.mxu3 %vm403_vm0, %v299_v27  ;;  %v301_v11 = vpack.c.bf16 %v264_v7, %v263_v6  ;;  %v1163_v19 = vunpack.c.h.bf16 %v1254_v13  ;;  %v1194_v20 = vunpack.c.l.bf16 %v1262_v14  ;;  %v1195_v21 = vunpack.c.h.bf16 %v1262_v14  ;;  %v1272_v63 = vld [vmem:[%s1838_s0 + $0xe8] sm:$0xff]  }
  0x13   :  { %v1226_v22 = vunpack.c.l.bf16 %v1270_v15  ;;  %v1227_v23 = vunpack.c.h.bf16 %v1270_v15  ;;  %v217_v24 = vmax.f32 %v1130_v16, 0.0  ;;  %v218_v25 = vmax.f32 %v1131_v17, 0.0 }
  0x14   :  { %v233_v26 = vmax.f32 %v1162_v18, 0.0  ;;  %v234_v27 = vmax.f32 %v1163_v19, 0.0  ;;  %v249_v28 = vmax.f32 %v1194_v20, 0.0  ;;  %v250_v29 = vmax.f32 %v1195_v21, 0.0  ;;  %v1249_v20 = vld [vmem:[%s1838_s0 + $0x30] sm:$0xff]  }
  0x15   :  { %v265_v30 = vmax.f32 %v1226_v22, 0.0  ;;  %v266_v31 = vmax.f32 %v1227_v23, 0.0  ;;  %v278_v32 = vpack.c.bf16 %v218_v25, %v217_v24  ;;  %v1134_v40 = vunpack.c.l.bf16 %v1247_v36  ;;  %v1257_v21 = vld [vmem:[%s1838_s0 + $0x70] sm:$0xff]  }
  0x16   :  { %v286_v33 = vpack.c.bf16 %v234_v27, %v233_v26  ;;  %v294_v34 = vpack.c.bf16 %v250_v29, %v249_v28  ;;  %v1135_v41 = vunpack.c.h.bf16 %v1247_v36  ;;  %v1166_v42 = vunpack.c.l.bf16 %v1255_v37  ;;  %v1265_v22 = vld [vmem:[%s1838_s0 + $0xb0] sm:$0xff]  }
  0x17   :  { %v302_v35 = vpack.c.bf16 %v266_v31, %v265_v30  ;;  %v1167_v43 = vunpack.c.h.bf16 %v1255_v37  ;;  %v1198_v44 = vunpack.c.l.bf16 %v1263_v38  ;;  %v1199_v45 = vunpack.c.h.bf16 %v1263_v38  ;;  %v1273_v23 = vld [vmem:[%s1838_s0 + $0xf0] sm:$0xff]  }
  0x18   :  { %v1230_v46 = vunpack.c.l.bf16 %v1271_v39  ;;  %v1231_v47 = vunpack.c.h.bf16 %v1271_v39  ;;  %v1138_v0 = vunpack.c.l.bf16 %v1248_v60  ;;  %v1139_v1 = vunpack.c.h.bf16 %v1248_v60 }
  0x19   :  { %v251_v52 = vmax.f32 %v1198_v44, 0.0  ;;  %v252_v53 = vmax.f32 %v1199_v45, 0.0  ;;  %v1170_v2 = vunpack.c.l.bf16 %v1256_v61  ;;  %v1171_v3 = vunpack.c.h.bf16 %v1256_v61  ;;  %v1250_v44 = vld [vmem:[%s1838_s0 + $0x38] sm:$0xff]  }
  0x1a   :  { %v267_v54 = vmax.f32 %v1230_v46, 0.0  ;;  %v268_v55 = vmax.f32 %v1231_v47, 0.0  ;;  %v1202_v4 = vunpack.c.l.bf16 %v1264_v62  ;;  %v1203_v5 = vunpack.c.h.bf16 %v1264_v62  ;;  %v1258_v45 = vld [vmem:[%s1838_s0 + $0x78] sm:$0xff]  }
  0x1b   :  { %v295_v58 = vpack.c.bf16 %v252_v53, %v251_v52  ;;  %v1234_v6 = vunpack.c.l.bf16 %v1272_v63  ;;  %v1235_v7 = vunpack.c.h.bf16 %v1272_v63  ;;  %v1142_v24 = vunpack.c.l.bf16 %v1249_v20  ;;  %v1266_v46 = vld [vmem:[%s1838_s0 + $0xb8] sm:$0xff]  }
  0x1c   :  { %v303_v59 = vpack.c.bf16 %v268_v55, %v267_v54  ;;  %v253_v12 = vmax.f32 %v1202_v4, 0.0  ;;  %v254_v13 = vmax.f32 %v1203_v5, 0.0  ;;  %v1143_v25 = vunpack.c.h.bf16 %v1249_v20  ;;  %v1274_v47 = vld [vmem:[%s1838_s0 + $0xf8] sm:$0xff]   ;;  %v1579_v4 = vld [vmem:[%s1839_s2] ss:$0 sm:$0xff] }
  0x1d   :  { %v269_v14 = vmax.f32 %v1234_v6, 0.0  ;;  %v270_v15 = vmax.f32 %v1235_v7, 0.0  ;;  %v1174_v26 = vunpack.c.l.bf16 %v1257_v21  ;;  %v1175_v27 = vunpack.c.h.bf16 %v1257_v21 }
  0x1e   :  { %v296_v18 = vpack.c.bf16 %v254_v13, %v253_v12  ;;  %v1206_v28 = vunpack.c.l.bf16 %v1265_v22  ;;  %v1207_v29 = vunpack.c.h.bf16 %v1265_v22  ;;  %v1238_v30 = vunpack.c.l.bf16 %v1273_v23 }
  0x1f   :  { %v304_v19 = vpack.c.bf16 %v270_v15, %v269_v14  ;;  %v1239_v31 = vunpack.c.h.bf16 %v1273_v23  ;;  %v1210_v52 = vunpack.c.l.bf16 %v1266_v46  ;;  %v1211_v53 = vunpack.c.h.bf16 %v1266_v46 }
  0x20   :  { %v255_v36 = vmax.f32 %v1206_v28, 0.0  ;;  %v256_v37 = vmax.f32 %v1207_v29, 0.0  ;;  %v271_v38 = vmax.f32 %v1238_v30, 0.0  ;;  %v1242_v54 = vunpack.c.l.bf16 %v1274_v47 }
  0x21   :  { %1081 = vmatmul.msk.bf16.gmra.mxu0 %vm403_vm0, %v276_v48  ;;  %1089 = vmatmul.msk.bf16.gmra.mxu1 %vm403_vm0, %v284_v49  ;;  %v219_v48 = vmax.f32 %v1134_v40, 0.0  ;;  %v220_v49 = vmax.f32 %v1135_v41, 0.0  ;;  %v272_v39 = vmax.f32 %v1239_v31, 0.0  ;;  %v1243_v55 = vunpack.c.h.bf16 %v1274_v47 }
  0x22   :  { %1097 = vmatmul.msk.bf16.gmra.mxu2 %vm403_vm0, %v292_v50  ;;  %1105 = vmatmul.msk.bf16.gmra.mxu3 %vm403_vm0, %v300_v51  ;;  %v235_v50 = vmax.f32 %v1166_v42, 0.0  ;;  %v236_v51 = vmax.f32 %v1167_v43, 0.0  ;;  %v297_v42 = vpack.c.bf16 %v256_v37, %v255_v36  ;;  %v257_v60 = vmax.f32 %v1210_v52, 0.0 }
  0x23   :  { %v279_v56 = vpack.c.bf16 %v220_v49, %v219_v48  ;;  %v305_v43 = vpack.c.bf16 %v272_v39, %v271_v38  ;;  %v1146_v48 = vunpack.c.l.bf16 %v1250_v44  ;;  %v1147_v49 = vunpack.c.h.bf16 %v1250_v44 }
  0x24   :  { %v287_v57 = vpack.c.bf16 %v236_v51, %v235_v50  ;;  %v1178_v50 = vunpack.c.l.bf16 %v1258_v45  ;;  %v1179_v51 = vunpack.c.h.bf16 %v1258_v45  ;;  %v258_v61 = vmax.f32 %v1211_v53, 0.0 }
  0x25   :  { %v273_v62 = vmax.f32 %v1242_v54, 0.0  ;;  %v274_v63 = vmax.f32 %v1243_v55, 0.0 }
  0x31   :  { %1082 = vmatmul.msk.bf16.gmra.mxu0 %vm403_vm0, %v277_v8  ;;  %1090 = vmatmul.msk.bf16.gmra.mxu1 %vm403_vm0, %v285_v9  ;;  %v221_v8 = vmax.f32 %v1138_v0, 0.0  ;;  %v222_v9 = vmax.f32 %v1139_v1, 0.0 }
  0x32   :  { %1098 = vmatmul.msk.bf16.gmra.mxu2 %vm403_vm0, %v293_v10  ;;  %1106 = vmatmul.msk.bf16.gmra.mxu3 %vm403_vm0, %v301_v11  ;;  %v237_v10 = vmax.f32 %v1170_v2, 0.0  ;;  %v238_v11 = vmax.f32 %v1171_v3, 0.0  ;;  %v298_v2 = vpack.c.bf16 %v258_v61, %v257_v60  ;;  %v306_v3 = vpack.c.bf16 %v274_v63, %v273_v62 }
  0x33   :  { %v280_v16 = vpack.c.bf16 %v222_v9, %v221_v8 }
  0x34   :  { %v288_v17 = vpack.c.bf16 %v238_v11, %v237_v10 }
  0x41   :  { %1083 = vmatmul.msk.bf16.gmra.mxu0 %vm403_vm0, %v278_v32  ;;  %1091 = vmatmul.msk.bf16.gmra.mxu1 %vm403_vm0, %v286_v33  ;;  %v223_v32 = vmax.f32 %v1142_v24, 0.0  ;;  %v224_v33 = vmax.f32 %v1143_v25, 0.0 }
  0x42   :  { %1099 = vmatmul.msk.bf16.gmra.mxu2 %vm403_vm0, %v294_v34  ;;  %1107 = vmatmul.msk.bf16.gmra.mxu3 %vm403_vm0, %v302_v35  ;;  %v239_v34 = vmax.f32 %v1174_v26, 0.0  ;;  %v240_v35 = vmax.f32 %v1175_v27, 0.0 }
  0x43   :  { %v281_v40 = vpack.c.bf16 %v224_v33, %v223_v32 }
  0x44   :  { %v289_v41 = vpack.c.bf16 %v240_v35, %v239_v34 }
  0x51   :  { %1084 = vmatmul.msk.bf16.gmra.mxu0 %vm403_vm0, %v279_v56  ;;  %1092 = vmatmul.msk.bf16.gmra.mxu1 %vm403_vm0, %v287_v57  ;;  %v225_v56 = vmax.f32 %v1146_v48, 0.0  ;;  %v226_v57 = vmax.f32 %v1147_v49, 0.0 }
  0x52   :  { %1100 = vmatmul.msk.bf16.gmra.mxu2 %vm403_vm0, %v295_v58  ;;  %1108 = vmatmul.msk.bf16.gmra.mxu3 %vm403_vm0, %v303_v59  ;;  %v241_v58 = vmax.f32 %v1178_v50, 0.0  ;;  %v242_v59 = vmax.f32 %v1179_v51, 0.0 }
  0x53   :  { %v282_v0 = vpack.c.bf16 %v226_v57, %v225_v56 }
  0x54   :  { %v290_v1 = vpack.c.bf16 %v242_v59, %v241_v58 }
  0x61   :  { %1085 = vmatmul.msk.bf16.gmra.mxu0 %vm403_vm0, %v280_v16  ;;  %1093 = vmatmul.msk.bf16.gmra.mxu1 %vm403_vm0, %v288_v17 }
  0x62   :  { %1101 = vmatmul.msk.bf16.gmra.mxu2 %vm403_vm0, %v296_v18  ;;  %1109 = vmatmul.msk.bf16.gmra.mxu3 %vm403_vm0, %v304_v19 }
  0x71   :  { %1086 = vmatmul.msk.bf16.gmra.mxu0 %vm403_vm0, %v281_v40  ;;  %1094 = vmatmul.msk.bf16.gmra.mxu1 %vm403_vm0, %v289_v41 }
  0x72   :  { %1102 = vmatmul.msk.bf16.gmra.mxu2 %vm403_vm0, %v297_v42  ;;  %1110 = vmatmul.msk.bf16.gmra.mxu3 %vm403_vm0, %v305_v43 }
  0x81   :  { %1087 = vmatmul.msk.bf16.gmra.mxu0 %vm403_vm0, %v282_v0  ;;  %1095 = vmatmul.msk.bf16.gmra.mxu1 %vm403_vm0, %v290_v1 }
  0x82   :  { %1103 = vmatmul.msk.bf16.gmra.mxu2 %vm403_vm0, %v298_v2  ;;  %1111 = vmatmul.msk.bf16.gmra.mxu3 %vm403_vm0, %v306_v3 }
  0x8e   :  { %v509_v5 = vpop.f32.mrf.mxu0  ;;  %v549_v6 = vpop.f32.mrf.mxu1 }
  0x8f   :  { %v868_v7 = vadd.f32 %v1579_v4, %v509_v5  ;;  %v884_v8 = vadd.f32 %v1579_v4, %v549_v6 }
  0x91   :  { %1288 = vtanh.f32 %v868_v7 }
  0x92   :  { %1290 = vtanh.f32 %v884_v8 }
  0x95   :  { %v589_v9 = vpop.f32.mrf.mxu2  ;;  %v629_v10 = vpop.f32.mrf.mxu3 }
  0x96   :  { %v900_v11 = vadd.f32 %v1579_v4, %v589_v9  ;;  %v916_v12 = vadd.f32 %v1579_v4, %v629_v10  ;;  %v511_v13 = vpop.f32.mrf.mxu0  ;;  %v551_v14 = vpop.f32.mrf.mxu1 }
  0x97   :  { %v1289_v15 = vpop.eup %1288  ;;  %v869_v16 = vadd.f32 %v1579_v4, %v511_v13  ;;  %v885_v17 = vadd.f32 %v1579_v4, %v551_v14 }
  0x98   :  { %v1291_v18 = vpop.eup %1290  ;;  %996 = vst [vmem:[%s1840_s3] sm:$0xff] %v1289_v15  ;;  %1292 = vtanh.f32 %v900_v11 }
  0x99   :  { %1012 = vst [vmem:[%s1840_s3 + $0x80] sm:$0xff] %v1291_v18  ;;  %1294 = vtanh.f32 %v916_v12 }
  0x9a   :  { %1296 = vtanh.f32 %v869_v16 }
  0x9b   :  { %1298 = vtanh.f32 %v885_v17 }
  0x9d   :  { %v591_v19 = vpop.f32.mrf.mxu2  ;;  %v631_v20 = vpop.f32.mrf.mxu3 }
  0x9e   :  { %v1293_v21 = vpop.eup %1292  ;;  %v901_v22 = vadd.f32 %v1579_v4, %v591_v19  ;;  %v917_v23 = vadd.f32 %v1579_v4, %v631_v20  ;;  %v514_v24 = vpop.f32.mrf.mxu0 }
  0x9f   :  { %v554_v25 = vpop.f32.mrf.mxu1  ;;  %v1295_v26 = vpop.eup %1294  ;;  %1028 = vst [vmem:[%s1840_s3 + $0x100] sm:$0xff] %v1293_v21  ;;  %v870_v27 = vadd.f32 %v1579_v4, %v514_v24 }
  0xa0   :  { %v886_v28 = vadd.f32 %v1579_v4, %v554_v25  ;;  %v1297_v29 = vpop.eup %1296  ;;  %1044 = vst [vmem:[%s1840_s3 + $0x180] sm:$0xff] %v1295_v26  ;;  %1300 = vtanh.f32 %v901_v22 }
  0xa1   :  { %v1299_v30 = vpop.eup %1298  ;;  %997 = vst [vmem:[%s1840_s3 + $0x8] sm:$0xff] %v1297_v29  ;;  %1302 = vtanh.f32 %v917_v23 }
  0xa2   :  { %1013 = vst [vmem:[%s1840_s3 + $0x88] sm:$0xff] %v1299_v30  ;;  %1304 = vtanh.f32 %v870_v27 }
  0xa3   :  { %1306 = vtanh.f32 %v886_v28 }
  0xa5   :  { %v594_v31 = vpop.f32.mrf.mxu2  ;;  %v634_v32 = vpop.f32.mrf.mxu3 }
  0xa6   :  { %v1301_v33 = vpop.eup %1300  ;;  %v902_v34 = vadd.f32 %v1579_v4, %v594_v31  ;;  %v918_v35 = vadd.f32 %v1579_v4, %v634_v32  ;;  %v516_v36 = vpop.f32.mrf.mxu0 }
  0xa7   :  { %v556_v37 = vpop.f32.mrf.mxu1  ;;  %v1303_v38 = vpop.eup %1302  ;;  %1029 = vst [vmem:[%s1840_s3 + $0x108] sm:$0xff] %v1301_v33  ;;  %v871_v39 = vadd.f32 %v1579_v4, %v516_v36 }
  0xa8   :  { %v887_v40 = vadd.f32 %v1579_v4, %v556_v37  ;;  %v1305_v41 = vpop.eup %1304  ;;  %1045 = vst [vmem:[%s1840_s3 + $0x188] sm:$0xff] %v1303_v38  ;;  %1308 = vtanh.f32 %v902_v34 }
  0xa9   :  { %v1307_v42 = vpop.eup %1306  ;;  %998 = vst [vmem:[%s1840_s3 + $0x10] sm:$0xff] %v1305_v41  ;;  %1310 = vtanh.f32 %v918_v35 }
  0xaa   :  { %1014 = vst [vmem:[%s1840_s3 + $0x90] sm:$0xff] %v1307_v42  ;;  %1312 = vtanh.f32 %v871_v39 }
  0xab   :  { %1314 = vtanh.f32 %v887_v40 }
  0xad   :  { %v596_v43 = vpop.f32.mrf.mxu2  ;;  %v636_v44 = vpop.f32.mrf.mxu3 }
  0xae   :  { %v1309_v45 = vpop.eup %1308  ;;  %v903_v46 = vadd.f32 %v1579_v4, %v596_v43  ;;  %v919_v47 = vadd.f32 %v1579_v4, %v636_v44  ;;  %v519_v48 = vpop.f32.mrf.mxu0 }
  0xaf   :  { %v559_v49 = vpop.f32.mrf.mxu1  ;;  %v1311_v50 = vpop.eup %1310  ;;  %1030 = vst [vmem:[%s1840_s3 + $0x110] sm:$0xff] %v1309_v45  ;;  %v872_v51 = vadd.f32 %v1579_v4, %v519_v48 }
  0xb0   :  { %v888_v52 = vadd.f32 %v1579_v4, %v559_v49  ;;  %v1313_v53 = vpop.eup %1312  ;;  %1046 = vst [vmem:[%s1840_s3 + $0x190] sm:$0xff] %v1311_v50  ;;  %1316 = vtanh.f32 %v903_v46 }
  0xb1   :  { %v1315_v54 = vpop.eup %1314  ;;  %999 = vst [vmem:[%s1840_s3 + $0x18] sm:$0xff] %v1313_v53  ;;  %1318 = vtanh.f32 %v919_v47 }
  0xb2   :  { %1015 = vst [vmem:[%s1840_s3 + $0x98] sm:$0xff] %v1315_v54  ;;  %1320 = vtanh.f32 %v872_v51 }
  0xb3   :  { %1322 = vtanh.f32 %v888_v52 }
  0xb5   :  { %v599_v55 = vpop.f32.mrf.mxu2  ;;  %v639_v56 = vpop.f32.mrf.mxu3 }
  0xb6   :  { %v1317_v57 = vpop.eup %1316  ;;  %v904_v58 = vadd.f32 %v1579_v4, %v599_v55  ;;  %v920_v59 = vadd.f32 %v1579_v4, %v639_v56  ;;  %v521_v60 = vpop.f32.mrf.mxu0 }
  0xb7   :  { %v561_v61 = vpop.f32.mrf.mxu1  ;;  %v1319_v62 = vpop.eup %1318  ;;  %1031 = vst [vmem:[%s1840_s3 + $0x118] sm:$0xff] %v1317_v57  ;;  %v873_v63 = vadd.f32 %v1579_v4, %v521_v60 }
  0xb8   :  { %v889_v0 = vadd.f32 %v1579_v4, %v561_v61  ;;  %v1321_v1 = vpop.eup %1320  ;;  %1047 = vst [vmem:[%s1840_s3 + $0x198] sm:$0xff] %v1319_v62  ;;  %1324 = vtanh.f32 %v904_v58 }
  0xb9   :  { %v1323_v2 = vpop.eup %1322  ;;  %1000 = vst [vmem:[%s1840_s3 + $0x20] sm:$0xff] %v1321_v1  ;;  %1326 = vtanh.f32 %v920_v59 }
  0xba   :  { %1016 = vst [vmem:[%s1840_s3 + $0xa0] sm:$0xff] %v1323_v2  ;;  %1328 = vtanh.f32 %v873_v63 }
  0xbb   :  { %1330 = vtanh.f32 %v889_v0 }
  0xbd   :  { %v601_v3 = vpop.f32.mrf.mxu2  ;;  %v641_v5 = vpop.f32.mrf.mxu3 }
  0xbe   :  { %v1325_v6 = vpop.eup %1324  ;;  %v905_v7 = vadd.f32 %v1579_v4, %v601_v3  ;;  %v921_v8 = vadd.f32 %v1579_v4, %v641_v5  ;;  %v524_v9 = vpop.f32.mrf.mxu0 }
  0xbf   :  { %v564_v10 = vpop.f32.mrf.mxu1  ;;  %v1327_v11 = vpop.eup %1326  ;;  %1032 = vst [vmem:[%s1840_s3 + $0x120] sm:$0xff] %v1325_v6  ;;  %v874_v12 = vadd.f32 %v1579_v4, %v524_v9 }
  0xc0   :  { %v890_v13 = vadd.f32 %v1579_v4, %v564_v10  ;;  %v1329_v14 = vpop.eup %1328  ;;  %1048 = vst [vmem:[%s1840_s3 + $0x1a0] sm:$0xff] %v1327_v11  ;;  %1332 = vtanh.f32 %v905_v7 }
  0xc1   :  { %v1331_v15 = vpop.eup %1330  ;;  %1001 = vst [vmem:[%s1840_s3 + $0x28] sm:$0xff] %v1329_v14  ;;  %1334 = vtanh.f32 %v921_v8 }
  0xc2   :  { %1017 = vst [vmem:[%s1840_s3 + $0xa8] sm:$0xff] %v1331_v15  ;;  %1336 = vtanh.f32 %v874_v12 }
  0xc3   :  { %1338 = vtanh.f32 %v890_v13 }
  0xc5   :  { %v604_v16 = vpop.f32.mrf.mxu2  ;;  %v644_v17 = vpop.f32.mrf.mxu3 }
  0xc6   :  { %v1333_v18 = vpop.eup %1332  ;;  %v906_v19 = vadd.f32 %v1579_v4, %v604_v16  ;;  %v922_v20 = vadd.f32 %v1579_v4, %v644_v17  ;;  %v526_v21 = vpop.f32.mrf.mxu0 }
  0xc7   :  { %v566_v22 = vpop.f32.mrf.mxu1  ;;  %v1335_v23 = vpop.eup %1334  ;;  %1033 = vst [vmem:[%s1840_s3 + $0x128] sm:$0xff] %v1333_v18  ;;  %v875_v24 = vadd.f32 %v1579_v4, %v526_v21 }
  0xc8   :  { %v891_v25 = vadd.f32 %v1579_v4, %v566_v22  ;;  %v1337_v26 = vpop.eup %1336  ;;  %1049 = vst [vmem:[%s1840_s3 + $0x1a8] sm:$0xff] %v1335_v23  ;;  %1340 = vtanh.f32 %v906_v19 }
  0xc9   :  { %v1339_v27 = vpop.eup %1338  ;;  %1002 = vst [vmem:[%s1840_s3 + $0x30] sm:$0xff] %v1337_v26  ;;  %1342 = vtanh.f32 %v922_v20 }
  0xca   :  { %1018 = vst [vmem:[%s1840_s3 + $0xb0] sm:$0xff] %v1339_v27  ;;  %1344 = vtanh.f32 %v875_v24 }
  0xcb   :  { %1346 = vtanh.f32 %v891_v25 }
  0xcd   :  { %v606_v28 = vpop.f32.mrf.mxu2  ;;  %v646_v29 = vpop.f32.mrf.mxu3 }
  0xce   :  { %v1341_v30 = vpop.eup %1340  ;;  %v907_v31 = vadd.f32 %v1579_v4, %v606_v28  ;;  %v923_v32 = vadd.f32 %v1579_v4, %v646_v29  ;;  %v529_v33 = vpop.f32.mrf.mxu0 }
  0xcf   :  { %v569_v34 = vpop.f32.mrf.mxu1  ;;  %v1343_v35 = vpop.eup %1342  ;;  %1034 = vst [vmem:[%s1840_s3 + $0x130] sm:$0xff] %v1341_v30  ;;  %v876_v36 = vadd.f32 %v1579_v4, %v529_v33 }
  0xd0   :  { %v892_v37 = vadd.f32 %v1579_v4, %v569_v34  ;;  %v1345_v38 = vpop.eup %1344  ;;  %1050 = vst [vmem:[%s1840_s3 + $0x1b0] sm:$0xff] %v1343_v35  ;;  %1348 = vtanh.f32 %v907_v31 }
  0xd1   :  { %v1347_v39 = vpop.eup %1346  ;;  %1003 = vst [vmem:[%s1840_s3 + $0x38] sm:$0xff] %v1345_v38  ;;  %1350 = vtanh.f32 %v923_v32 }
  0xd2   :  { %1019 = vst [vmem:[%s1840_s3 + $0xb8] sm:$0xff] %v1347_v39  ;;  %1352 = vtanh.f32 %v876_v36 }
  0xd3   :  { %1354 = vtanh.f32 %v892_v37 }
  0xd5   :  { %v609_v40 = vpop.f32.mrf.mxu2  ;;  %v649_v41 = vpop.f32.mrf.mxu3 }
  0xd6   :  { %v1349_v42 = vpop.eup %1348  ;;  %v908_v43 = vadd.f32 %v1579_v4, %v609_v40  ;;  %v924_v44 = vadd.f32 %v1579_v4, %v649_v41  ;;  %v531_v45 = vpop.f32.mrf.mxu0 }
  0xd7   :  { %v571_v46 = vpop.f32.mrf.mxu1  ;;  %v1351_v47 = vpop.eup %1350  ;;  %1035 = vst [vmem:[%s1840_s3 + $0x138] sm:$0xff] %v1349_v42  ;;  %v877_v48 = vadd.f32 %v1579_v4, %v531_v45 }
  0xd8   :  { %v893_v49 = vadd.f32 %v1579_v4, %v571_v46  ;;  %v1353_v50 = vpop.eup %1352  ;;  %1051 = vst [vmem:[%s1840_s3 + $0x1b8] sm:$0xff] %v1351_v47  ;;  %1356 = vtanh.f32 %v908_v43 }
  0xd9   :  { %v1355_v51 = vpop.eup %1354  ;;  %1004 = vst [vmem:[%s1840_s3 + $0x40] sm:$0xff] %v1353_v50  ;;  %1358 = vtanh.f32 %v924_v44 }
  0xda   :  { %1020 = vst [vmem:[%s1840_s3 + $0xc0] sm:$0xff] %v1355_v51  ;;  %1360 = vtanh.f32 %v877_v48 }
  0xdb   :  { %1362 = vtanh.f32 %v893_v49 }
  0xdd   :  { %v611_v52 = vpop.f32.mrf.mxu2  ;;  %v651_v53 = vpop.f32.mrf.mxu3 }
  0xde   :  { %v1357_v54 = vpop.eup %1356  ;;  %v909_v55 = vadd.f32 %v1579_v4, %v611_v52  ;;  %v925_v56 = vadd.f32 %v1579_v4, %v651_v53  ;;  %v534_v57 = vpop.f32.mrf.mxu0 }
  0xdf   :  { %v574_v58 = vpop.f32.mrf.mxu1  ;;  %v1359_v59 = vpop.eup %1358  ;;  %1036 = vst [vmem:[%s1840_s3 + $0x140] sm:$0xff] %v1357_v54  ;;  %v878_v60 = vadd.f32 %v1579_v4, %v534_v57 }
  0xe0   :  { %v894_v61 = vadd.f32 %v1579_v4, %v574_v58  ;;  %v1361_v62 = vpop.eup %1360  ;;  %1052 = vst [vmem:[%s1840_s3 + $0x1c0] sm:$0xff] %v1359_v59  ;;  %1364 = vtanh.f32 %v909_v55 }
  0xe1   :  { %v1363_v63 = vpop.eup %1362  ;;  %1005 = vst [vmem:[%s1840_s3 + $0x48] sm:$0xff] %v1361_v62  ;;  %1366 = vtanh.f32 %v925_v56 }
  0xe2   :  { %1021 = vst [vmem:[%s1840_s3 + $0xc8] sm:$0xff] %v1363_v63  ;;  %1368 = vtanh.f32 %v878_v60 }
  0xe3   :  { %1370 = vtanh.f32 %v894_v61 }
  0xe5   :  { %v614_v0 = vpop.f32.mrf.mxu2  ;;  %v654_v1 = vpop.f32.mrf.mxu3 }
  0xe6   :  { %v1365_v2 = vpop.eup %1364  ;;  %v910_v3 = vadd.f32 %v1579_v4, %v614_v0  ;;  %v926_v5 = vadd.f32 %v1579_v4, %v654_v1  ;;  %v536_v6 = vpop.f32.mrf.mxu0 }
  0xe7   :  { %v576_v7 = vpop.f32.mrf.mxu1  ;;  %v1367_v8 = vpop.eup %1366  ;;  %1037 = vst [vmem:[%s1840_s3 + $0x148] sm:$0xff] %v1365_v2  ;;  %v879_v9 = vadd.f32 %v1579_v4, %v536_v6 }
  0xe8   :  { %v895_v10 = vadd.f32 %v1579_v4, %v576_v7  ;;  %v1369_v11 = vpop.eup %1368  ;;  %1053 = vst [vmem:[%s1840_s3 + $0x1c8] sm:$0xff] %v1367_v8  ;;  %1372 = vtanh.f32 %v910_v3 }
  0xe9   :  { %v1371_v12 = vpop.eup %1370  ;;  %1006 = vst [vmem:[%s1840_s3 + $0x50] sm:$0xff] %v1369_v11  ;;  %1374 = vtanh.f32 %v926_v5 }
  0xea   :  { %1022 = vst [vmem:[%s1840_s3 + $0xd0] sm:$0xff] %v1371_v12  ;;  %1376 = vtanh.f32 %v879_v9 }
  0xeb   :  { %1378 = vtanh.f32 %v895_v10 }
  0xed   :  { %v616_v13 = vpop.f32.mrf.mxu2  ;;  %v656_v14 = vpop.f32.mrf.mxu3 }
  0xee   :  { %v1373_v15 = vpop.eup %1372  ;;  %v911_v16 = vadd.f32 %v1579_v4, %v616_v13  ;;  %v927_v17 = vadd.f32 %v1579_v4, %v656_v14  ;;  %v539_v18 = vpop.f32.mrf.mxu0 }
  0xef   :  { %v579_v19 = vpop.f32.mrf.mxu1  ;;  %v1375_v20 = vpop.eup %1374  ;;  %1038 = vst [vmem:[%s1840_s3 + $0x150] sm:$0xff] %v1373_v15  ;;  %v880_v21 = vadd.f32 %v1579_v4, %v539_v18 }
  0xf0   :  { %v896_v22 = vadd.f32 %v1579_v4, %v579_v19  ;;  %v1377_v23 = vpop.eup %1376  ;;  %1054 = vst [vmem:[%s1840_s3 + $0x1d0] sm:$0xff] %v1375_v20  ;;  %1380 = vtanh.f32 %v911_v16 }
  0xf1   :  { %v1379_v24 = vpop.eup %1378  ;;  %1007 = vst [vmem:[%s1840_s3 + $0x58] sm:$0xff] %v1377_v23  ;;  %1382 = vtanh.f32 %v927_v17 }
  0xf2   :  { %1023 = vst [vmem:[%s1840_s3 + $0xd8] sm:$0xff] %v1379_v24  ;;  %1384 = vtanh.f32 %v880_v21 }
  0xf3   :  { %1386 = vtanh.f32 %v896_v22 }
  0xf5   :  { %v619_v25 = vpop.f32.mrf.mxu2  ;;  %v659_v26 = vpop.f32.mrf.mxu3 }
  0xf6   :  { %v1381_v27 = vpop.eup %1380  ;;  %v912_v28 = vadd.f32 %v1579_v4, %v619_v25  ;;  %v928_v29 = vadd.f32 %v1579_v4, %v659_v26  ;;  %v541_v30 = vpop.f32.mrf.mxu0 }
  0xf7   :  { %v581_v31 = vpop.f32.mrf.mxu1  ;;  %v1383_v32 = vpop.eup %1382  ;;  %1039 = vst [vmem:[%s1840_s3 + $0x158] sm:$0xff] %v1381_v27  ;;  %v881_v33 = vadd.f32 %v1579_v4, %v541_v30 }
  0xf8   :  { %v897_v34 = vadd.f32 %v1579_v4, %v581_v31  ;;  %v1385_v35 = vpop.eup %1384  ;;  %1055 = vst [vmem:[%s1840_s3 + $0x1d8] sm:$0xff] %v1383_v32  ;;  %1388 = vtanh.f32 %v912_v28 }
  0xf9   :  { %v1387_v36 = vpop.eup %1386  ;;  %1008 = vst [vmem:[%s1840_s3 + $0x60] sm:$0xff] %v1385_v35  ;;  %1390 = vtanh.f32 %v928_v29 }
  0xfa   :  { %1024 = vst [vmem:[%s1840_s3 + $0xe0] sm:$0xff] %v1387_v36  ;;  %1392 = vtanh.f32 %v881_v33 }
  0xfb   :  { %1394 = vtanh.f32 %v897_v34 }
  0xfd   :  { %v621_v37 = vpop.f32.mrf.mxu2  ;;  %v661_v38 = vpop.f32.mrf.mxu3 }
  0xfe   :  { %v1389_v39 = vpop.eup %1388  ;;  %v913_v40 = vadd.f32 %v1579_v4, %v621_v37  ;;  %v929_v41 = vadd.f32 %v1579_v4, %v661_v38  ;;  %v544_v42 = vpop.f32.mrf.mxu0 }
  0xff   :  { %v584_v43 = vpop.f32.mrf.mxu1  ;;  %v1391_v44 = vpop.eup %1390  ;;  %1040 = vst [vmem:[%s1840_s3 + $0x160] sm:$0xff] %v1389_v39  ;;  %v882_v45 = vadd.f32 %v1579_v4, %v544_v42 }
 0x100   :  { %v898_v46 = vadd.f32 %v1579_v4, %v584_v43  ;;  %v1393_v47 = vpop.eup %1392  ;;  %1056 = vst [vmem:[%s1840_s3 + $0x1e0] sm:$0xff] %v1391_v44  ;;  %1396 = vtanh.f32 %v913_v40 }
 0x101   :  { %v1395_v48 = vpop.eup %1394  ;;  %1009 = vst [vmem:[%s1840_s3 + $0x68] sm:$0xff] %v1393_v47  ;;  %1398 = vtanh.f32 %v929_v41 }
 0x102   :  { %1025 = vst [vmem:[%s1840_s3 + $0xe8] sm:$0xff] %v1395_v48  ;;  %1400 = vtanh.f32 %v882_v45 }
 0x103   :  { %1402 = vtanh.f32 %v898_v46 }
 0x105   :  { %v624_v49 = vpop.f32.mrf.mxu2  ;;  %v664_v50 = vpop.f32.mrf.mxu3 }
 0x106   :  { %v1397_v51 = vpop.eup %1396  ;;  %v914_v52 = vadd.f32 %v1579_v4, %v624_v49  ;;  %v930_v53 = vadd.f32 %v1579_v4, %v664_v50  ;;  %v546_v54 = vpop.f32.mrf.mxu0 }
 0x107   :  { %v586_v55 = vpop.f32.mrf.mxu1  ;;  %v1399_v56 = vpop.eup %1398  ;;  %1041 = vst [vmem:[%s1840_s3 + $0x168] sm:$0xff] %v1397_v51  ;;  %v883_v57 = vadd.f32 %v1579_v4, %v546_v54 }
 0x108   :  { %v899_v58 = vadd.f32 %v1579_v4, %v586_v55  ;;  %v1401_v59 = vpop.eup %1400  ;;  %1057 = vst [vmem:[%s1840_s3 + $0x1e8] sm:$0xff] %v1399_v56  ;;  %1404 = vtanh.f32 %v914_v52 }
 0x109   :  { %v1403_v60 = vpop.eup %1402  ;;  %1010 = vst [vmem:[%s1840_s3 + $0x70] sm:$0xff] %v1401_v59  ;;  %1406 = vtanh.f32 %v930_v53 }
 0x10a   :  { %1026 = vst [vmem:[%s1840_s3 + $0xf0] sm:$0xff] %v1403_v60  ;;  %1408 = vtanh.f32 %v883_v57 }
 0x10b   :  { %1410 = vtanh.f32 %v899_v58 }
 0x10d   :  { %v626_v61 = vpop.f32.mrf.mxu2  ;;  %v666_v62 = vpop.f32.mrf.mxu3 }
 0x10e   :  { %v1405_v63 = vpop.eup %1404  ;;  %v915_v0 = vadd.f32 %v1579_v4, %v626_v61  ;;  %v931_v1 = vadd.f32 %v1579_v4, %v666_v62 }
 0x10f   :  { %v1407_v2 = vpop.eup %1406  ;;  %1042 = vst [vmem:[%s1840_s3 + $0x170] sm:$0xff] %v1405_v63 }
 0x110   :  { %v1409_v3 = vpop.eup %1408  ;;  %1058 = vst [vmem:[%s1840_s3 + $0x1f0] sm:$0xff] %v1407_v2  ;;  %1412 = vtanh.f32 %v915_v0 }
 0x111   :  { %v1411_v5 = vpop.eup %1410  ;;  %1011 = vst [vmem:[%s1840_s3 + $0x78] sm:$0xff] %v1409_v3  ;;  %1414 = vtanh.f32 %v931_v1 }
 0x112   :  { %1027 = vst [vmem:[%s1840_s3 + $0xf8] sm:$0xff] %v1411_v5 }
 0x116   :  { %v1413_v4 = vpop.eup %1412 }
 0x117   :  { %v1415_v6 = vpop.eup %1414  ;;  %1043 = vst [vmem:[%s1840_s3 + $0x178] sm:$0xff] %v1413_v4 }
 0x118   :  { %1059 = vst [vmem:[%s1840_s3 + $0x1f8] sm:$0xff] %v1415_v6 }

</bundles_post_ra>
